<compile_context>
chip_gen: v6e
topology: v6e:2x2x1
jax: 0.10.0
libtpu: 0.0.40
codegen_flags: <defaults>
</compile_context>

<pallas_src>
import functools

import jax
import jax.numpy as jnp
from jax import lax
from jax.experimental import pallas as pl
from jax.experimental.pallas import tpu as pltpu


def _round_up(x, m):
    return ((x + m - 1) // m) * m


def _vmem_limit_bytes():
    # Per-generation VMEM budget: ~100 MiB on v5e/v6e (128 MiB physical),
    # ~56 MiB on v7x (64 MiB physical).  Conservative fallback if the
    # trace-time query is unavailable.
    try:
        cap = int(pltpu.get_tpu_info().vmem_capacity_bytes)
        return min(cap - 8 * 1024 * 1024, 100 * 1024 * 1024)
    except Exception:
        return 56 * 1024 * 1024


# ----------------------------------------------------------------------------
# Fused multi-layer LSTM.  grid = (batch_split, nlayers).
#   axis 0 "parallel"  : independent batch halves (both v7x TensorCores)
#   axis 1 "arbitrary" : layers (sequential; weights pipelined per layer)
# ----------------------------------------------------------------------------
def _lstm_stack_kernel(x_ref, h0_ref, c0_ref, wih0_ref, wihr_ref, whh_ref,
                       b_ref, hall_ref, hT_ref, cT_ref, xproj_scr, *, seq_len):
    l = pl.program_id(1)
    Bc = hT_ref.shape[1]
    Hp = hT_ref.shape[2]

    bias = b_ref[0]                                       # (1, 4Hp) f32

    # Hoisted input projection: ONE big GEMM for all timesteps of this layer,
    # stored bf16 to halve the scratch footprint.  Only the small
    # (Bc,Hp)@(Hp,4Hp) recurrent matmul stays on the serial critical path.
    @pl.when(l == 0)
    def _():
        xproj_scr[...] = (
            jnp.dot(x_ref[...].astype(jnp.bfloat16), wih0_ref[...],
                    preferred_element_type=jnp.float32) + bias
        ).astype(xproj_scr.dtype)

    @pl.when(l > 0)
    def _():
        # Previous layer's full output is still resident in the output ref
        # (same h_all block across the layer axis) and is already bf16.
        xproj_scr[...] = (
            jnp.dot(hall_ref[...], wihr_ref[0],
                    preferred_element_type=jnp.float32) + bias
        ).astype(xproj_scr.dtype)

    whh_l = whh_ref[0]                                    # (Hp, 4Hp) bf16, loop-invariant
    h = h0_ref[0]                                         # (Bc, Hp) f32
    c = c0_ref[0]

    def step_at(row, h, c):
        gates = (xproj_scr[pl.ds(row, Bc), :].astype(jnp.float32)
                 + jnp.dot(h.astype(jnp.bfloat16), whh_l,
                           preferred_element_type=jnp.float32))    # (Bc, 4Hp) f32
        # PyTorch gate order i, f, g, o.  Hp is a multiple of 128 so each
        # slice is lane-tile aligned.  sigmoid written via tanh so all gate
        # nonlinearities use the same EUP op form (v5e review item).
        i_g = 0.5 * (jnp.tanh(0.5 * gates[:, 0 * Hp:1 * Hp]) + 1.0)
        f_g = 0.5 * (jnp.tanh(0.5 * gates[:, 1 * Hp:2 * Hp]) + 1.0)
        g_g = jnp.tanh(gates[:, 2 * Hp:3 * Hp])
        o_g = 0.5 * (jnp.tanh(0.5 * gates[:, 3 * Hp:4 * Hp]) + 1.0)
        c_n = f_g * c + i_g * g_g                         # state math stays f32
        h_n = o_g * jnp.tanh(c_n)
        hall_ref[pl.ds(row, Bc), :] = h_n.astype(hall_ref.dtype)
        return h_n, c_n

    if seq_len <= 16:
        # Short sequences: static unroll -> full LLO scheduling visibility.
        for t in range(seq_len):
            h, c = step_at(t * Bc, h, c)
    else:
        # Long sequences: bounded live ranges / instruction memory.
        def body(t, hc):
            return step_at(pl.multiple_of(t * Bc, Bc), *hc)
        h, c = lax.fori_loop(0, seq_len, body, (h, c), unroll=4)

    hT_ref[0] = h                                         # once per (split, layer)
    cT_ref[0] = c


def lstm_stack(x, h0, c0, layer_params):
    """Run all LSTM layers in one fused Pallas kernel.

    x: (S, B, I) float; h0/c0: (L, B, H) f32.
    layer_params: list of (w_ih (4H,in), w_hh (4H,H), b_ih (4H,), b_hh (4H,)).

    Returns padded results (padded entries are exactly zero):
      h_all (S, Bp, Hp) bf16   -- last layer's output sequence
      h_T, c_T (L, Bp, Hp) f32 -- final per-layer states
    """
    S, B, I = x.shape
    L, _, H = h0.shape
    Bp, Hp, Ip = _round_up(B, 8), _round_up(H, 128), _round_up(I, 128)
    # Leading "parallel" batch-split axis (v7x: one half per TensorCore).
    split = 2 if Bp % 16 == 0 else 1
    Bc = Bp // split

    # ---- zero-pad activations (zero pads keep padded h/c exactly zero) ----
    x_p = jnp.zeros((S, Bp, Ip), jnp.float32).at[:, :B, :I].set(x.astype(jnp.float32))
    h0_p = jnp.zeros((L, Bp, Hp), jnp.float32).at[:, :B, :H].set(h0.astype(jnp.float32))
    c0_p = jnp.zeros((L, Bp, Hp), jnp.float32).at[:, :B, :H].set(c0.astype(jnp.float32))
    # Core-major layout: each grid step sees a flat, lane-dense (S*Bc, .) slab
    # (layout plumbing done in the wrapper, not in the kernel).
    x_cm = (x_p.reshape(S, split, Bc, Ip).transpose(1, 0, 2, 3)
            .reshape(split, S * Bc, Ip))

    # ---- pad & transpose weights per gate block (PyTorch order i,f,g,o) ----
    def pad_wT(w, in_p):                     # (4H, in) -> (in_p, 4Hp) f32
        wt = w.T.astype(jnp.float32)
        inn = wt.shape[0]
        out = jnp.zeros((in_p, 4 * Hp), jnp.float32)
        for g in range(4):
            out = out.at[:inn, g * Hp:g * Hp + H].set(wt[:, g * H:(g + 1) * H])
        return out

    def pad_b(b):                            # (4H,) -> (1, 4Hp) f32
        out = jnp.zeros((1, 4 * Hp), jnp.float32)
        for g in range(4):
            out = out.at[0, g * Hp:g * Hp + H].set(b[g * H:(g + 1) * H])
        return out

    # MXU operands in bf16 (halves weight VMEM); bias / gate math stay f32.
    wih0_t = pad_wT(layer_params[0][0], Ip).astype(jnp.bfloat16)            # (Ip, 4Hp)
    if L > 1:
        wihr_t = jnp.stack([pad_wT(p[0], Hp) for p in layer_params[1:]]
                           ).astype(jnp.bfloat16)                           # (L-1, Hp, 4Hp)
    else:
        wihr_t = jnp.zeros((1, Hp, 4 * Hp), jnp.bfloat16)                   # unused dummy
    whh_t = jnp.stack([pad_wT(p[1], Hp) for p in layer_params]
                      ).astype(jnp.bfloat16)                                # (L, Hp, 4Hp)
    bias = jnp.stack([pad_b(p[2] + p[3]) for p in layer_params])            # (L, 1, 4Hp) f32

    kernel = functools.partial(_lstm_stack_kernel, seq_len=S)

    grid_spec = pltpu.PrefetchScalarGridSpec(
        num_scalar_prefetch=0,
        grid=(split, L),
        in_specs=[
            pl.BlockSpec((None, S * Bc, Ip), lambda c, l: (c, 0, 0)),        # x (per core)
            pl.BlockSpec((1, Bc, Hp), lambda c, l: (l, c, 0)),               # h0
            pl.BlockSpec((1, Bc, Hp), lambda c, l: (l, c, 0)),               # c0
            pl.BlockSpec((Ip, 4 * Hp), lambda c, l: (0, 0)),                 # W_ih^T layer 0
            pl.BlockSpec((1, Hp, 4 * Hp),
                         lambda c, l: (jnp.maximum(l - 1, 0), 0, 0)),        # W_ih^T layers 1..
            pl.BlockSpec((1, Hp, 4 * Hp), lambda c, l: (l, 0, 0)),           # W_hh^T
            pl.BlockSpec((1, 1, 4 * Hp), lambda c, l: (l, 0, 0)),            # b_ih + b_hh
        ],
        out_specs=[
            pl.BlockSpec((None, S * Bc, Hp), lambda c, l: (c, 0, 0)),        # h_all (resident)
            pl.BlockSpec((1, Bc, Hp), lambda c, l: (l, c, 0)),               # h_T
            pl.BlockSpec((1, Bc, Hp), lambda c, l: (l, c, 0)),               # c_T
        ],
        scratch_shapes=[pltpu.VMEM((S * Bc, 4 * Hp), jnp.bfloat16)],         # hoisted proj
    )

    out_shapes = (
        jax.ShapeDtypeStruct((split, S * Bc, Hp), jnp.bfloat16),
        jax.ShapeDtypeStruct((L, Bp, Hp), jnp.float32),
        jax.ShapeDtypeStruct((L, Bp, Hp), jnp.float32),
    )

    h_all_cm, h_T, c_T = pl.pallas_call(
        kernel,
        out_shape=out_shapes,
        grid_spec=grid_spec,
        compiler_params=pltpu.CompilerParams(
            dimension_semantics=("parallel", "arbitrary"),
            vmem_limit_bytes=_vmem_limit_bytes()),
    )(x_cm, h0_p, c0_p, wih0_t, wihr_t, whh_t, bias)

    # Undo the core-major layout (cheap: N*Hp bf16) before the decoder.
    h_all = (h_all_cm.reshape(split, S, Bc, Hp).transpose(1, 0, 2, 3)
             .reshape(S, Bp, Hp))
    return h_all, h_T, c_T


# ----------------------------------------------------------------------------
# Decoder linear: (N, Hp) @ (Hp, Vp) + b, vocab padded to a multiple of 128.
# Vocab grid axis outermost so the weight slab streams from HBM exactly once.
# ----------------------------------------------------------------------------
def _decoder_kernel(x_ref, w_ref, b_ref, o_ref):
    o_ref[...] = (jnp.dot(x_ref[...].astype(jnp.bfloat16), w_ref[...],
                          preferred_element_type=jnp.float32)
                  + b_ref[...])


def decoder_linear(x2d, w_dec, b_dec):
    """x2d: (N, Hp) bf16 (H zero-padded); w_dec: (V, H); b_dec: (V,).
    Returns padded logits (N, Vp) f32, Vp = V rounded up to 128."""
    N, Hp = x2d.shape
    V, H = w_dec.shape
    Vp = _round_up(V, 128)
    Np = _round_up(N, 8)                       # row tiles always multiples of 8
    if Np != N:
        x2d = jnp.zeros((Np, Hp), x2d.dtype).at[:N].set(x2d)

    w_t = jnp.zeros((Hp, Vp), jnp.bfloat16).at[:H, :V].set(
        w_dec.T.astype(jnp.bfloat16))
    b2 = jnp.zeros((1, Vp), jnp.float32).at[:, :V].set(b_dec.astype(jnp.float32))

    tn = next(t for t in (512, 256, 128, 64, 32, 16, 8) if Np % t == 0)
    tv = next(t for t in (512, 256, 128) if Vp % t == 0)
    grid = (Vp // tv, Np // tn)                # vocab outermost, rows innermost

    out = pl.pallas_call(
        _decoder_kernel,
        out_shape=jax.ShapeDtypeStruct((Np, Vp), jnp.float32),
        grid_spec=pltpu.PrefetchScalarGridSpec(
            num_scalar_prefetch=0,
            grid=grid,
            in_specs=[
                pl.BlockSpec((tn, Hp), lambda j, i: (i, 0)),
                pl.BlockSpec((Hp, tv), lambda j, i: (0, j)),
                pl.BlockSpec((1, tv), lambda j, i: (0, j)),
            ],
            out_specs=pl.BlockSpec((tn, tv), lambda j, i: (i, j)),
        ),
        compiler_params=pltpu.CompilerParams(
            dimension_semantics=("parallel", "parallel"),
            vmem_limit_bytes=_vmem_limit_bytes()),
    )(x2d, w_t, b2)
    return out if Np == N else out[:N]


# ----------------------------------------------------------------------------
# RNNModel (LSTM variant) forward, parameters built in-script.
# ----------------------------------------------------------------------------
class RNNModelParams:
    """Parameters for RNNModel(rnn_type='LSTM', ...) with initWeights semantics."""

    def __init__(self, key, n_tks, ninp, nhid, nlayers):
        self.n_tks, self.ninp, self.nhid, self.nlayers = n_tks, ninp, nhid, nlayers
        ks = jax.random.split(key, 2 + 4 * nlayers)
        initrange = 0.1
        self.enc_w = jax.random.uniform(ks[0], (n_tks, ninp), jnp.float32,
                                        -initrange, initrange)
        self.dec_w = jax.random.uniform(ks[1], (n_tks, nhid), jnp.float32,
                                        -initrange, initrange)
        self.dec_b = jnp.zeros((n_tks,), jnp.float32)
        bound = 1.0 / (nhid ** 0.5)            # PyTorch nn.LSTM default init
        self.lstm = []
        for l in range(nlayers):
            in_size = ninp if l == 0 else nhid
            k = ks[2 + 4 * l: 2 + 4 * (l + 1)]
            self.lstm.append((
                jax.random.uniform(k[0], (4 * nhid, in_size), jnp.float32, -bound, bound),
                jax.random.uniform(k[1], (4 * nhid, nhid), jnp.float32, -bound, bound),
                jax.random.uniform(k[2], (4 * nhid,), jnp.float32, -bound, bound),
                jax.random.uniform(k[3], (4 * nhid,), jnp.float32, -bound, bound),
            ))


def rnn_model_forward(params, input_, hidden):
    """input_: (S, B) int32 token ids; hidden = (h0, c0), each (nlayers, B, nhid)."""
    h0, c0 = hidden
    S, B = input_.shape
    # encoder: embedding gather (glue in plain JAX; no clean Pallas equivalent)
    embed = jnp.take(params.enc_w, input_, axis=0)                 # (S, B, ninp)
    # dropout: identity (eval mode)  # TODO(synk): training-mode dropout not implemented
    h_all, h_T, c_T = lstm_stack(embed, h0, c0, params.lstm)       # padded outputs
    _, Bp, Hp = h_all.shape
    logits_p = decoder_linear(h_all.reshape(S * Bp, Hp),
                              params.dec_w, params.dec_b)          # (S*Bp, Vp) f32
    Vp = logits_p.shape[-1]
    logits = logits_p.reshape(S, Bp, Vp)
    # Only slice when padding was actually inserted (avoid the extra copy).
    if Bp != B or Vp != params.n_tks:
        logits = logits[:, :B, :params.n_tks]
    h_T = h_T[:, :B, :params.nhid]
    c_T = c_T[:, :B, :params.nhid]
    return logits, (h_T, c_T)


if __name__ == "__main__":
    # Small but lane/sublane-aligned shapes (review: batch multiple of 8,
    # hidden/embed multiples of 128, vocab multiple of 128).
    n_tks, ninp, nhid, nlayers = 256, 128, 128, 2
    seq_len, batch = 8, 16

    key = jax.random.PRNGKey(0)
    k_param, k_tok = jax.random.split(key)
    params = RNNModelParams(k_param, n_tks, ninp, nhid, nlayers)

    input_ = jax.random.randint(k_tok, (seq_len, batch), 0, n_tks, dtype=jnp.int32)
    hidden = (jnp.zeros((nlayers, batch, nhid), jnp.float32),
              jnp.zeros((nlayers, batch, nhid), jnp.float32))

    logits, (hT, cT) = rnn_model_forward(params, input_, hidden)
    jax.block_until_ready(logits)
    jax.block_until_ready(hT)
    jax.block_until_ready(cT)

    assert logits.shape == (seq_len, batch, n_tks)
    assert hT.shape == (nlayers, batch, nhid)
    assert cT.shape == (nlayers, batch, nhid)
    assert bool(jnp.isfinite(logits).all())
    assert bool(jnp.isfinite(hT).all()) and bool(jnp.isfinite(cT).all())
    print("KERNEL_OK")
</pallas_src>

<mosaic_0001>
module attributes {stable_mosaic.version = 11 : i64} {
  func.func @_lstm_stack_kernel(%arg0: i32, %arg1: i32, %arg2: memref<1x64x128xf32, #tpu.memory_space<vmem>>, %arg3: memref<1x8x128xf32, #tpu.memory_space<vmem>>, %arg4: memref<1x8x128xf32, #tpu.memory_space<vmem>>, %arg5: memref<128x512xbf16, #tpu.memory_space<vmem>>, %arg6: memref<1x128x512xbf16, #tpu.memory_space<vmem>>, %arg7: memref<1x128x512xbf16, #tpu.memory_space<vmem>>, %arg8: memref<1x1x512xf32, #tpu.memory_space<vmem>>, %arg9: memref<1x64x128xbf16, #tpu.memory_space<vmem>>, %arg10: memref<1x8x128xf32, #tpu.memory_space<vmem>>, %arg11: memref<1x8x128xf32, #tpu.memory_space<vmem>>, %arg12: memref<64x512xbf16, #tpu.memory_space<vmem>>) attributes {dimension_semantics = [#tpu.dimension_semantics<parallel>, #tpu.dimension_semantics<arbitrary>], iteration_bounds = array<i64: 2, 2>, scalar_prefetch = 0 : i64, scratch_operands = 1 : i64, tpu.core_type = #tpu.core_type<tc>, window_params = [{transform_indices = @transform_0, window_bounds = array<i64: 1, 64, 128>}, {transform_indices = @transform_1, window_bounds = array<i64: 1, 8, 128>}, {transform_indices = @transform_2, window_bounds = array<i64: 1, 8, 128>}, {pipeline_mode = #tpu.pipeline_mode<synchronous>, transform_indices = @transform_3, window_bounds = array<i64: 128, 512>}, {transform_indices = @transform_4, window_bounds = array<i64: 1, 128, 512>}, {transform_indices = @transform_5, window_bounds = array<i64: 1, 128, 512>}, {transform_indices = @transform_6, window_bounds = array<i64: 1, 1, 512>}, {transform_indices = @transform_7, window_bounds = array<i64: 1, 64, 128>}, {transform_indices = @transform_8, window_bounds = array<i64: 1, 8, 128>}, {transform_indices = @transform_9, window_bounds = array<i64: 1, 8, 128>}]} {
    %c0 = arith.constant 0 : index
    %c0_0 = arith.constant 0 : index
    %c0_1 = arith.constant 0 : index
    %0 = vector.load %arg8[%c0, %c0_0, %c0_1] : memref<1x1x512xf32, #tpu.memory_space<vmem>>, vector<1x1x512xf32>
    %1 = vector.shape_cast %0 : vector<1x1x512xf32> to vector<1x512xf32>
    %c0_i32 = arith.constant 0 : i32
    %2 = arith.cmpi eq, %arg1, %c0_i32 : i32
    %3 = arith.extui %2 : i1 to i32
    %c0_i32_2 = arith.constant 0 : i32
    %4 = arith.cmpi ne, %3, %c0_i32_2 : i32
    scf.if %4 {
      %c0_132 = arith.constant 0 : index
      %c0_133 = arith.constant 0 : index
      %c0_134 = arith.constant 0 : index
      %340 = vector.load %arg2[%c0_132, %c0_133, %c0_134] : memref<1x64x128xf32, #tpu.memory_space<vmem>>, vector<1x64x128xf32>
      %341 = vector.shape_cast %340 : vector<1x64x128xf32> to vector<64x128xf32>
      %342 = arith.truncf %341 : vector<64x128xf32> to vector<64x128xbf16>
      %c0_135 = arith.constant 0 : index
      %c0_136 = arith.constant 0 : index
      %343 = vector.load %arg5[%c0_135, %c0_136] : memref<128x512xbf16, #tpu.memory_space<vmem>>, vector<128x512xbf16>
      %cst_137 = arith.constant dense<0.000000e+00> : vector<64x512xf32>
      %344 = tpu.matmul %342, %343, %cst_137 {dimension_numbers = #tpu.dot_dimension_numbers<[1], [0], [0], [1], [0, 0, 1, 1], [], []>} : vector<64x128xbf16>, vector<128x512xbf16>, vector<64x512xf32> -> vector<64x512xf32>
      %345 = vector.broadcast %1 : vector<1x512xf32> to vector<64x512xf32>
      %346 = arith.addf %344, %345 : vector<64x512xf32>
      %347 = arith.truncf %346 : vector<64x512xf32> to vector<64x512xbf16>
      %c0_138 = arith.constant 0 : index
      %c0_139 = arith.constant 0 : index
      %348 = vector.load %arg12[%c0_138, %c0_139] : memref<64x512xbf16, #tpu.memory_space<vmem>>, vector<64x512xbf16>
      tpu.vector_store %arg12[%c0_138, %c0_139], %347 {strides = array<i32>} : memref<64x512xbf16, #tpu.memory_space<vmem>>, vector<64x512xbf16>,
    } else {
    }
    %c0_i32_3 = arith.constant 0 : i32
    %5 = arith.cmpi sgt, %arg1, %c0_i32_3 : i32
    %6 = arith.extui %5 : i1 to i32
    %c0_i32_4 = arith.constant 0 : i32
    %7 = arith.cmpi ne, %6, %c0_i32_4 : i32
    scf.if %7 {
      %c0_132 = arith.constant 0 : index
      %c0_133 = arith.constant 0 : index
      %c0_134 = arith.constant 0 : index
      %340 = vector.load %arg9[%c0_132, %c0_133, %c0_134] : memref<1x64x128xbf16, #tpu.memory_space<vmem>>, vector<1x64x128xbf16>
      %341 = vector.shape_cast %340 : vector<1x64x128xbf16> to vector<64x128xbf16>
      %c0_135 = arith.constant 0 : index
      %c0_136 = arith.constant 0 : index
      %c0_137 = arith.constant 0 : index
      %342 = vector.load %arg6[%c0_135, %c0_136, %c0_137] : memref<1x128x512xbf16, #tpu.memory_space<vmem>>, vector<1x128x512xbf16>
      %343 = vector.shape_cast %342 : vector<1x128x512xbf16> to vector<128x512xbf16>
      %cst_138 = arith.constant dense<0.000000e+00> : vector<64x512xf32>
      %344 = tpu.matmul %341, %343, %cst_138 {dimension_numbers = #tpu.dot_dimension_numbers<[1], [0], [0], [1], [0, 0, 1, 1], [], []>} : vector<64x128xbf16>, vector<128x512xbf16>, vector<64x512xf32> -> vector<64x512xf32>
      %345 = vector.broadcast %1 : vector<1x512xf32> to vector<64x512xf32>
      %346 = arith.addf %344, %345 : vector<64x512xf32>
      %347 = arith.truncf %346 : vector<64x512xf32> to vector<64x512xbf16>
      %c0_139 = arith.constant 0 : index
      %c0_140 = arith.constant 0 : index
      %348 = vector.load %arg12[%c0_139, %c0_140] : memref<64x512xbf16, #tpu.memory_space<vmem>>, vector<64x512xbf16>
      tpu.vector_store %arg12[%c0_139, %c0_140], %347 {strides = array<i32>} : memref<64x512xbf16, #tpu.memory_space<vmem>>, vector<64x512xbf16>,
    } else {
    }
    %c0_5 = arith.constant 0 : index
    %c0_6 = arith.constant 0 : index
    %c0_7 = arith.constant 0 : index
    %8 = vector.load %arg7[%c0_5, %c0_6, %c0_7] : memref<1x128x512xbf16, #tpu.memory_space<vmem>>, vector<1x128x512xbf16>
    %9 = vector.shape_cast %8 : vector<1x128x512xbf16> to vector<128x512xbf16>
    %c0_8 = arith.constant 0 : index
    %c0_9 = arith.constant 0 : index
    %c0_10 = arith.constant 0 : index
    %10 = vector.load %arg3[%c0_8, %c0_9, %c0_10] : memref<1x8x128xf32, #tpu.memory_space<vmem>>, vector<1x8x128xf32>
    %11 = vector.shape_cast %10 : vector<1x8x128xf32> to vector<8x128xf32>
    %c0_11 = arith.constant 0 : index
    %c0_12 = arith.constant 0 : index
    %c0_13 = arith.constant 0 : index
    %12 = vector.load %arg4[%c0_11, %c0_12, %c0_13] : memref<1x8x128xf32, #tpu.memory_space<vmem>>, vector<1x8x128xf32>
    %13 = vector.shape_cast %12 : vector<1x8x128xf32> to vector<8x128xf32>
    %c0_14 = arith.constant 0 : index
    %c0_15 = arith.constant 0 : index
    %14 = vector.load %arg12[%c0_14, %c0_15] : memref<64x512xbf16, #tpu.memory_space<vmem>>, vector<8x512xbf16>
    %15 = arith.extf %14 : vector<8x512xbf16> to vector<8x512xf32>
    %16 = arith.truncf %11 : vector<8x128xf32> to vector<8x128xbf16>
    %cst = arith.constant dense<0.000000e+00> : vector<8x512xf32>
    %17 = tpu.matmul %16, %9, %cst {dimension_numbers = #tpu.dot_dimension_numbers<[1], [0], [0], [1], [0, 0, 1, 1], [], []>} : vector<8x128xbf16>, vector<128x512xbf16>, vector<8x512xf32> -> vector<8x512xf32>
    %18 = arith.addf %15, %17 : vector<8x512xf32>
    %19 = vector.extract_strided_slice %18 {offsets = [0, 0], sizes = [8, 128], strides = [1, 1]} : vector<8x512xf32> to vector<8x128xf32>
    %cst_16 = arith.constant 5.000000e-01 : f32
    %20 = vector.broadcast %cst_16 : f32 to vector<8x128xf32>
    %21 = arith.mulf %20, %19 : vector<8x128xf32>
    %22 = math.tanh %21 : vector<8x128xf32>
    %cst_17 = arith.constant 1.000000e+00 : f32
    %23 = vector.broadcast %cst_17 : f32 to vector<8x128xf32>
    %24 = arith.addf %22, %23 : vector<8x128xf32>
    %cst_18 = arith.constant 5.000000e-01 : f32
    %25 = vector.broadcast %cst_18 : f32 to vector<8x128xf32>
    %26 = arith.mulf %25, %24 : vector<8x128xf32>
    %27 = vector.extract_strided_slice %18 {offsets = [0, 128], sizes = [8, 128], strides = [1, 1]} : vector<8x512xf32> to vector<8x128xf32>
    %cst_19 = arith.constant 5.000000e-01 : f32
    %28 = vector.broadcast %cst_19 : f32 to vector<8x128xf32>
    %29 = arith.mulf %28, %27 : vector<8x128xf32>
    %30 = math.tanh %29 : vector<8x128xf32>
    %cst_20 = arith.constant 1.000000e+00 : f32
    %31 = vector.broadcast %cst_20 : f32 to vector<8x128xf32>
    %32 = arith.addf %30, %31 : vector<8x128xf32>
    %cst_21 = arith.constant 5.000000e-01 : f32
    %33 = vector.broadcast %cst_21 : f32 to vector<8x128xf32>
    %34 = arith.mulf %33, %32 : vector<8x128xf32>
    %35 = vector.extract_strided_slice %18 {offsets = [0, 256], sizes = [8, 128], strides = [1, 1]} : vector<8x512xf32> to vector<8x128xf32>
    %36 = math.tanh %35 : vector<8x128xf32>
    %37 = vector.extract_strided_slice %18 {offsets = [0, 384], sizes = [8, 128], strides = [1, 1]} : vector<8x512xf32> to vector<8x128xf32>
    %cst_22 = arith.constant 5.000000e-01 : f32
    %38 = vector.broadcast %cst_22 : f32 to vector<8x128xf32>
    %39 = arith.mulf %38, %37 : vector<8x128xf32>
    %40 = math.tanh %39 : vector<8x128xf32>
    %cst_23 = arith.constant 1.000000e+00 : f32
    %41 = vector.broadcast %cst_23 : f32 to vector<8x128xf32>
    %42 = arith.addf %40, %41 : vector<8x128xf32>
    %cst_24 = arith.constant 5.000000e-01 : f32
    %43 = vector.broadcast %cst_24 : f32 to vector<8x128xf32>
    %44 = arith.mulf %43, %42 : vector<8x128xf32>
    %45 = arith.mulf %34, %13 : vector<8x128xf32>
    %46 = arith.mulf %26, %36 : vector<8x128xf32>
    %47 = arith.addf %45, %46 : vector<8x128xf32>
    %48 = math.tanh %47 : vector<8x128xf32>
    %49 = arith.mulf %44, %48 : vector<8x128xf32>
    %50 = arith.truncf %49 : vector<8x128xf32> to vector<8x128xbf16>
    %c0_25 = arith.constant 0 : index
    %c0_26 = arith.constant 0 : index
    %c0_27 = arith.constant 0 : index
    %51 = vector.load %arg9[%c0_25, %c0_26, %c0_27] : memref<1x64x128xbf16, #tpu.memory_space<vmem>>, vector<1x8x128xbf16>
    %52 = vector.shape_cast %51 : vector<1x8x128xbf16> to vector<8x128xbf16>
    %53 = vector.shape_cast %50 : vector<8x128xbf16> to vector<1x8x128xbf16>
    tpu.vector_store %arg9[%c0_25, %c0_26, %c0_27], %53 {strides = array<i32>} : memref<1x64x128xbf16, #tpu.memory_space<vmem>>, vector<1x8x128xbf16>,
    %c8 = arith.constant 8 : index
    %c0_28 = arith.constant 0 : index
    %54 = vector.load %arg12[%c8, %c0_28] : memref<64x512xbf16, #tpu.memory_space<vmem>>, vector<8x512xbf16>
    %55 = arith.extf %54 : vector<8x512xbf16> to vector<8x512xf32>
    %56 = arith.truncf %49 : vector<8x128xf32> to vector<8x128xbf16>
    %cst_29 = arith.constant dense<0.000000e+00> : vector<8x512xf32>
    %57 = tpu.matmul %56, %9, %cst_29 {dimension_numbers = #tpu.dot_dimension_numbers<[1], [0], [0], [1], [0, 0, 1, 1], [], []>} : vector<8x128xbf16>, vector<128x512xbf16>, vector<8x512xf32> -> vector<8x512xf32>
    %58 = arith.addf %55, %57 : vector<8x512xf32>
    %59 = vector.extract_strided_slice %58 {offsets = [0, 0], sizes = [8, 128], strides = [1, 1]} : vector<8x512xf32> to vector<8x128xf32>
    %cst_30 = arith.constant 5.000000e-01 : f32
    %60 = vector.broadcast %cst_30 : f32 to vector<8x128xf32>
    %61 = arith.mulf %60, %59 : vector<8x128xf32>
    %62 = math.tanh %61 : vector<8x128xf32>
    %cst_31 = arith.constant 1.000000e+00 : f32
    %63 = vector.broadcast %cst_31 : f32 to vector<8x128xf32>
    %64 = arith.addf %62, %63 : vector<8x128xf32>
    %cst_32 = arith.constant 5.000000e-01 : f32
    %65 = vector.broadcast %cst_32 : f32 to vector<8x128xf32>
    %66 = arith.mulf %65, %64 : vector<8x128xf32>
    %67 = vector.extract_strided_slice %58 {offsets = [0, 128], sizes = [8, 128], strides = [1, 1]} : vector<8x512xf32> to vector<8x128xf32>
    %cst_33 = arith.constant 5.000000e-01 : f32
    %68 = vector.broadcast %cst_33 : f32 to vector<8x128xf32>
    %69 = arith.mulf %68, %67 : vector<8x128xf32>
    %70 = math.tanh %69 : vector<8x128xf32>
    %cst_34 = arith.constant 1.000000e+00 : f32
    %71 = vector.broadcast %cst_34 : f32 to vector<8x128xf32>
    %72 = arith.addf %70, %71 : vector<8x128xf32>
    %cst_35 = arith.constant 5.000000e-01 : f32
    %73 = vector.broadcast %cst_35 : f32 to vector<8x128xf32>
    %74 = arith.mulf %73, %72 : vector<8x128xf32>
    %75 = vector.extract_strided_slice %58 {offsets = [0, 256], sizes = [8, 128], strides = [1, 1]} : vector<8x512xf32> to vector<8x128xf32>
    %76 = math.tanh %75 : vector<8x128xf32>
    %77 = vector.extract_strided_slice %58 {offsets = [0, 384], sizes = [8, 128], strides = [1, 1]} : vector<8x512xf32> to vector<8x128xf32>
    %cst_36 = arith.constant 5.000000e-01 : f32
    %78 = vector.broadcast %cst_36 : f32 to vector<8x128xf32>
    %79 = arith.mulf %78, %77 : vector<8x128xf32>
    %80 = math.tanh %79 : vector<8x128xf32>
    %cst_37 = arith.constant 1.000000e+00 : f32
    %81 = vector.broadcast %cst_37 : f32 to vector<8x128xf32>
    %82 = arith.addf %80, %81 : vector<8x128xf32>
    %cst_38 = arith.constant 5.000000e-01 : f32
    %83 = vector.broadcast %cst_38 : f32 to vector<8x128xf32>
    %84 = arith.mulf %83, %82 : vector<8x128xf32>
    %85 = arith.mulf %74, %47 : vector<8x128xf32>
    %86 = arith.mulf %66, %76 : vector<8x128xf32>
    %87 = arith.addf %85, %86 : vector<8x128xf32>
    %88 = math.tanh %87 : vector<8x128xf32>
    %89 = arith.mulf %84, %88 : vector<8x128xf32>
    %90 = arith.truncf %89 : vector<8x128xf32> to vector<8x128xbf16>
    %c0_39 = arith.constant 0 : index
    %c8_40 = arith.constant 8 : index
    %c0_41 = arith.constant 0 : index
    %91 = vector.load %arg9[%c0_39, %c8_40, %c0_41] : memref<1x64x128xbf16, #tpu.memory_space<vmem>>, vector<1x8x128xbf16>
    %92 = vector.shape_cast %91 : vector<1x8x128xbf16> to vector<8x128xbf16>
    %93 = vector.shape_cast %90 : vector<8x128xbf16> to vector<1x8x128xbf16>
    tpu.vector_store %arg9[%c0_39, %c8_40, %c0_41], %93 {strides = array<i32>} : memref<1x64x128xbf16, #tpu.memory_space<vmem>>, vector<1x8x128xbf16>,
    %c16 = arith.constant 16 : index
    %c0_42 = arith.constant 0 : index
    %94 = vector.load %arg12[%c16, %c0_42] : memref<64x512xbf16, #tpu.memory_space<vmem>>, vector<8x512xbf16>
    %95 = arith.extf %94 : vector<8x512xbf16> to vector<8x512xf32>
    %96 = arith.truncf %89 : vector<8x128xf32> to vector<8x128xbf16>
    %cst_43 = arith.constant dense<0.000000e+00> : vector<8x512xf32>
    %97 = tpu.matmul %96, %9, %cst_43 {dimension_numbers = #tpu.dot_dimension_numbers<[1], [0], [0], [1], [0, 0, 1, 1], [], []>} : vector<8x128xbf16>, vector<128x512xbf16>, vector<8x512xf32> -> vector<8x512xf32>
    %98 = arith.addf %95, %97 : vector<8x512xf32>
    %99 = vector.extract_strided_slice %98 {offsets = [0, 0], sizes = [8, 128], strides = [1, 1]} : vector<8x512xf32> to vector<8x128xf32>
    %cst_44 = arith.constant 5.000000e-01 : f32
    %100 = vector.broadcast %cst_44 : f32 to vector<8x128xf32>
    %101 = arith.mulf %100, %99 : vector<8x128xf32>
    %102 = math.tanh %101 : vector<8x128xf32>
    %cst_45 = arith.constant 1.000000e+00 : f32
    %103 = vector.broadcast %cst_45 : f32 to vector<8x128xf32>
    %104 = arith.addf %102, %103 : vector<8x128xf32>
    %cst_46 = arith.constant 5.000000e-01 : f32
    %105 = vector.broadcast %cst_46 : f32 to vector<8x128xf32>
    %106 = arith.mulf %105, %104 : vector<8x128xf32>
    %107 = vector.extract_strided_slice %98 {offsets = [0, 128], sizes = [8, 128], strides = [1, 1]} : vector<8x512xf32> to vector<8x128xf32>
    %cst_47 = arith.constant 5.000000e-01 : f32
    %108 = vector.broadcast %cst_47 : f32 to vector<8x128xf32>
    %109 = arith.mulf %108, %107 : vector<8x128xf32>
    %110 = math.tanh %109 : vector<8x128xf32>
    %cst_48 = arith.constant 1.000000e+00 : f32
    %111 = vector.broadcast %cst_48 : f32 to vector<8x128xf32>
    %112 = arith.addf %110, %111 : vector<8x128xf32>
    %cst_49 = arith.constant 5.000000e-01 : f32
    %113 = vector.broadcast %cst_49 : f32 to vector<8x128xf32>
    %114 = arith.mulf %113, %112 : vector<8x128xf32>
    %115 = vector.extract_strided_slice %98 {offsets = [0, 256], sizes = [8, 128], strides = [1, 1]} : vector<8x512xf32> to vector<8x128xf32>
    %116 = math.tanh %115 : vector<8x128xf32>
    %117 = vector.extract_strided_slice %98 {offsets = [0, 384], sizes = [8, 128], strides = [1, 1]} : vector<8x512xf32> to vector<8x128xf32>
    %cst_50 = arith.constant 5.000000e-01 : f32
    %118 = vector.broadcast %cst_50 : f32 to vector<8x128xf32>
    %119 = arith.mulf %118, %117 : vector<8x128xf32>
    %120 = math.tanh %119 : vector<8x128xf32>
    %cst_51 = arith.constant 1.000000e+00 : f32
    %121 = vector.broadcast %cst_51 : f32 to vector<8x128xf32>
    %122 = arith.addf %120, %121 : vector<8x128xf32>
    %cst_52 = arith.constant 5.000000e-01 : f32
    %123 = vector.broadcast %cst_52 : f32 to vector<8x128xf32>
    %124 = arith.mulf %123, %122 : vector<8x128xf32>
    %125 = arith.mulf %114, %87 : vector<8x128xf32>
    %126 = arith.mulf %106, %116 : vector<8x128xf32>
    %127 = arith.addf %125, %126 : vector<8x128xf32>
    %128 = math.tanh %127 : vector<8x128xf32>
    %129 = arith.mulf %124, %128 : vector<8x128xf32>
    %130 = arith.truncf %129 : vector<8x128xf32> to vector<8x128xbf16>
    %c0_53 = arith.constant 0 : index
    %c16_54 = arith.constant 16 : index
    %c0_55 = arith.constant 0 : index
    %131 = vector.load %arg9[%c0_53, %c16_54, %c0_55] : memref<1x64x128xbf16, #tpu.memory_space<vmem>>, vector<1x8x128xbf16>
    %132 = vector.shape_cast %131 : vector<1x8x128xbf16> to vector<8x128xbf16>
    %133 = vector.shape_cast %130 : vector<8x128xbf16> to vector<1x8x128xbf16>
    tpu.vector_store %arg9[%c0_53, %c16_54, %c0_55], %133 {strides = array<i32>} : memref<1x64x128xbf16, #tpu.memory_space<vmem>>, vector<1x8x128xbf16>,
    %c24 = arith.constant 24 : index
    %c0_56 = arith.constant 0 : index
    %134 = vector.load %arg12[%c24, %c0_56] : memref<64x512xbf16, #tpu.memory_space<vmem>>, vector<8x512xbf16>
    %135 = arith.extf %134 : vector<8x512xbf16> to vector<8x512xf32>
    %136 = arith.truncf %129 : vector<8x128xf32> to vector<8x128xbf16>
    %cst_57 = arith.constant dense<0.000000e+00> : vector<8x512xf32>
    %137 = tpu.matmul %136, %9, %cst_57 {dimension_numbers = #tpu.dot_dimension_numbers<[1], [0], [0], [1], [0, 0, 1, 1], [], []>} : vector<8x128xbf16>, vector<128x512xbf16>, vector<8x512xf32> -> vector<8x512xf32>
    %138 = arith.addf %135, %137 : vector<8x512xf32>
    %139 = vector.extract_strided_slice %138 {offsets = [0, 0], sizes = [8, 128], strides = [1, 1]} : vector<8x512xf32> to vector<8x128xf32>
    %cst_58 = arith.constant 5.000000e-01 : f32
    %140 = vector.broadcast %cst_58 : f32 to vector<8x128xf32>
    %141 = arith.mulf %140, %139 : vector<8x128xf32>
    %142 = math.tanh %141 : vector<8x128xf32>
    %cst_59 = arith.constant 1.000000e+00 : f32
    %143 = vector.broadcast %cst_59 : f32 to vector<8x128xf32>
    %144 = arith.addf %142, %143 : vector<8x128xf32>
    %cst_60 = arith.constant 5.000000e-01 : f32
    %145 = vector.broadcast %cst_60 : f32 to vector<8x128xf32>
    %146 = arith.mulf %145, %144 : vector<8x128xf32>
    %147 = vector.extract_strided_slice %138 {offsets = [0, 128], sizes = [8, 128], strides = [1, 1]} : vector<8x512xf32> to vector<8x128xf32>
    %cst_61 = arith.constant 5.000000e-01 : f32
    %148 = vector.broadcast %cst_61 : f32 to vector<8x128xf32>
    %149 = arith.mulf %148, %147 : vector<8x128xf32>
    %150 = math.tanh %149 : vector<8x128xf32>
    %cst_62 = arith.constant 1.000000e+00 : f32
    %151 = vector.broadcast %cst_62 : f32 to vector<8x128xf32>
    %152 = arith.addf %150, %151 : vector<8x128xf32>
    %cst_63 = arith.constant 5.000000e-01 : f32
    %153 = vector.broadcast %cst_63 : f32 to vector<8x128xf32>
    %154 = arith.mulf %153, %152 : vector<8x128xf32>
    %155 = vector.extract_strided_slice %138 {offsets = [0, 256], sizes = [8, 128], strides = [1, 1]} : vector<8x512xf32> to vector<8x128xf32>
    %156 = math.tanh %155 : vector<8x128xf32>
    %157 = vector.extract_strided_slice %138 {offsets = [0, 384], sizes = [8, 128], strides = [1, 1]} : vector<8x512xf32> to vector<8x128xf32>
    %cst_64 = arith.constant 5.000000e-01 : f32
    %158 = vector.broadcast %cst_64 : f32 to vector<8x128xf32>
    %159 = arith.mulf %158, %157 : vector<8x128xf32>
    %160 = math.tanh %159 : vector<8x128xf32>
    %cst_65 = arith.constant 1.000000e+00 : f32
    %161 = vector.broadcast %cst_65 : f32 to vector<8x128xf32>
    %162 = arith.addf %160, %161 : vector<8x128xf32>
    %cst_66 = arith.constant 5.000000e-01 : f32
    %163 = vector.broadcast %cst_66 : f32 to vector<8x128xf32>
    %164 = arith.mulf %163, %162 : vector<8x128xf32>
    %165 = arith.mulf %154, %127 : vector<8x128xf32>
    %166 = arith.mulf %146, %156 : vector<8x128xf32>
    %167 = arith.addf %165, %166 : vector<8x128xf32>
    %168 = math.tanh %167 : vector<8x128xf32>
    %169 = arith.mulf %164, %168 : vector<8x128xf32>
    %170 = arith.truncf %169 : vector<8x128xf32> to vector<8x128xbf16>
    %c0_67 = arith.constant 0 : index
    %c24_68 = arith.constant 24 : index
    %c0_69 = arith.constant 0 : index
    %171 = vector.load %arg9[%c0_67, %c24_68, %c0_69] : memref<1x64x128xbf16, #tpu.memory_space<vmem>>, vector<1x8x128xbf16>
    %172 = vector.shape_cast %171 : vector<1x8x128xbf16> to vector<8x128xbf16>
    %173 = vector.shape_cast %170 : vector<8x128xbf16> to vector<1x8x128xbf16>
    tpu.vector_store %arg9[%c0_67, %c24_68, %c0_69], %173 {strides = array<i32>} : memref<1x64x128xbf16, #tpu.memory_space<vmem>>, vector<1x8x128xbf16>,
    %c32 = arith.constant 32 : index
    %c0_70 = arith.constant 0 : index
    %174 = vector.load %arg12[%c32, %c0_70] : memref<64x512xbf16, #tpu.memory_space<vmem>>, vector<8x512xbf16>
    %175 = arith.extf %174 : vector<8x512xbf16> to vector<8x512xf32>
    %176 = arith.truncf %169 : vector<8x128xf32> to vector<8x128xbf16>
    %cst_71 = arith.constant dense<0.000000e+00> : vector<8x512xf32>
    %177 = tpu.matmul %176, %9, %cst_71 {dimension_numbers = #tpu.dot_dimension_numbers<[1], [0], [0], [1], [0, 0, 1, 1], [], []>} : vector<8x128xbf16>, vector<128x512xbf16>, vector<8x512xf32> -> vector<8x512xf32>
    %178 = arith.addf %175, %177 : vector<8x512xf32>
    %179 = vector.extract_strided_slice %178 {offsets = [0, 0], sizes = [8, 128], strides = [1, 1]} : vector<8x512xf32> to vector<8x128xf32>
    %cst_72 = arith.constant 5.000000e-01 : f32
    %180 = vector.broadcast %cst_72 : f32 to vector<8x128xf32>
    %181 = arith.mulf %180, %179 : vector<8x128xf32>
    %182 = math.tanh %181 : vector<8x128xf32>
    %cst_73 = arith.constant 1.000000e+00 : f32
    %183 = vector.broadcast %cst_73 : f32 to vector<8x128xf32>
    %184 = arith.addf %182, %183 : vector<8x128xf32>
    %cst_74 = arith.constant 5.000000e-01 : f32
    %185 = vector.broadcast %cst_74 : f32 to vector<8x128xf32>
    %186 = arith.mulf %185, %184 : vector<8x128xf32>
    %187 = vector.extract_strided_slice %178 {offsets = [0, 128], sizes = [8, 128], strides = [1, 1]} : vector<8x512xf32> to vector<8x128xf32>
    %cst_75 = arith.constant 5.000000e-01 : f32
    %188 = vector.broadcast %cst_75 : f32 to vector<8x128xf32>
    %189 = arith.mulf %188, %187 : vector<8x128xf32>
    %190 = math.tanh %189 : vector<8x128xf32>
    %cst_76 = arith.constant 1.000000e+00 : f32
    %191 = vector.broadcast %cst_76 : f32 to vector<8x128xf32>
    %192 = arith.addf %190, %191 : vector<8x128xf32>
    %cst_77 = arith.constant 5.000000e-01 : f32
    %193 = vector.broadcast %cst_77 : f32 to vector<8x128xf32>
    %194 = arith.mulf %193, %192 : vector<8x128xf32>
    %195 = vector.extract_strided_slice %178 {offsets = [0, 256], sizes = [8, 128], strides = [1, 1]} : vector<8x512xf32> to vector<8x128xf32>
    %196 = math.tanh %195 : vector<8x128xf32>
    %197 = vector.extract_strided_slice %178 {offsets = [0, 384], sizes = [8, 128], strides = [1, 1]} : vector<8x512xf32> to vector<8x128xf32>
    %cst_78 = arith.constant 5.000000e-01 : f32
    %198 = vector.broadcast %cst_78 : f32 to vector<8x128xf32>
    %199 = arith.mulf %198, %197 : vector<8x128xf32>
    %200 = math.tanh %199 : vector<8x128xf32>
    %cst_79 = arith.constant 1.000000e+00 : f32
    %201 = vector.broadcast %cst_79 : f32 to vector<8x128xf32>
    %202 = arith.addf %200, %201 : vector<8x128xf32>
    %cst_80 = arith.constant 5.000000e-01 : f32
    %203 = vector.broadcast %cst_80 : f32 to vector<8x128xf32>
    %204 = arith.mulf %203, %202 : vector<8x128xf32>
    %205 = arith.mulf %194, %167 : vector<8x128xf32>
    %206 = arith.mulf %186, %196 : vector<8x128xf32>
    %207 = arith.addf %205, %206 : vector<8x128xf32>
    %208 = math.tanh %207 : vector<8x128xf32>
    %209 = arith.mulf %204, %208 : vector<8x128xf32>
    %210 = arith.truncf %209 : vector<8x128xf32> to vector<8x128xbf16>
    %c0_81 = arith.constant 0 : index
    %c32_82 = arith.constant 32 : index
    %c0_83 = arith.constant 0 : index
    %211 = vector.load %arg9[%c0_81, %c32_82, %c0_83] : memref<1x64x128xbf16, #tpu.memory_space<vmem>>, vector<1x8x128xbf16>
    %212 = vector.shape_cast %211 : vector<1x8x128xbf16> to vector<8x128xbf16>
    %213 = vector.shape_cast %210 : vector<8x128xbf16> to vector<1x8x128xbf16>
    tpu.vector_store %arg9[%c0_81, %c32_82, %c0_83], %213 {strides = array<i32>} : memref<1x64x128xbf16, #tpu.memory_space<vmem>>, vector<1x8x128xbf16>,
    %c40 = arith.constant 40 : index
    %c0_84 = arith.constant 0 : index
    %214 = vector.load %arg12[%c40, %c0_84] : memref<64x512xbf16, #tpu.memory_space<vmem>>, vector<8x512xbf16>
    %215 = arith.extf %214 : vector<8x512xbf16> to vector<8x512xf32>
    %216 = arith.truncf %209 : vector<8x128xf32> to vector<8x128xbf16>
    %cst_85 = arith.constant dense<0.000000e+00> : vector<8x512xf32>
    %217 = tpu.matmul %216, %9, %cst_85 {dimension_numbers = #tpu.dot_dimension_numbers<[1], [0], [0], [1], [0, 0, 1, 1], [], []>} : vector<8x128xbf16>, vector<128x512xbf16>, vector<8x512xf32> -> vector<8x512xf32>
    %218 = arith.addf %215, %217 : vector<8x512xf32>
    %219 = vector.extract_strided_slice %218 {offsets = [0, 0], sizes = [8, 128], strides = [1, 1]} : vector<8x512xf32> to vector<8x128xf32>
    %cst_86 = arith.constant 5.000000e-01 : f32
    %220 = vector.broadcast %cst_86 : f32 to vector<8x128xf32>
    %221 = arith.mulf %220, %219 : vector<8x128xf32>
    %222 = math.tanh %221 : vector<8x128xf32>
    %cst_87 = arith.constant 1.000000e+00 : f32
    %223 = vector.broadcast %cst_87 : f32 to vector<8x128xf32>
    %224 = arith.addf %222, %223 : vector<8x128xf32>
    %cst_88 = arith.constant 5.000000e-01 : f32
    %225 = vector.broadcast %cst_88 : f32 to vector<8x128xf32>
    %226 = arith.mulf %225, %224 : vector<8x128xf32>
    %227 = vector.extract_strided_slice %218 {offsets = [0, 128], sizes = [8, 128], strides = [1, 1]} : vector<8x512xf32> to vector<8x128xf32>
    %cst_89 = arith.constant 5.000000e-01 : f32
    %228 = vector.broadcast %cst_89 : f32 to vector<8x128xf32>
    %229 = arith.mulf %228, %227 : vector<8x128xf32>
    %230 = math.tanh %229 : vector<8x128xf32>
    %cst_90 = arith.constant 1.000000e+00 : f32
    %231 = vector.broadcast %cst_90 : f32 to vector<8x128xf32>
    %232 = arith.addf %230, %231 : vector<8x128xf32>
    %cst_91 = arith.constant 5.000000e-01 : f32
    %233 = vector.broadcast %cst_91 : f32 to vector<8x128xf32>
    %234 = arith.mulf %233, %232 : vector<8x128xf32>
    %235 = vector.extract_strided_slice %218 {offsets = [0, 256], sizes = [8, 128], strides = [1, 1]} : vector<8x512xf32> to vector<8x128xf32>
    %236 = math.tanh %235 : vector<8x128xf32>
    %237 = vector.extract_strided_slice %218 {offsets = [0, 384], sizes = [8, 128], strides = [1, 1]} : vector<8x512xf32> to vector<8x128xf32>
    %cst_92 = arith.constant 5.000000e-01 : f32
    %238 = vector.broadcast %cst_92 : f32 to vector<8x128xf32>
    %239 = arith.mulf %238, %237 : vector<8x128xf32>
    %240 = math.tanh %239 : vector<8x128xf32>
    %cst_93 = arith.constant 1.000000e+00 : f32
    %241 = vector.broadcast %cst_93 : f32 to vector<8x128xf32>
    %242 = arith.addf %240, %241 : vector<8x128xf32>
    %cst_94 = arith.constant 5.000000e-01 : f32
    %243 = vector.broadcast %cst_94 : f32 to vector<8x128xf32>
    %244 = arith.mulf %243, %242 : vector<8x128xf32>
    %245 = arith.mulf %234, %207 : vector<8x128xf32>
    %246 = arith.mulf %226, %236 : vector<8x128xf32>
    %247 = arith.addf %245, %246 : vector<8x128xf32>
    %248 = math.tanh %247 : vector<8x128xf32>
    %249 = arith.mulf %244, %248 : vector<8x128xf32>
    %250 = arith.truncf %249 : vector<8x128xf32> to vector<8x128xbf16>
    %c0_95 = arith.constant 0 : index
    %c40_96 = arith.constant 40 : index
    %c0_97 = arith.constant 0 : index
    %251 = vector.load %arg9[%c0_95, %c40_96, %c0_97] : memref<1x64x128xbf16, #tpu.memory_space<vmem>>, vector<1x8x128xbf16>
    %252 = vector.shape_cast %251 : vector<1x8x128xbf16> to vector<8x128xbf16>
    %253 = vector.shape_cast %250 : vector<8x128xbf16> to vector<1x8x128xbf16>
    tpu.vector_store %arg9[%c0_95, %c40_96, %c0_97], %253 {strides = array<i32>} : memref<1x64x128xbf16, #tpu.memory_space<vmem>>, vector<1x8x128xbf16>,
    %c48 = arith.constant 48 : index
    %c0_98 = arith.constant 0 : index
    %254 = vector.load %arg12[%c48, %c0_98] : memref<64x512xbf16, #tpu.memory_space<vmem>>, vector<8x512xbf16>
    %255 = arith.extf %254 : vector<8x512xbf16> to vector<8x512xf32>
    %256 = arith.truncf %249 : vector<8x128xf32> to vector<8x128xbf16>
    %cst_99 = arith.constant dense<0.000000e+00> : vector<8x512xf32>
    %257 = tpu.matmul %256, %9, %cst_99 {dimension_numbers = #tpu.dot_dimension_numbers<[1], [0], [0], [1], [0, 0, 1, 1], [], []>} : vector<8x128xbf16>, vector<128x512xbf16>, vector<8x512xf32> -> vector<8x512xf32>
    %258 = arith.addf %255, %257 : vector<8x512xf32>
    %259 = vector.extract_strided_slice %258 {offsets = [0, 0], sizes = [8, 128], strides = [1, 1]} : vector<8x512xf32> to vector<8x128xf32>
    %cst_100 = arith.constant 5.000000e-01 : f32
    %260 = vector.broadcast %cst_100 : f32 to vector<8x128xf32>
    %261 = arith.mulf %260, %259 : vector<8x128xf32>
    %262 = math.tanh %261 : vector<8x128xf32>
    %cst_101 = arith.constant 1.000000e+00 : f32
    %263 = vector.broadcast %cst_101 : f32 to vector<8x128xf32>
    %264 = arith.addf %262, %263 : vector<8x128xf32>
    %cst_102 = arith.constant 5.000000e-01 : f32
    %265 = vector.broadcast %cst_102 : f32 to vector<8x128xf32>
    %266 = arith.mulf %265, %264 : vector<8x128xf32>
    %267 = vector.extract_strided_slice %258 {offsets = [0, 128], sizes = [8, 128], strides = [1, 1]} : vector<8x512xf32> to vector<8x128xf32>
    %cst_103 = arith.constant 5.000000e-01 : f32
    %268 = vector.broadcast %cst_103 : f32 to vector<8x128xf32>
    %269 = arith.mulf %268, %267 : vector<8x128xf32>
    %270 = math.tanh %269 : vector<8x128xf32>
    %cst_104 = arith.constant 1.000000e+00 : f32
    %271 = vector.broadcast %cst_104 : f32 to vector<8x128xf32>
    %272 = arith.addf %270, %271 : vector<8x128xf32>
    %cst_105 = arith.constant 5.000000e-01 : f32
    %273 = vector.broadcast %cst_105 : f32 to vector<8x128xf32>
    %274 = arith.mulf %273, %272 : vector<8x128xf32>
    %275 = vector.extract_strided_slice %258 {offsets = [0, 256], sizes = [8, 128], strides = [1, 1]} : vector<8x512xf32> to vector<8x128xf32>
    %276 = math.tanh %275 : vector<8x128xf32>
    %277 = vector.extract_strided_slice %258 {offsets = [0, 384], sizes = [8, 128], strides = [1, 1]} : vector<8x512xf32> to vector<8x128xf32>
    %cst_106 = arith.constant 5.000000e-01 : f32
    %278 = vector.broadcast %cst_106 : f32 to vector<8x128xf32>
    %279 = arith.mulf %278, %277 : vector<8x128xf32>
    %280 = math.tanh %279 : vector<8x128xf32>
    %cst_107 = arith.constant 1.000000e+00 : f32
    %281 = vector.broadcast %cst_107 : f32 to vector<8x128xf32>
    %282 = arith.addf %280, %281 : vector<8x128xf32>
    %cst_108 = arith.constant 5.000000e-01 : f32
    %283 = vector.broadcast %cst_108 : f32 to vector<8x128xf32>
    %284 = arith.mulf %283, %282 : vector<8x128xf32>
    %285 = arith.mulf %274, %247 : vector<8x128xf32>
    %286 = arith.mulf %266, %276 : vector<8x128xf32>
    %287 = arith.addf %285, %286 : vector<8x128xf32>
    %288 = math.tanh %287 : vector<8x128xf32>
    %289 = arith.mulf %284, %288 : vector<8x128xf32>
    %290 = arith.truncf %289 : vector<8x128xf32> to vector<8x128xbf16>
    %c0_109 = arith.constant 0 : index
    %c48_110 = arith.constant 48 : index
    %c0_111 = arith.constant 0 : index
    %291 = vector.load %arg9[%c0_109, %c48_110, %c0_111] : memref<1x64x128xbf16, #tpu.memory_space<vmem>>, vector<1x8x128xbf16>
    %292 = vector.shape_cast %291 : vector<1x8x128xbf16> to vector<8x128xbf16>
    %293 = vector.shape_cast %290 : vector<8x128xbf16> to vector<1x8x128xbf16>
    tpu.vector_store %arg9[%c0_109, %c48_110, %c0_111], %293 {strides = array<i32>} : memref<1x64x128xbf16, #tpu.memory_space<vmem>>, vector<1x8x128xbf16>,
    %c56 = arith.constant 56 : index
    %c0_112 = arith.constant 0 : index
    %294 = vector.load %arg12[%c56, %c0_112] : memref<64x512xbf16, #tpu.memory_space<vmem>>, vector<8x512xbf16>
    %295 = arith.extf %294 : vector<8x512xbf16> to vector<8x512xf32>
    %296 = arith.truncf %289 : vector<8x128xf32> to vector<8x128xbf16>
    %cst_113 = arith.constant dense<0.000000e+00> : vector<8x512xf32>
    %297 = tpu.matmul %296, %9, %cst_113 {dimension_numbers = #tpu.dot_dimension_numbers<[1], [0], [0], [1], [0, 0, 1, 1], [], []>} : vector<8x128xbf16>, vector<128x512xbf16>, vector<8x512xf32> -> vector<8x512xf32>
    %298 = arith.addf %295, %297 : vector<8x512xf32>
    %299 = vector.extract_strided_slice %298 {offsets = [0, 0], sizes = [8, 128], strides = [1, 1]} : vector<8x512xf32> to vector<8x128xf32>
    %cst_114 = arith.constant 5.000000e-01 : f32
    %300 = vector.broadcast %cst_114 : f32 to vector<8x128xf32>
    %301 = arith.mulf %300, %299 : vector<8x128xf32>
    %302 = math.tanh %301 : vector<8x128xf32>
    %cst_115 = arith.constant 1.000000e+00 : f32
    %303 = vector.broadcast %cst_115 : f32 to vector<8x128xf32>
    %304 = arith.addf %302, %303 : vector<8x128xf32>
    %cst_116 = arith.constant 5.000000e-01 : f32
    %305 = vector.broadcast %cst_116 : f32 to vector<8x128xf32>
    %306 = arith.mulf %305, %304 : vector<8x128xf32>
    %307 = vector.extract_strided_slice %298 {offsets = [0, 128], sizes = [8, 128], strides = [1, 1]} : vector<8x512xf32> to vector<8x128xf32>
    %cst_117 = arith.constant 5.000000e-01 : f32
    %308 = vector.broadcast %cst_117 : f32 to vector<8x128xf32>
    %309 = arith.mulf %308, %307 : vector<8x128xf32>
    %310 = math.tanh %309 : vector<8x128xf32>
    %cst_118 = arith.constant 1.000000e+00 : f32
    %311 = vector.broadcast %cst_118 : f32 to vector<8x128xf32>
    %312 = arith.addf %310, %311 : vector<8x128xf32>
    %cst_119 = arith.constant 5.000000e-01 : f32
    %313 = vector.broadcast %cst_119 : f32 to vector<8x128xf32>
    %314 = arith.mulf %313, %312 : vector<8x128xf32>
    %315 = vector.extract_strided_slice %298 {offsets = [0, 256], sizes = [8, 128], strides = [1, 1]} : vector<8x512xf32> to vector<8x128xf32>
    %316 = math.tanh %315 : vector<8x128xf32>
    %317 = vector.extract_strided_slice %298 {offsets = [0, 384], sizes = [8, 128], strides = [1, 1]} : vector<8x512xf32> to vector<8x128xf32>
    %cst_120 = arith.constant 5.000000e-01 : f32
    %318 = vector.broadcast %cst_120 : f32 to vector<8x128xf32>
    %319 = arith.mulf %318, %317 : vector<8x128xf32>
    %320 = math.tanh %319 : vector<8x128xf32>
    %cst_121 = arith.constant 1.000000e+00 : f32
    %321 = vector.broadcast %cst_121 : f32 to vector<8x128xf32>
    %322 = arith.addf %320, %321 : vector<8x128xf32>
    %cst_122 = arith.constant 5.000000e-01 : f32
    %323 = vector.broadcast %cst_122 : f32 to vector<8x128xf32>
    %324 = arith.mulf %323, %322 : vector<8x128xf32>
    %325 = arith.mulf %314, %287 : vector<8x128xf32>
    %326 = arith.mulf %306, %316 : vector<8x128xf32>
    %327 = arith.addf %325, %326 : vector<8x128xf32>
    %328 = math.tanh %327 : vector<8x128xf32>
    %329 = arith.mulf %324, %328 : vector<8x128xf32>
    %330 = arith.truncf %329 : vector<8x128xf32> to vector<8x128xbf16>
    %c0_123 = arith.constant 0 : index
    %c56_124 = arith.constant 56 : index
    %c0_125 = arith.constant 0 : index
    %331 = vector.load %arg9[%c0_123, %c56_124, %c0_125] : memref<1x64x128xbf16, #tpu.memory_space<vmem>>, vector<1x8x128xbf16>
    %332 = vector.shape_cast %331 : vector<1x8x128xbf16> to vector<8x128xbf16>
    %333 = vector.shape_cast %330 : vector<8x128xbf16> to vector<1x8x128xbf16>
    tpu.vector_store %arg9[%c0_123, %c56_124, %c0_125], %333 {strides = array<i32>} : memref<1x64x128xbf16, #tpu.memory_space<vmem>>, vector<1x8x128xbf16>,
    %c0_126 = arith.constant 0 : index
    %c0_127 = arith.constant 0 : index
    %c0_128 = arith.constant 0 : index
    %334 = vector.load %arg10[%c0_126, %c0_127, %c0_128] : memref<1x8x128xf32, #tpu.memory_space<vmem>>, vector<1x8x128xf32>
    %335 = vector.shape_cast %334 : vector<1x8x128xf32> to vector<8x128xf32>
    %336 = vector.shape_cast %329 : vector<8x128xf32> to vector<1x8x128xf32>
    tpu.vector_store %arg10[%c0_126, %c0_127, %c0_128], %336 {strides = array<i32>} : memref<1x8x128xf32, #tpu.memory_space<vmem>>, vector<1x8x128xf32>,
    %c0_129 = arith.constant 0 : index
    %c0_130 = arith.constant 0 : index
    %c0_131 = arith.constant 0 : index
    %337 = vector.load %arg11[%c0_129, %c0_130, %c0_131] : memref<1x8x128xf32, #tpu.memory_space<vmem>>, vector<1x8x128xf32>
    %338 = vector.shape_cast %337 : vector<1x8x128xf32> to vector<8x128xf32>
    %339 = vector.shape_cast %327 : vector<8x128xf32> to vector<1x8x128xf32>
    tpu.vector_store %arg11[%c0_129, %c0_130, %c0_131], %339 {strides = array<i32>} : memref<1x8x128xf32, #tpu.memory_space<vmem>>, vector<1x8x128xf32>,
    return
  }
  func.func @transform_0(%arg0: i32, %arg1: i32) -> (i32, i32, i32) {
    %c0_i32 = arith.constant 0 : i32
    %c0_i32_0 = arith.constant 0 : i32
    %c0_i32_1 = arith.constant 0 : i32
    return %arg0, %c0_i32, %c0_i32_0 : i32, i32, i32
  }
  func.func @transform_1(%arg0: i32, %arg1: i32) -> (i32, i32, i32) {
    %c0_i32 = arith.constant 0 : i32
    %c0_i32_0 = arith.constant 0 : i32
    return %arg1, %arg0, %c0_i32 : i32, i32, i32
  }
  func.func @transform_2(%arg0: i32, %arg1: i32) -> (i32, i32, i32) {
    %c0_i32 = arith.constant 0 : i32
    %c0_i32_0 = arith.constant 0 : i32
    return %arg1, %arg0, %c0_i32 : i32, i32, i32
  }
  func.func @transform_3(%arg0: i32, %arg1: i32) -> (i32, i32) {
    %c0_i32 = arith.constant 0 : i32
    %c0_i32_0 = arith.constant 0 : i32
    %c0_i32_1 = arith.constant 0 : i32
    return %c0_i32, %c0_i32_0 : i32, i32
  }
  func.func @transform_4(%arg0: i32, %arg1: i32) -> (i32, i32, i32) {
    %c1_i32 = arith.constant 1 : i32
    %0 = arith.subi %arg1, %c1_i32 : i32
    %c0_i32 = arith.constant 0 : i32
    %1 = arith.maxsi %0, %c0_i32 : i32
    %c0_i32_0 = arith.constant 0 : i32
    %c0_i32_1 = arith.constant 0 : i32
    %c0_i32_2 = arith.constant 0 : i32
    return %1, %c0_i32_0, %c0_i32_1 : i32, i32, i32
  }
  func.func @transform_5(%arg0: i32, %arg1: i32) -> (i32, i32, i32) {
    %c0_i32 = arith.constant 0 : i32
    %c0_i32_0 = arith.constant 0 : i32
    %c0_i32_1 = arith.constant 0 : i32
    return %arg1, %c0_i32, %c0_i32_0 : i32, i32, i32
  }
  func.func @transform_6(%arg0: i32, %arg1: i32) -> (i32, i32, i32) {
    %c0_i32 = arith.constant 0 : i32
    %c0_i32_0 = arith.constant 0 : i32
    %c0_i32_1 = arith.constant 0 : i32
    return %arg1, %c0_i32, %c0_i32_0 : i32, i32, i32
  }
  func.func @transform_7(%arg0: i32, %arg1: i32) -> (i32, i32, i32) {
    %c0_i32 = arith.constant 0 : i32
    %c0_i32_0 = arith.constant 0 : i32
    %c0_i32_1 = arith.constant 0 : i32
    return %arg0, %c0_i32, %c0_i32_0 : i32, i32, i32
  }
  func.func @transform_8(%arg0: i32, %arg1: i32) -> (i32, i32, i32) {
    %c0_i32 = arith.constant 0 : i32
    %c0_i32_0 = arith.constant 0 : i32
    return %arg1, %arg0, %c0_i32 : i32, i32, i32
  }
  func.func @transform_9(%arg0: i32, %arg1: i32) -> (i32, i32, i32) {
    %c0_i32 = arith.constant 0 : i32
    %c0_i32_0 = arith.constant 0 : i32
    return %arg1, %arg0, %c0_i32 : i32, i32, i32
  }
}

</mosaic_0001>

<bundles_post_ra>
// kernel: tpu_custom_call.1
= control target key start
LH: loop header
LB: loop body
LE: loop exit
PB: predicated region body
PF: predicated region fallthrough
CT: control target
= control target key end

     0   :  { %s5220_s0 = inlined_call_operand.hbm [shape: f32[2,64,128], index: 0, kind: input, shape index: {}]   ;;  %s5221_s1 = inlined_call_operand.hbm [shape: f32[2,16,128], index: 1, kind: input, shape index: {}]   ;;  %s5222_s2 = inlined_call_operand.hbm [shape: f32[2,16,128], index: 2, kind: input, shape index: {}]   ;;  %s5223_s3 = inlined_call_operand.hbm [shape: bf16[128,512], index: 3, kind: input, shape index: {}]   ;;  %s5224_s4 = inlined_call_operand.hbm [shape: bf16[1,128,512], index: 4, kind: input, shape index: {}]   ;;  %s5225_s5 = inlined_call_operand.hbm [shape: bf16[2,128,512], index: 5, kind: input, shape index: {}]   ;;  %s5226_s6 = inlined_call_operand.vmem [shape: f32[2,1,512], index: 6, kind: input, shape index: {}]   ;;  %s5227_s7 = inlined_call_operand.hbm [shape: bf16[2,64,128], index: 7, kind: output, shape index: {0}]   ;;  %s5228_s8 = inlined_call_operand.hbm [shape: f32[2,16,128], index: 8, kind: output, shape index: {1}]   ;;  %s5229_s9 = inlined_call_operand.hbm [shape: f32[2,16,128], index: 9, kind: output, shape index: {2}]  }
   0x1   :  { %5261 = sst [smem:[#allocation42_spill]] %s5220_s0 }
   0x2   :  { %5262 = sst [smem:[#allocation43_spill]] %s5221_s1 }
   0x3   :  { %5263 = sst [smem:[#allocation44_spill]] %s5222_s2 }
   0x4   :  { %5264 = sst [smem:[#allocation45_spill]] %s5223_s3 }
   0x5   :  { %5265 = sst [smem:[#allocation46_spill]] %s5224_s4 }
   0x6   :  { %5266 = sst [smem:[#allocation47_spill]] %s5225_s5 }
   0x7   :  { %5267 = sst [smem:[#allocation48_spill]] %s5226_s6 }
   0x8   :  { %5268 = sst [smem:[#allocation49_spill]] %s5227_s7 }
   0x9   :  { %5269 = sst [smem:[#allocation50_spill]] %s5228_s8 }
   0xa   :  { %5270 = sst [smem:[#allocation51_spill]] %s5229_s9 }
   0xb   :  { %15 = vsyncpa [#allocation4], 0 }
   0xc   :  { %17 = vsyncpa [#allocation4 + $0x1], 0 }
   0xd   :  { %18 = vsyncpa [#allocation7], 0 }
   0xe   :  { %20 = vsyncpa [#allocation7 + $0x1], 0 }
   0xf   :  { %21 = vsyncpa [#allocation10], 0 }
  0x10   :  { %22 = vsyncpa [#allocation5], 0 }
  0x11   :  { %24 = vsyncpa [#allocation5 + $0x1], 0 }
  0x12   :  { %25 = vsyncpa [#allocation15], 0 }
  0x13   :  { %27 = vsyncpa [#allocation15 + $0x1], 0  ;;  %s4131_s30 = smov 0   ;;  %s4133_s10 = smov 0  }
  0x14   :  { %s4135_s11 = smov 0   ;;  %s4137_s12 = smov 0  }
  0x15   :  { %s4139_s13 = smov 0   ;;  %s4141_s14 = smov 0  }
  0x16   :  { %s4143_s15 = smov 0   ;;  %s4145_s16 = smov 0  }
  0x17   :  { %s4147_s17 = smov 0   ;;  %s4149_s18 = smov 0  }
  0x18   :  { %s4151_s19 = smov 0   ;;  %s4153_s20 = smov 0  }
  0x19   :  { %s4155_s21 = smov 0   ;;  %s4157_s22 = smov 0  }
  0x1a   :  { %s4159_s23 = smov 0   ;;  %s4161_s24 = smov 0  }
  0x1b LB: > { %5271 = sst [smem:[#allocation24_spill]] %s4001_s30  ;;  %s4212_s25 = sadd.s32 4294967295, %s4061_s24   ;;  %s4061_s24 = sphi %s4161_s24, %s33_s24   ;;  %s4057_s23 = sphi %s4159_s23, %s5364_s23   ;;  %s4053_s22 = sphi %s4157_s22, %s5363_s22   ;;  %s4049_s21 = sphi %s4155_s21, %s5362_s21   ;;  %s4045_s20 = sphi %s4153_s20, %s5361_s20   ;;  %s4041_s19 = sphi %s4151_s19, %s5360_s19   ;;  %s4037_s18 = sphi %s4149_s18, %s5359_s18   ;;  %s4033_s17 = sphi %s4147_s17, %s5367_s17   ;;  %s4029_s16 = sphi %s4145_s16, %s5357_s16   ;;  %s4025_s15 = sphi %s4143_s15, %s5356_s15   ;;  %s4021_s14 = sphi %s4141_s14, %s5355_s14   ;;  %s4017_s13 = sphi %s4139_s13, %s5184_s13   ;;  %s4013_s12 = sphi %s4137_s12, %s5366_s12   ;;  %s4009_s11 = sphi %s4135_s11, %s4415_s11   ;;  %s4005_s10 = sphi %s4133_s10, %s5354_s10   ;;  %s4001_s30 = sphi %s4131_s30, %s5353_s30  }
  0x1c   : > { %5272 = sst [smem:[#allocation25_spill]] %s4005_s10  ;;  %s42_s27 = sadd.s32 1, %s4053_s22 }
  0x1d   : > { %5273 = sst [smem:[#allocation26_spill]] %s4009_s11  ;;  %s45_s28 = sadd.s32 1, %s4057_s23 }
  0x1e   : > { %5274 = sst [smem:[#allocation27_spill]] %s4025_s15  ;;  %p43_p0 = scmp.ge.s32.totalorder %s42_s27, 2 }
  0x1f   : > { %5275 = sst [smem:[#allocation28_spill]] %s4029_s16  ;;  %p5248_p1 = scmp.eq.s32.totalorder %s4061_s24, 0 }
  0x20   : > { %5276 = sst [smem:[#allocation29_spill]] %s4037_s18  ;;  %p5246_p2 = scmp.eq.s32.totalorder %s4212_s25, 0 }
  0x21   : > { %5277 = sst [smem:[#allocation30_spill]] %s4041_s19  ;;  %s80_s29 = sadd.s32 1, %s4029_s16 }
  0x22   : > { %5278 = sst [smem:[#allocation31_spill]] %s4045_s20  ;;  %s5369_s27 = smov (%p43_p0, %s42_s27), 0 }
  0x23   : > { %5279 = sst [smem:[#allocation32_spill]] %s4049_s21  ;;  %s5371_s28 = smov (!%p43_p0, %s45_s28), %s4057_s23 }
  0x24   : > { %5280 = sst [smem:[#allocation33_spill]] %s4053_s22  ;;  %s4225_s7 = ssub.s32 %s4053_s22, %s5369_s27 }
  0x25   : > { %5281 = sst [smem:[#allocation34_spill]] %s4057_s23  ;;  %p87_p3 = scmp.ne.s32.totalorder %s4029_s16, %s4025_s15 }
  0x26   : > { %5282 = sst [smem:[#allocation35_spill]] %s5369_s27  ;;  %p47_p4 = scmp.ge.s32.totalorder %s5371_s28, 2 }
  0x27   : > { %5283 = sst [smem:[#allocation36_spill]] %s4225_s7  ;;  %p93_p5 = scmp.ne.s32.totalorder %s4025_s15, %s4021_s14 }
  0x28   : > { %p4236_p6 = por %p87_p3, %p5248_p1  ;;  %s5373_s28 = smov (%p47_p4, %s5371_s28), 0 }
  0x29   : > { %5285 = sst [smem:[#allocation37_spill]] %s5373_s28  ;;  %p4245_p8 = por %p93_p5, %p5246_p2 }
  0x2a   : > { %p5247_p9 = scmp.eq.s32.totalorder %s4212_s25, 3  ;;  %s4252_s14 = ssub.s32 %s4057_s23, %s5373_s28 }
  0x2b   : > { %s5286_s27 = scalar_select %p4245_p8, 1, 0 }
  0x2c   : > { %s5288_s9 = sadd.s32 4294967294, %s4061_s24   ;;  %p50_p11 = scmp.eq.s32.totalorder %s4252_s14, 0 }
  0x2d   : > { %5287 = sst [smem:[#allocation38_spill]] %s5286_s27  ;;  %p4256_p10 = scmp.eq.s32.totalorder %s5288_s9, 3 }
  0x2e   : > { %s77_s21 = sor.u32 %s4225_s7, %s4252_s14  ;;  %p4268_p13 = por %p5247_p9, %p87_p3 }
  0x2f   : > { %p78_p12 = scmp.eq.s32.totalorder %s77_s21, 0  ;;  %p4274_p0 = por %p4256_p10, %p93_p5 }
  0x30   : > { %s5290_s6 = scalar_select %p4268_p13, 1, 0 }
  0x31   : > { %s5292_s28 = scalar_select %p4274_p0, 1, 0 }
  0x32   : > { %5291 = sst [smem:[#allocation39_spill]] %s5290_s6  ;;  %p5245_p4 = scmp.lt.s32.totalorder %s4061_s24, 4 }
  0x33   : > { %s4279_s9 = scalar_select %p78_p12, %s4029_s16, %s80_s29  }
  0x34   : > { %s368_s27 = sand.u32 1, %s4029_s16   ;;  %s2994_s21 = sshll.u32 %s4053_s22, 1 }
  0x35   : > { %5293 = sst [smem:[#allocation40_spill]] %s4279_s9  ;;  %s4284_s5 = sshll.u32 %s368_s27, 3 }
  0x36   : > { %s375_s15 = sadd.s32 %s4057_s23, %s2994_s21  ;;  %s370_s10 = scalar_lea.vmem [#allocation6], %s4284_s5 }
  0x37   : > { %s2995_s30 = sshll.u32 %s375_s15, 7  ;;  %s379_s7 = sshll.u32 %s370_s10, 4  ;;  %s380_s7 = int_to_ptr.vmem [resolvable:$true] %s379_s7 }
  0x38   : > { %s5294_s1 = sld [smem:[#allocation43_spill]]  ;;  %p4296_p3 = pnand %p5245_p4, %p4236_p6 }
  0x39   : > { %s5296_s2 = sld [smem:[#allocation44_spill]]  ;;  %s5297_s15 = sand.u32 1, %s4061_s24  }
  0x3a   : > { %s4307_s10 = scalar_lea.sflag [#allocation7], %s5297_s15  ;;  %p5249_p5 = pneg %p4296_p3 }
  0x3b   : > { %s3671_s6 = scalar_lea.vmem %s380_s7, 128  ;;  %s4063_s11 = smov [#allocation6]  }
  0x3c   : > { %p3672_p12 = scmp.ne.s32.totalorder %s380_s7, %s3671_s6  ;;  %s3676_s26 = sshll.u32 %s4063_s11, 4  ;;  %s3677_s26 = int_to_ptr.vmem [resolvable:$false] %s3676_s26 }
  0x3d   : > { %p3679_p4 = scmp.lt.s32.totalorder %s380_s7, %s3677_s26 }
  0x3e   : > { %s377_s4 = scalar_lea.hbm %s5294_s1, %s2995_s30  ;;  %p3674_p6 = pnand %p3672_p12, %p5249_p5 }
  0x3f   : > { %s4303_s21 = scalar_lea.hbm %s5296_s2, %s2995_s30  ;;  %s3678_s1 = scalar_lea.vmem %s3677_s26, 256 }
  0x40   : > { %p3675_p7 = pneg %p3674_p6  ;;  %p3680_p2 = scmp.lt.s32.totalorder %s3678_s1, %s3671_s6 }
  0x42   : > { %p3681_p9 = por %p3680_p2, %p3679_p4 }
  0x44   : > { %p3682_p1 = pnand %p3681_p9, %p3675_p7 }
  0x46   : > { %3685 = shalt.err (!%p3682_p1)
}
  0x47   : > { %3228 = dma.hbm_to_vmem [thread:$0]  (!%p4296_p3), %s377_s4, 128, %s380_s7, %s4307_s10  }
  0x48   : > { %s52_s1 = sadd.s32 1, %s4041_s19  ;;  %p59_p1 = scmp.ne.s32.totalorder %s4041_s19, %s4037_s18 }
  0x49   : > { %s4323_s30 = scalar_select %p50_p11, %s4041_s19, %s52_s1  }
  0x4a   : > { %p5299_p2 = scmp.eq.s32.totalorder %s4061_s24, 0  ;;  %p65_p9 = scmp.ne.s32.totalorder %s4037_s18, %s4033_s17 }
  0x4b   : > { %5298 = sst [smem:[#allocation41_spill]] %s4323_s30  ;;  %p5300_p4 = scmp.eq.s32.totalorder %s4212_s25, 3 }
  0x4c   : > { %p61_p7 = por %p5299_p2, %p59_p1  ;;  %s347_s27 = sand.u32 1, %s4041_s19  }
  0x4d   : > { %p4331_p12 = por %p5300_p4, %p59_p1  ;;  %p5302_p6 = scmp.eq.s32.totalorder %s4212_s25, 0 }
  0x4e   : > { %p4344_p0 = por %p4256_p10, %p65_p9  ;;  %s2990_s7 = sshll.u32 %s347_s27, 6 }
  0x4f   : > { %s5301_s20 = scalar_select %p4331_p12, 1, 0 }
  0x50   : > { %p4338_p5 = por %p5302_p6, %p65_p9  ;;  %s3162_s14 = sshll.u32 %s4057_s23, 10 }
  0x51   : > { %s5304_s4 = scalar_select %p4344_p0, 1, 0 }
  0x52   : > { %s5303_s15 = scalar_select %p4338_p5, 1, 0 }
  0x53   : > { %s5305_s0 = sld [smem:[#allocation42_spill]]  ;;  %s349_s1 = scalar_lea.vmem [#allocation3], %s2990_s7 }
  0x54   : > { %s356_s2 = sshll.u32 %s349_s1, 4  ;;  %p5306_p11 = scmp.lt.s32.totalorder %s4061_s24, 4  ;;  %s357_s2 = int_to_ptr.vmem [resolvable:$true] %s356_s2 }
  0x55   : > { %s5308_s8 = sand.u32 1, %s4061_s24   ;;  %s3699_s27 = scalar_lea.vmem %s357_s2, 1024 }
  0x56   : > { %p4354_p1 = pnand %p5306_p11, %p61_p7  ;;  %s4360_s19 = scalar_lea.sflag [#allocation4], %s5308_s8 }
  0x57   : > { %p3700_p2 = scmp.ne.s32.totalorder %s357_s2, %s3699_s27  ;;  %s4064_s6 = smov [#allocation3]  }
  0x58   : > { %p3688_p10 = pneg %p4354_p1 }
  0x59   : > { %s355_s26 = scalar_lea.hbm %s5305_s0, %s3162_s14  ;;  %s3704_s14 = sshll.u32 %s4064_s6, 4  ;;  %s3705_s14 = int_to_ptr.vmem [resolvable:$false] %s3704_s14 }
  0x5a   : > { %p3702_p9 = pnand %p3700_p2, %p3688_p10  ;;  %s3706_s7 = scalar_lea.vmem %s3705_s14, 2048 }
  0x5b   : > { %p3707_p6 = scmp.lt.s32.totalorder %s357_s2, %s3705_s14  ;;  %p3708_p7 = scmp.lt.s32.totalorder %s3706_s7, %s3699_s27 }
  0x5c   : > { %p3703_p4 = pneg %p3702_p9 }
  0x5d   : > { %p3709_p11 = por %p3708_p7, %p3707_p6 }
  0x5f   : > { %p3710_p0 = pnand %p3709_p11, %p3703_p4 }
  0x61   : > { %3713 = shalt.err (!%p3710_p0)
}
  0x62   : > { %s4065_s11 = smov 128   ;;  %s4066_s1 = smov 8  }
  0x63   : > { %3225 = dma.hbm_to_vmem [thread:$0]  (!%p4354_p1), %s355_s26, 1024, %s357_s2, %s4360_s19, %s4065_s11, %s4065_s11, %s4066_s1  }
  0x64   : > { %s390_s8 = scalar_lea.vmem [#allocation8], %s4284_s5  ;;  %p5309_p2 = pneg %p4296_p3 }
  0x65   : > { %s399_s0 = sshll.u32 %s390_s8, 4  ;;  %s4067_s27 = smov [#allocation8]   ;;  %s400_s0 = int_to_ptr.vmem [resolvable:$true] %s399_s0 }
  0x66   : > { %s3727_s23 = scalar_lea.vmem %s400_s0, 128  ;;  %s3732_s6 = sshll.u32 %s4067_s27, 4  ;;  %s3733_s6 = int_to_ptr.vmem [resolvable:$false] %s3732_s6 }
  0x67   : > { %p3728_p10 = scmp.ne.s32.totalorder %s400_s0, %s3727_s23  ;;  %s3734_s14 = scalar_lea.vmem %s3733_s6, 256 }
  0x68   : > { %p3735_p0 = scmp.lt.s32.totalorder %s400_s0, %s3733_s6  ;;  %p3736_p4 = scmp.lt.s32.totalorder %s3734_s14, %s3727_s23 }
  0x69   : > { %p3730_p9 = pnand %p3728_p10, %p5309_p2 }
  0x6a   : > { %p3737_p6 = por %p3736_p4, %p3735_p0 }
  0x6b   : > { %p3731_p12 = pneg %p3730_p9 }
  0x6d   : > { %p3738_p7 = pnand %p3737_p6, %p3731_p12 }
  0x6f   : > { %3741 = shalt.err (!%p3738_p7)
}
  0x70   : > { %3231 = dma.hbm_to_vmem [thread:$0]  (!%p4296_p3), %s4303_s21, 128, %s400_s0, %s4307_s10  }
  0x71   : > { %p2987_p1 = scmp.ge.s32.totalorder %s4061_s24, 1  ;;  %p319_p11 = scmp.lt.s32.totalorder %s4061_s24, 5 }
  0x72   : > { %s4068_s5 = smov [#allocation9]   ;;  %p5311_p2 = scmp.eq.s32.totalorder %s4212_s25, 0 }
  0x73   : > { %p4377_p10 = pnand %p2987_p1, %p319_p11  ;;  %s331_s23 = sshll.u32 %s4068_s5, 4  ;;  %s332_s23 = int_to_ptr.vmem [resolvable:$true] %s331_s23 }
  0x74   : > { %s3753_s29 = scalar_lea.vmem %s332_s23, 4096  ;;  %p3761_p3 = scmp.lt.s32.totalorder %s332_s23, %s332_s23 }
  0x75   : > { %s5310_s2 = scalar_select %p4377_p10, 1, 0 }
  0x76   : > { %p3218_p12 = pneg %p4377_p10  ;;  %p3754_p4 = scmp.ne.s32.totalorder %s332_s23, %s3753_s29 }
  0x77   : > { %p3762_p13 = scmp.lt.s32.totalorder %s3753_s29, %s3753_s29 }
  0x78   : > { %p3219_p9 = pnand %p3218_p12, %p5311_p2 }
  0x79   : > { %p3763_p8 = por %p3762_p13, %p3761_p3 }
  0x7a   : > { %p3744_p0 = pneg %p3219_p9 }
  0x7c   : > { %p3756_p6 = pnand %p3754_p4, %p3744_p0 }
  0x7e   : > { %p3757_p7 = pneg %p3756_p6 }
  0x80   : > { %p3764_p1 = pnand %p3763_p8, %p3757_p7 }
  0x82   : > { %3767 = shalt.err (!%p3764_p1)
}
  0x83   : > { %s4069_s0 = smov 256   ;;  %s4070_s21 = smov 16  }
  0x84   : > { %s5312_s3 = sld [smem:[#allocation45_spill]]  ;;  %p3998_p11 = scmp.ne.s32.totalorder %s4017_s13, 0 }
  0x85   : > { %p174_p12 = scmp.ne.s32.totalorder %s4017_s13, %s4013_s12  ;;  %p5313_p13 = scmp.eq.s32.totalorder %s4061_s24, 0 }
  0x86   : > { %s4071_s11 = smov [#allocation11]   ;;  %p5315_p4 = scmp.lt.s32.totalorder %s4061_s24, 4 }
  0x87   : > { %p170_p8 = por %p3998_p11, %p5313_p13  ;;  %p4398_p0 = por %p174_p12, %p5311_p2 }
  0x88   : > { %s420_s1 = sshll.u32 %s4071_s11, 4  ;;  %s421_s1 = int_to_ptr.vmem [resolvable:$true] %s420_s1 }
  0x89   : > { %p3232_p6 = pnand %p5315_p4, %p170_p8  ;;  %s3781_s8 = scalar_lea.vmem %s421_s1, 4096 }
  0x8a   : > { %3221 = dma.hbm_to_vmem [thread:$0]  (!%p3219_p9), %s5312_s3, 4096, %s332_s23, [#allocation10], %s4069_s0, %s4069_s0, %s4070_s21  }
  0x8b   : > { %p3770_p7 = pneg %p3232_p6  ;;  %p3782_p3 = scmp.ne.s32.totalorder %s421_s1, %s3781_s8 }
  0x8c   : > { %s3788_s27 = scalar_lea.vmem %s421_s1, 8192  ;;  %p3789_p9 = scmp.lt.s32.totalorder %s421_s1, %s421_s1 }
  0x8d   : > { %p3784_p1 = pnand %p3782_p3, %p3770_p7  ;;  %p3790_p10 = scmp.lt.s32.totalorder %s3788_s27, %s3781_s8 }
  0x8f   : > { %p3785_p5 = pneg %p3784_p1  ;;  %p3791_p11 = por %p3790_p10, %p3789_p9 }
  0x91   : > { %p3792_p13 = pnand %p3791_p11, %p3785_p5 }
  0x93   : > { %3795 = shalt.err (!%p3792_p13)
}
  0x94   : > { %s5316_s14 = sld [smem:[#allocation46_spill]]  ;;  %s3164_s27 = sshll.u32 %s4053_s22, 12 }
  0x95   : > { %s5317_s5 = sld [smem:[#allocation26_spill]]  ;;  %p5322_p8 = scmp.eq.s32.totalorder %s4061_s24, 0 }
  0x96   : > { %s5318_s23 = sld [smem:[#allocation36_spill]]  ;;  %p5323_p4 = scmp.eq.s32.totalorder %s4212_s25, 0 }
  0x97   : > { %s5319_s29 = sld [smem:[#allocation25_spill]] }
  0x98   : > { %s5320_s30 = sld [smem:[#allocation24_spill]] }
  0x99   : > { %s5325_s16 = sld [smem:[#allocation47_spill]] }
  0x9a   : > { %3234 = dma.hbm_to_vmem [thread:$0]  (!%p3232_p6), %s5316_s14, 4096, %s421_s1, %s4360_s19, %s4069_s0, %s4069_s0, %s4070_s21  }
  0x9b   : > { %s187_s26 = sadd.s32 1, %s5317_s5  ;;  %s432_s8 = sand.u32 1, %s5317_s5  }
  0x9c   : > { %p5321_p5 = scmp.eq.s32.totalorder %s5318_s23, 0  ;;  %s3003_s6 = sshll.u32 %s432_s8, 8 }
  0x9d   : > { %p194_p10 = scmp.ne.s32.totalorder %s5317_s5, %s5319_s29  ;;  %p5326_p6 = scmp.lt.s32.totalorder %s4061_s24, 4 }
  0x9e   : > { %s4415_s11 = scalar_select %p5321_p5, %s5317_s5, %s187_s26  }
  0x9f   : > { %p200_p12 = scmp.ne.s32.totalorder %s5319_s29, %s5320_s30  ;;  %p196_p2 = por %p194_p10, %p5322_p8 }
  0xa0   : > { %s440_s19 = scalar_lea.hbm %s5325_s16, %s3164_s27  ;;  %s434_s14 = scalar_lea.vmem [#allocation12], %s3003_s6 }
  0xa1   : > { %p4427_p7 = por %p200_p12, %p5323_p4  ;;  %p4436_p3 = pnand %p5326_p6, %p196_p2 }
  0xa2   : > { %s441_s5 = sshll.u32 %s434_s14, 4  ;;  %s4072_s29 = smov [#allocation12]   ;;  %s442_s5 = int_to_ptr.vmem [resolvable:$true] %s441_s5 }
  0xa3   : > { %p3798_p1 = pneg %p4436_p3  ;;  %s3809_s23 = scalar_lea.vmem %s442_s5, 4096 }
  0xa4   : > { %p3810_p9 = scmp.ne.s32.totalorder %s442_s5, %s3809_s23  ;;  %s3814_s30 = sshll.u32 %s4072_s29, 4  ;;  %s3815_s30 = int_to_ptr.vmem [resolvable:$false] %s3814_s30 }
  0xa5   : > { %s3816_s3 = scalar_lea.vmem %s3815_s30, 8192  ;;  %p3817_p5 = scmp.lt.s32.totalorder %s442_s5, %s3815_s30 }
  0xa6   : > { %p3812_p11 = pnand %p3810_p9, %p3798_p1  ;;  %p3818_p10 = scmp.lt.s32.totalorder %s3816_s3, %s3809_s23 }
  0xa8   : > { %p3813_p13 = pneg %p3812_p11  ;;  %p3819_p12 = por %p3818_p10, %p3817_p5 }
  0xaa   : > { %p3820_p8 = pnand %p3819_p12, %p3813_p13 }
  0xac   : > { %3823 = shalt.err (!%p3820_p8)
}
  0xad   : > { %3237 = dma.hbm_to_vmem [thread:$0]  (!%p4436_p3), %s440_s19, 4096, %s442_s5, %s4307_s10, %s4069_s0, %s4069_s0, %s4070_s21  }
  0xae   : > { %p5328_p2 = scmp.ne.s32.totalorder %s5310_s2, 0 }
  0xaf   : > { %s4451_s16 = sand.u32 (!%p5328_p2), 1, %s4212_s25   ;;  %s4454_s9 = sand.u32 (!%p5328_p2), 1, %s4037_s18  }
  0xb0   : > { %460 = sbr.rel (%p5328_p2) target bundleno = 2762 (0xaca), region = 48  ;;  %s3007_s26 = sshll.u32 (!%p5328_p2), %s4454_s9, 6 }
  0xb1   : > { %s463_s8 = scalar_lea.sflag (!%p5328_p2), [#allocation4], %s4451_s16  ;;  %s4458_s27 = scalar_lea.vmem (!%p5328_p2), [#allocation3], %s3007_s26 }
  0xb2   : > { %p5329_p4 = scmp.ne.s32.totalorder (!%p5328_p2), %s5303_s15, 0 }
  0xb5   : > { %3971 = dma.done.wait (%p5329_p4), %s463_s8, 1024  }
  0xb6   : > { %3973 = vsyncadd (%p5329_p4), %s463_s8, 4294966272  ;;  %s5330_s10 = sld [smem:[#allocation27_spill]]  ;;  %s472_s6 = scalar_lea.sflag [#allocation7], %s4451_s16 }
  0xb7   : > { %s5331_s2 = sld [smem:[#allocation38_spill]] }
  0xbc   : > { %s473_s0 = sand.u32 1, %s5330_s10  }
  0xbd   : > { %s4465_s21 = sshll.u32 %s473_s0, 3  ;;  %p5332_p6 = scmp.ne.s32.totalorder %s5331_s2, 0 }
  0xbe   : > { %s475_s19 = scalar_lea.vmem [#allocation6], %s4465_s21 }
  0xbf   : > { %3975 = dma.done.wait (%p5332_p6), %s472_s6, 256  }
  0xc0   : > { %3977 = vsyncadd (%p5332_p6), %s472_s6, 4294967040  ;;  %s484_s1 = scalar_lea.vmem [#allocation8], %s4465_s21  ;;  %p5333_p3 = scmp.eq.s32.totalorder %s4212_s25, 0 }
  0xc2   : > { %3979 = dma.done.wait (%p5333_p3), [#allocation10], 4096   ;;  %p5334_p1 = pmov %p5333_p3 }
  0xc3   : > { %s495_s15 = sand.u32 1, %s4017_s13  }
  0xc4   : > { %3981 = vsyncadd (%p5334_p1), [#allocation10], 4294963200  ;;  %s3011_s14 = sshll.u32 %s495_s15, 8 }
  0xc5   : > { %s4479_s5 = scalar_lea.vmem [#allocation11], %s3011_s14 }
  0xc6   : > { %3983 = dma.done.wait (%p4398_p0), %s463_s8, 4096  }
  0xc7   : > { %3985 = vsyncadd (%p4398_p0), %s463_s8, 4294963200  ;;  %s5335_s23 = sld [smem:[#allocation25_spill]] }
  0xcd   : > { %s504_s29 = sand.u32 1, %s5335_s23  }
  0xce   : > { %s3012_s30 = sshll.u32 %s504_s29, 8 }
  0xcf   : > { %s4486_s3 = scalar_lea.vmem [#allocation12], %s3012_s30 }
  0xd0   : > { %3987 = dma.done.wait (%p4427_p7), %s472_s6, 4096  }
  0xd1   : > { %3989 = vsyncadd (%p4427_p7), %s472_s6, 4294963200  ;;  %s5336_s25 = sld [smem:[#allocation31_spill]]  ;;  %s3013_s26 = sshll.u32 %s4454_s9, 5 }
  0xd2   : > { %s5337_s0 = sld [smem:[#allocation48_spill]]  ;;  %s4500_s14 = scalar_lea.vmem [#allocation13], %s3013_s26 }
  0xd3   : > { %s5258_s23 = scalar_lea.vmem [#allocation14], %s4465_s21  ;;  %s574_s12 = scalar_lea.vmem [#allocation16], %s4465_s21 }
  0xd7   : > { %p578_p9 = scmp.lt.s32.totalorder %s5336_s25, 1  ;;  %p3017_p0 = scmp.ne.s32.totalorder %s5336_s25, 0 }
  0xd9   : > { %s579_s7 = scalar_select %p578_p9, %s5336_s25, 1 }
  0xda   : > { %587 = sbr.rel (%p3017_p0) target bundleno = 485 (0x1e5), region = 76 }
  0xdb   : > { %s3016_s8 = sshll.u32 %s579_s7, 2 }
  0xdc   : > { %s581_s15 = scalar_lea.vmem %s5337_s0, %s3016_s8 }
  0xdd   : > { %v4498_v0 = vld [vmem:[%s581_s15] sm:$0xf] }
  0xdf   : > { %v3398_v1 = vld [vmem:[#allocation9 + $0xe4] ss:$16 sps:$4 sm:$0xff]   ;;  %v3400_v2 = vld [vmem:[#allocation9 + $0xec] ss:$16 sps:$4 sm:$0xff]   ;;  %v4073_v3 = vmov 0   ;;  %v633_v46 = vlaneseq }
  0xe0   : > { %845 = vmatprep.mubr.bf16.mxu0 %v4073_v3  ;;  %918 = vmatprep.mubr.bf16.mxu1 %v4073_v3  ;;  %v3402_v4 = vld [vmem:[#allocation9 + $0xe0] ss:$16 sps:$4 sm:$0xff]   ;;  %v3403_v5 = vld [vmem:[#allocation9 + $0xe8] ss:$16 sps:$4 sm:$0xff]   ;;  %v3404_v6 = vld [vmem:[#allocation9 + $0xc4] ss:$16 sps:$4 sm:$0xff]  }
  0xe1   : > { %813 = vmatprep.subr.bf16.mxu0 %v3398_v1  ;;  %886 = vmatprep.subr.bf16.mxu1 %v3400_v2  ;;  %v3406_v7 = vld [vmem:[#allocation9 + $0xcc] ss:$16 sps:$4 sm:$0xff]   ;;  %v3408_v8 = vld [vmem:[#allocation9 + $0xc0] ss:$16 sps:$4 sm:$0xff]   ;;  %v3409_v9 = vld [vmem:[#allocation9 + $0xc8] ss:$16 sps:$4 sm:$0xff]  }
  0xe2   : > { %814 = vmatpush1.bf16.msra.mxu0 %v3402_v4  ;;  %887 = vmatpush1.bf16.msra.mxu1 %v3403_v5  ;;  %v3410_v10 = vld [vmem:[#allocation9 + $0xa4] ss:$16 sps:$4 sm:$0xff]   ;;  %v3412_v11 = vld [vmem:[#allocation9 + $0xac] ss:$16 sps:$4 sm:$0xff]   ;;  %v3414_v12 = vld [vmem:[#allocation9 + $0xa0] ss:$16 sps:$4 sm:$0xff]  }
  0xe3   : > { %815 = vmatprep.subr.bf16.mxu0 %v3404_v6  ;;  %888 = vmatprep.subr.bf16.mxu1 %v3406_v7  ;;  %v3415_v13 = vld [vmem:[#allocation9 + $0xa8] ss:$16 sps:$4 sm:$0xff]   ;;  %v3416_v14 = vld [vmem:[#allocation9 + $0x84] ss:$16 sps:$4 sm:$0xff]   ;;  %v3418_v15 = vld [vmem:[#allocation9 + $0x8c] ss:$16 sps:$4 sm:$0xff]  }
  0xe4   : > { %v3420_v16 = vld [vmem:[#allocation9 + $0x80] ss:$16 sps:$4 sm:$0xff]   ;;  %v3421_v17 = vld [vmem:[#allocation9 + $0x88] ss:$16 sps:$4 sm:$0xff]   ;;  %v3422_v18 = vld [vmem:[#allocation9 + $0x64] ss:$16 sps:$4 sm:$0xff]  }
  0xe5   : > { %v3424_v19 = vld [vmem:[#allocation9 + $0x6c] ss:$16 sps:$4 sm:$0xff]   ;;  %v3426_v20 = vld [vmem:[#allocation9 + $0x60] ss:$16 sps:$4 sm:$0xff]   ;;  %v3427_v21 = vld [vmem:[#allocation9 + $0x68] ss:$16 sps:$4 sm:$0xff]  }
  0xe6   : > { %816 = vmatpush1.bf16.msra.mxu0 %v3408_v8  ;;  %889 = vmatpush1.bf16.msra.mxu1 %v3409_v9  ;;  %v3428_v22 = vld [vmem:[#allocation9 + $0x44] ss:$16 sps:$4 sm:$0xff]   ;;  %v3430_v23 = vld [vmem:[#allocation9 + $0x4c] ss:$16 sps:$4 sm:$0xff]   ;;  %v3432_v24 = vld [vmem:[#allocation9 + $0x40] ss:$16 sps:$4 sm:$0xff]  }
  0xe7   : > { %817 = vmatprep.subr.bf16.mxu0 %v3410_v10  ;;  %890 = vmatprep.subr.bf16.mxu1 %v3412_v11  ;;  %v3433_v25 = vld [vmem:[#allocation9 + $0x48] ss:$16 sps:$4 sm:$0xff]   ;;  %v3434_v26 = vld [vmem:[#allocation9 + $0x24] ss:$16 sps:$4 sm:$0xff]   ;;  %v3436_v27 = vld [vmem:[#allocation9 + $0x2c] ss:$16 sps:$4 sm:$0xff]  }
  0xe8   : > { %v3438_v28 = vld [vmem:[#allocation9 + $0x20] ss:$16 sps:$4 sm:$0xff]   ;;  %v3439_v29 = vld [vmem:[#allocation9 + $0x28] ss:$16 sps:$4 sm:$0xff]   ;;  %v3440_v30 = vld [vmem:[#allocation9 + $0x4] ss:$16 sps:$4 sm:$0xff]  }
  0xe9   : > { %v3442_v31 = vld [vmem:[#allocation9 + $0xc] ss:$16 sps:$4 sm:$0xff]   ;;  %v3444_v32 = vld [vmem:[#allocation9] ss:$16 sps:$4 sm:$0xff]   ;;  %v3445_v33 = vld [vmem:[#allocation9 + $0x8] ss:$16 sps:$4 sm:$0xff]  }
  0xea   : > { %818 = vmatpush1.bf16.msra.mxu0 %v3414_v12  ;;  %891 = vmatpush1.bf16.msra.mxu1 %v3415_v13  ;;  %v588_v34 = vld [vmem:[%s4458_s27] sm:$0xff]  ;;  %v589_v35 = vld [vmem:[%s4458_s27 + $0x8] sm:$0xff]  ;;  %v590_v37 = vld [vmem:[%s4458_s27 + $0x10] sm:$0xff]  ;;  %v634_v47 = vshrl.u32 %v633_v46, 7 }
  0xeb   : > { %819 = vmatprep.subr.bf16.mxu0 %v3416_v14  ;;  %892 = vmatprep.subr.bf16.mxu1 %v3418_v15  ;;  %v596_v36 = vpack.c.bf16 %v589_v35, %v588_v34  ;;  %v591_v38 = vld [vmem:[%s4458_s27 + $0x18] sm:$0xff]  ;;  %v592_v40 = vld [vmem:[%s4458_s27 + $0x20] sm:$0xff]  ;;  %v593_v41 = vld [vmem:[%s4458_s27 + $0x28] sm:$0xff] }
  0xec   : > { %v597_v39 = vpack.c.bf16 %v591_v38, %v590_v37  ;;  %v598_v42 = vpack.c.bf16 %v593_v41, %v592_v40  ;;  %v594_v43 = vld [vmem:[%s4458_s27 + $0x30] sm:$0xff]  ;;  %v595_v44 = vld [vmem:[%s4458_s27 + $0x38] sm:$0xff]  ;;  %v635_v48 = vsub.s32 0, %v634_v47  ;;  %v643_v49 = vsub.s32 2, %v634_v47 }
  0xed   : > { %v599_v45 = vpack.c.bf16 %v595_v44, %v594_v43  ;;  %v639_v50 = vsub.s32 1, %v634_v47  ;;  %v647_v51 = vsub.s32 3, %v634_v47 }
  0xee   : > { %820 = vmatpush1.bf16.msra.mxu0 %v3420_v16  ;;  %893 = vmatpush1.bf16.msra.mxu1 %v3421_v17  ;;  %v4522_v52 = vrot.slane %v4498_v0, %v635_v48  ;;  %v4525_v53 = vrot.slane %v4498_v0, %v643_v49 }
  0xef   : > { %821 = vmatprep.subr.bf16.mxu0 %v3422_v18  ;;  %894 = vmatprep.subr.bf16.mxu1 %v3424_v19  ;;  %v4528_v54 = vrot.slane %v4498_v0, %v639_v50  ;;  %v4531_v55 = vrot.slane %v4498_v0, %v647_v51 }
  0xf2   : > { %822 = vmatpush1.bf16.msra.mxu0 %v3426_v20  ;;  %895 = vmatpush1.bf16.msra.mxu1 %v3427_v21 }
  0xf3   : > { %823 = vmatprep.subr.bf16.mxu0 %v3428_v22  ;;  %896 = vmatprep.subr.bf16.mxu1 %v3430_v23 }
  0xf6   : > { %824 = vmatpush1.bf16.msra.mxu0 %v3432_v24  ;;  %897 = vmatpush1.bf16.msra.mxu1 %v3433_v25 }
  0xf7   : > { %825 = vmatprep.subr.bf16.mxu0 %v3434_v26  ;;  %898 = vmatprep.subr.bf16.mxu1 %v3436_v27 }
  0xfa   : > { %826 = vmatpush1.bf16.msra.mxu0 %v3438_v28  ;;  %899 = vmatpush1.bf16.msra.mxu1 %v3439_v29 }
  0xfb   : > { %827 = vmatprep.subr.bf16.mxu0 %v3440_v30  ;;  %900 = vmatprep.subr.bf16.mxu1 %v3442_v31 }
  0xfe   : > { %828 = vmatpush1.bf16.msra.mxu0 %v3444_v32  ;;  %901 = vmatpush1.bf16.msra.mxu1 %v3445_v33 }
 0x101   : > { %846 = vmatmul.mubr.bf16.vlgmr.msra.gmra.mxu0 %v596_v36  ;;  %919 = vmatmul.mubr.bf16.vlgmr.msra.gmra.mxu1 %v596_v36 }
 0x102   : > { %855 = vmatprep.mubr.bf16.mxu0 %v4073_v3  ;;  %928 = vmatprep.mubr.bf16.mxu1 %v4073_v3 }
 0x109   : > { %856 = vmatmul.mubr.bf16.gmra.mxu0 %v597_v39  ;;  %929 = vmatmul.mubr.bf16.gmra.mxu1 %v597_v39 }
 0x10a   : > { %865 = vmatprep.mubr.bf16.mxu0 %v4073_v3  ;;  %938 = vmatprep.mubr.bf16.mxu1 %v4073_v3 }
 0x111   : > { %866 = vmatmul.mubr.bf16.gmra.mxu0 %v598_v42  ;;  %939 = vmatmul.mubr.bf16.gmra.mxu1 %v598_v42 }
 0x112   : > { %875 = vmatprep.mubr.bf16.mxu0 %v4073_v3  ;;  %948 = vmatprep.mubr.bf16.mxu1 %v4073_v3 }
 0x119   : > { %876 = vmatmul.mubr.bf16.gmra.mxu0 %v599_v45  ;;  %949 = vmatmul.mubr.bf16.gmra.mxu1 %v599_v45 }
 0x1c1   : > { %v847_v56 = vpop.f32.mrf.mxu0  ;;  %v920_v57 = vpop.f32.mrf.mxu1 }
 0x1c2   : > { %v848_v60 = vadd.f32 %v847_v56, %v4522_v52  ;;  %v921_v61 = vadd.f32 %v920_v57, %v4525_v53 }
 0x1c3   : > { %v849_v58 = vpop.f32.mrf.mxu0  ;;  %v922_v59 = vpop.f32.mrf.mxu1 }
 0x1c4   : > { %v850_v62 = vadd.f32 %v849_v58, %v4528_v54  ;;  %v923_v63 = vadd.f32 %v922_v59, %v4531_v55 }
 0x1c5   : > { %v851_v1 = vpop.f32.mrf.mxu0  ;;  %v924_v2 = vpop.f32.mrf.mxu1 }
 0x1c6   : > { %v3165_v3 = vpack.c.bf16 %v850_v62, %v848_v60  ;;  %v3166_v4 = vpack.c.bf16 %v923_v63, %v921_v61  ;;  %v852_v7 = vadd.f32 %v851_v1, %v4522_v52  ;;  %v925_v8 = vadd.f32 %v924_v2, %v4525_v53 }
 0x1c7   : > { %v853_v5 = vpop.f32.mrf.mxu0  ;;  %v926_v6 = vpop.f32.mrf.mxu1 }
 0x1c8   : > { %1055 = vst [vmem:[#allocation2 + $0x30] sm:$0xff] %v3165_v3  ;;  %1056 = vst [vmem:[#allocation2] sm:$0xff] %v3166_v4  ;;  %v854_v9 = vadd.f32 %v853_v5, %v4528_v54  ;;  %v927_v10 = vadd.f32 %v926_v6, %v4531_v55 }
 0x1c9   : > { %v857_v11 = vpop.f32.mrf.mxu0  ;;  %v930_v12 = vpop.f32.mrf.mxu1 }
 0x1ca   : > { %v3167_v13 = vpack.c.bf16 %v854_v9, %v852_v7  ;;  %v3168_v14 = vpack.c.bf16 %v927_v10, %v925_v8  ;;  %v858_v17 = vadd.f32 %v857_v11, %v4522_v52  ;;  %v931_v18 = vadd.f32 %v930_v12, %v4525_v53 }
 0x1cb   : > { %v859_v15 = vpop.f32.mrf.mxu0  ;;  %v932_v16 = vpop.f32.mrf.mxu1 }
 0x1cc   : > { %1057 = vst [vmem:[#allocation2 + $0x58] sm:$0xff] %v3167_v13  ;;  %1058 = vst [vmem:[#allocation2 + $0x18] sm:$0xff] %v3168_v14  ;;  %v860_v19 = vadd.f32 %v859_v15, %v4528_v54  ;;  %v933_v20 = vadd.f32 %v932_v16, %v4531_v55 }
 0x1cd   : > { %v861_v21 = vpop.f32.mrf.mxu0  ;;  %v934_v22 = vpop.f32.mrf.mxu1 }
 0x1ce   : > { %v3169_v23 = vpack.c.bf16 %v860_v19, %v858_v17  ;;  %v3170_v24 = vpack.c.bf16 %v933_v20, %v931_v18  ;;  %v862_v27 = vadd.f32 %v861_v21, %v4522_v52  ;;  %v935_v28 = vadd.f32 %v934_v22, %v4525_v53 }
 0x1cf   : > { %v863_v25 = vpop.f32.mrf.mxu0  ;;  %v936_v26 = vpop.f32.mrf.mxu1 }
 0x1d0   : > { %1059 = vst [vmem:[#allocation2 + $0x50] sm:$0xff] %v3169_v23  ;;  %1060 = vst [vmem:[#allocation2 + $0x68] sm:$0xff] %v3170_v24  ;;  %v864_v29 = vadd.f32 %v863_v25, %v4528_v54  ;;  %v937_v30 = vadd.f32 %v936_v26, %v4531_v55 }
 0x1d1   : > { %v867_v31 = vpop.f32.mrf.mxu0  ;;  %v940_v32 = vpop.f32.mrf.mxu1 }
 0x1d2   : > { %v3171_v33 = vpack.c.bf16 %v864_v29, %v862_v27  ;;  %v3172_v34 = vpack.c.bf16 %v937_v30, %v935_v28  ;;  %v868_v37 = vadd.f32 %v867_v31, %v4522_v52  ;;  %v941_v38 = vadd.f32 %v940_v32, %v4525_v53 }
 0x1d3   : > { %v869_v35 = vpop.f32.mrf.mxu0  ;;  %v942_v36 = vpop.f32.mrf.mxu1 }
 0x1d4   : > { %1061 = vst [vmem:[#allocation2 + $0x8] sm:$0xff] %v3171_v33  ;;  %1062 = vst [vmem:[#allocation2 + $0x48] sm:$0xff] %v3172_v34  ;;  %v870_v39 = vadd.f32 %v869_v35, %v4528_v54  ;;  %v943_v40 = vadd.f32 %v942_v36, %v4531_v55 }
 0x1d5   : > { %v871_v41 = vpop.f32.mrf.mxu0  ;;  %v944_v42 = vpop.f32.mrf.mxu1 }
 0x1d6   : > { %v3173_v43 = vpack.c.bf16 %v870_v39, %v868_v37  ;;  %v3174_v44 = vpack.c.bf16 %v943_v40, %v941_v38  ;;  %v872_v47 = vadd.f32 %v871_v41, %v4522_v52  ;;  %v945_v48 = vadd.f32 %v944_v42, %v4525_v53 }
 0x1d7   : > { %v873_v45 = vpop.f32.mrf.mxu0  ;;  %v946_v46 = vpop.f32.mrf.mxu1 }
 0x1d8   : > { %1063 = vst [vmem:[#allocation2 + $0x40] sm:$0xff] %v3173_v43  ;;  %1064 = vst [vmem:[#allocation2 + $0x20] sm:$0xff] %v3174_v44  ;;  %v874_v49 = vadd.f32 %v873_v45, %v4528_v54  ;;  %v947_v50 = vadd.f32 %v946_v46, %v4531_v55 }
 0x1d9   : > { %v877_v51 = vpop.f32.mrf.mxu0  ;;  %v950_v56 = vpop.f32.mrf.mxu1 }
 0x1da   : > { %v3175_v57 = vpack.c.bf16 %v874_v49, %v872_v47  ;;  %v3176_v58 = vpack.c.bf16 %v947_v50, %v945_v48  ;;  %v878_v61 = vadd.f32 %v877_v51, %v4522_v52  ;;  %v951_v62 = vadd.f32 %v950_v56, %v4525_v53 }
 0x1db   : > { %v879_v59 = vpop.f32.mrf.mxu0  ;;  %v952_v60 = vpop.f32.mrf.mxu1 }
 0x1dc   : > { %1065 = vst [vmem:[#allocation2 + $0x10] sm:$0xff] %v3175_v57  ;;  %1066 = vst [vmem:[#allocation2 + $0x38] sm:$0xff] %v3176_v58  ;;  %v880_v63 = vadd.f32 %v879_v59, %v4528_v54  ;;  %v953_v1 = vadd.f32 %v952_v60, %v4531_v55 }
 0x1dd   : > { %v881_v2 = vpop.f32.mrf.mxu0  ;;  %v954_v3 = vpop.f32.mrf.mxu1 }
 0x1de   : > { %v3177_v4 = vpack.c.bf16 %v880_v63, %v878_v61  ;;  %v3178_v5 = vpack.c.bf16 %v953_v1, %v951_v62  ;;  %v882_v8 = vadd.f32 %v881_v2, %v4522_v52  ;;  %v955_v9 = vadd.f32 %v954_v3, %v4525_v53 }
 0x1df   : > { %v883_v6 = vpop.f32.mrf.mxu0  ;;  %v956_v7 = vpop.f32.mrf.mxu1 }
 0x1e0   : > { %1067 = vst [vmem:[#allocation2 + $0x60] sm:$0xff] %v3177_v4  ;;  %1068 = vst [vmem:[#allocation2 + $0x70] sm:$0xff] %v3178_v5  ;;  %v884_v10 = vadd.f32 %v883_v6, %v4528_v54  ;;  %v957_v11 = vadd.f32 %v956_v7, %v4531_v55 }
 0x1e2   : > { %v3179_v12 = vpack.c.bf16 %v884_v10, %v882_v8  ;;  %v3180_v13 = vpack.c.bf16 %v957_v11, %v955_v9 }
 0x1e4   : > { %1069 = vst [vmem:[#allocation2 + $0x78] sm:$0xff] %v3179_v12  ;;  %1070 = vst [vmem:[#allocation2 + $0x28] sm:$0xff] %v3180_v13 }
 0x1e5 PF: > { %s5338_s27 = sld [smem:[#allocation31_spill]] }
 0x1eb   : > { %p3066_p7 = scmp.le.s32.totalorder %s5338_s27, 0 }
 0x1ed   : > { %1074 = sbr.rel (%p3066_p7) target bundleno = 760 (0x2f8), region = 80 }
 0x1f2   : > { %v3446_v52 = vld [vmem:[%s4479_s5 + $0xe4] ss:$16 sps:$4 sm:$0xff]   ;;  %v3448_v53 = vld [vmem:[%s4479_s5 + $0xec] ss:$16 sps:$4 sm:$0xff]   ;;  %v4074_v54 = vmov 0   ;;  %v1116_v47 = vlaneseq }
 0x1f3   : > { %1352 = vmatprep.mubr.bf16.mxu0 %v4074_v54  ;;  %1425 = vmatprep.mubr.bf16.mxu1 %v4074_v54  ;;  %v3450_v55 = vld [vmem:[%s4479_s5 + $0xe0] ss:$16 sps:$4 sm:$0xff]   ;;  %v3451_v14 = vld [vmem:[%s4479_s5 + $0xe8] ss:$16 sps:$4 sm:$0xff]   ;;  %v3452_v15 = vld [vmem:[%s4479_s5 + $0xc4] ss:$16 sps:$4 sm:$0xff]  }
 0x1f4   : > { %1320 = vmatprep.subr.bf16.mxu0 %v3446_v52  ;;  %1393 = vmatprep.subr.bf16.mxu1 %v3448_v53  ;;  %v3454_v16 = vld [vmem:[%s4479_s5 + $0xcc] ss:$16 sps:$4 sm:$0xff]   ;;  %v3456_v17 = vld [vmem:[%s4479_s5 + $0xc0] ss:$16 sps:$4 sm:$0xff]   ;;  %v3457_v18 = vld [vmem:[%s4479_s5 + $0xc8] ss:$16 sps:$4 sm:$0xff]  }
 0x1f5   : > { %1321 = vmatpush1.bf16.msra.mxu0 %v3450_v55  ;;  %1394 = vmatpush1.bf16.msra.mxu1 %v3451_v14  ;;  %v3458_v19 = vld [vmem:[%s4479_s5 + $0xa4] ss:$16 sps:$4 sm:$0xff]   ;;  %v3460_v20 = vld [vmem:[%s4479_s5 + $0xac] ss:$16 sps:$4 sm:$0xff]   ;;  %v3462_v21 = vld [vmem:[%s4479_s5 + $0xa0] ss:$16 sps:$4 sm:$0xff]  }
 0x1f6   : > { %1322 = vmatprep.subr.bf16.mxu0 %v3452_v15  ;;  %1395 = vmatprep.subr.bf16.mxu1 %v3454_v16  ;;  %v3463_v22 = vld [vmem:[%s4479_s5 + $0xa8] ss:$16 sps:$4 sm:$0xff]   ;;  %v3464_v23 = vld [vmem:[%s4479_s5 + $0x84] ss:$16 sps:$4 sm:$0xff]   ;;  %v3466_v24 = vld [vmem:[%s4479_s5 + $0x8c] ss:$16 sps:$4 sm:$0xff]  }
 0x1f7   : > { %v3468_v25 = vld [vmem:[%s4479_s5 + $0x80] ss:$16 sps:$4 sm:$0xff]   ;;  %v3469_v26 = vld [vmem:[%s4479_s5 + $0x88] ss:$16 sps:$4 sm:$0xff]   ;;  %v3470_v27 = vld [vmem:[%s4479_s5 + $0x64] ss:$16 sps:$4 sm:$0xff]  }
 0x1f8   : > { %v3472_v28 = vld [vmem:[%s4479_s5 + $0x6c] ss:$16 sps:$4 sm:$0xff]   ;;  %v3474_v29 = vld [vmem:[%s4479_s5 + $0x60] ss:$16 sps:$4 sm:$0xff]   ;;  %v3475_v30 = vld [vmem:[%s4479_s5 + $0x68] ss:$16 sps:$4 sm:$0xff]  }
 0x1f9   : > { %1323 = vmatpush1.bf16.msra.mxu0 %v3456_v17  ;;  %1396 = vmatpush1.bf16.msra.mxu1 %v3457_v18  ;;  %v3476_v31 = vld [vmem:[%s4479_s5 + $0x44] ss:$16 sps:$4 sm:$0xff]   ;;  %v3478_v32 = vld [vmem:[%s4479_s5 + $0x4c] ss:$16 sps:$4 sm:$0xff]   ;;  %v3480_v33 = vld [vmem:[%s4479_s5 + $0x40] ss:$16 sps:$4 sm:$0xff]  }
 0x1fa   : > { %1324 = vmatprep.subr.bf16.mxu0 %v3458_v19  ;;  %1397 = vmatprep.subr.bf16.mxu1 %v3460_v20  ;;  %v3481_v34 = vld [vmem:[%s4479_s5 + $0x48] ss:$16 sps:$4 sm:$0xff]   ;;  %v3482_v35 = vld [vmem:[%s4479_s5 + $0x24] ss:$16 sps:$4 sm:$0xff]   ;;  %v3484_v36 = vld [vmem:[%s4479_s5 + $0x2c] ss:$16 sps:$4 sm:$0xff]  }
 0x1fb   : > { %v3486_v37 = vld [vmem:[%s4479_s5 + $0x20] ss:$16 sps:$4 sm:$0xff]   ;;  %v3487_v38 = vld [vmem:[%s4479_s5 + $0x28] ss:$16 sps:$4 sm:$0xff]   ;;  %v3488_v39 = vld [vmem:[%s4479_s5 + $0x4] ss:$16 sps:$4 sm:$0xff]  }
 0x1fc   : > { %v3490_v40 = vld [vmem:[%s4479_s5 + $0xc] ss:$16 sps:$4 sm:$0xff]   ;;  %v3492_v41 = vld [vmem:[%s4479_s5] ss:$16 sps:$4 sm:$0xff]   ;;  %v3493_v42 = vld [vmem:[%s4479_s5 + $0x8] ss:$16 sps:$4 sm:$0xff]  }
 0x1fd   : > { %1325 = vmatpush1.bf16.msra.mxu0 %v3462_v21  ;;  %1398 = vmatpush1.bf16.msra.mxu1 %v3463_v22  ;;  %v3494_v43 = vld [vmem:[%s4500_s14] sm:$0xff]   ;;  %v3495_v44 = vld [vmem:[%s4500_s14 + $0x8] sm:$0xff]   ;;  %v3496_v45 = vld [vmem:[%s4500_s14 + $0x10] sm:$0xff]   ;;  %v1117_v48 = vshrl.u32 %v1116_v47, 7 }
 0x1fe   : > { %1326 = vmatprep.subr.bf16.mxu0 %v3464_v23  ;;  %1399 = vmatprep.subr.bf16.mxu1 %v3466_v24  ;;  %v3497_v46 = vld [vmem:[%s4500_s14 + $0x18] sm:$0xff]  }
 0x1ff   : > { %v1118_v49 = vsub.s32 0, %v1117_v48  ;;  %v1126_v50 = vsub.s32 2, %v1117_v48  ;;  %v1122_v51 = vsub.s32 1, %v1117_v48  ;;  %v1130_v56 = vsub.s32 3, %v1117_v48 }
 0x201   : > { %1327 = vmatpush1.bf16.msra.mxu0 %v3468_v25  ;;  %1400 = vmatpush1.bf16.msra.mxu1 %v3469_v26  ;;  %v4611_v57 = vrot.slane %v4498_v0, %v1118_v49  ;;  %v4614_v58 = vrot.slane %v4498_v0, %v1126_v50  ;;  %v4617_v59 = vrot.slane %v4498_v0, %v1122_v51 }
 0x202   : > { %1328 = vmatprep.subr.bf16.mxu0 %v3470_v27  ;;  %1401 = vmatprep.subr.bf16.mxu1 %v3472_v28  ;;  %v4620_v60 = vrot.slane %v4498_v0, %v1130_v56 }
 0x205   : > { %1329 = vmatpush1.bf16.msra.mxu0 %v3474_v29  ;;  %1402 = vmatpush1.bf16.msra.mxu1 %v3475_v30 }
 0x206   : > { %1330 = vmatprep.subr.bf16.mxu0 %v3476_v31  ;;  %1403 = vmatprep.subr.bf16.mxu1 %v3478_v32 }
 0x209   : > { %1331 = vmatpush1.bf16.msra.mxu0 %v3480_v33  ;;  %1404 = vmatpush1.bf16.msra.mxu1 %v3481_v34 }
 0x20a   : > { %1332 = vmatprep.subr.bf16.mxu0 %v3482_v35  ;;  %1405 = vmatprep.subr.bf16.mxu1 %v3484_v36 }
 0x20d   : > { %1333 = vmatpush1.bf16.msra.mxu0 %v3486_v37  ;;  %1406 = vmatpush1.bf16.msra.mxu1 %v3487_v38 }
 0x20e   : > { %1334 = vmatprep.subr.bf16.mxu0 %v3488_v39  ;;  %1407 = vmatprep.subr.bf16.mxu1 %v3490_v40 }
 0x211   : > { %1335 = vmatpush1.bf16.msra.mxu0 %v3492_v41  ;;  %1408 = vmatpush1.bf16.msra.mxu1 %v3493_v42 }
 0x214   : > { %1353 = vmatmul.mubr.bf16.vlgmr.msra.gmra.mxu0 %v3494_v43  ;;  %1426 = vmatmul.mubr.bf16.vlgmr.msra.gmra.mxu1 %v3494_v43 }
 0x215   : > { %1362 = vmatprep.mubr.bf16.mxu0 %v4074_v54  ;;  %1435 = vmatprep.mubr.bf16.mxu1 %v4074_v54 }
 0x21c   : > { %1363 = vmatmul.mubr.bf16.gmra.mxu0 %v3495_v44  ;;  %1436 = vmatmul.mubr.bf16.gmra.mxu1 %v3495_v44 }
 0x21d   : > { %1372 = vmatprep.mubr.bf16.mxu0 %v4074_v54  ;;  %1445 = vmatprep.mubr.bf16.mxu1 %v4074_v54 }
 0x224   : > { %1373 = vmatmul.mubr.bf16.gmra.mxu0 %v3496_v45  ;;  %1446 = vmatmul.mubr.bf16.gmra.mxu1 %v3496_v45 }
 0x225   : > { %1382 = vmatprep.mubr.bf16.mxu0 %v4074_v54  ;;  %1455 = vmatprep.mubr.bf16.mxu1 %v4074_v54 }
 0x22c   : > { %1383 = vmatmul.mubr.bf16.gmra.mxu0 %v3497_v46  ;;  %1456 = vmatmul.mubr.bf16.gmra.mxu1 %v3497_v46 }
 0x2d4   : > { %v1354_v61 = vpop.f32.mrf.mxu0  ;;  %v1427_v62 = vpop.f32.mrf.mxu1 }
 0x2d5   : > { %v1355_v2 = vadd.f32 %v1354_v61, %v4611_v57  ;;  %v1428_v3 = vadd.f32 %v1427_v62, %v4614_v58 }
 0x2d6   : > { %v1356_v63 = vpop.f32.mrf.mxu0  ;;  %v1429_v1 = vpop.f32.mrf.mxu1 }
 0x2d7   : > { %v1357_v4 = vadd.f32 %v1356_v63, %v4617_v59  ;;  %v1430_v5 = vadd.f32 %v1429_v1, %v4620_v60 }
 0x2d8   : > { %v1358_v6 = vpop.f32.mrf.mxu0  ;;  %v1431_v7 = vpop.f32.mrf.mxu1 }
 0x2d9   : > { %v3181_v8 = vpack.c.bf16 %v1357_v4, %v1355_v2  ;;  %v3182_v9 = vpack.c.bf16 %v1430_v5, %v1428_v3  ;;  %v1359_v0 = vadd.f32 %v1358_v6, %v4611_v57  ;;  %v1432_v12 = vadd.f32 %v1431_v7, %v4614_v58 }
 0x2da   : > { %v1360_v10 = vpop.f32.mrf.mxu0  ;;  %v1433_v11 = vpop.f32.mrf.mxu1 }
 0x2db   : > { %1562 = vst [vmem:[#allocation2 + $0x30] sm:$0xff] %v3181_v8  ;;  %1563 = vst [vmem:[#allocation2] sm:$0xff] %v3182_v9  ;;  %v1361_v13 = vadd.f32 %v1360_v10, %v4617_v59  ;;  %v1434_v52 = vadd.f32 %v1433_v11, %v4620_v60 }
 0x2dc   : > { %v1364_v53 = vpop.f32.mrf.mxu0  ;;  %v1437_v54 = vpop.f32.mrf.mxu1 }
 0x2dd   : > { %v3183_v55 = vpack.c.bf16 %v1361_v13, %v1359_v0  ;;  %v3184_v14 = vpack.c.bf16 %v1434_v52, %v1432_v12  ;;  %v1365_v17 = vadd.f32 %v1364_v53, %v4611_v57  ;;  %v1438_v18 = vadd.f32 %v1437_v54, %v4614_v58 }
 0x2de   : > { %v1366_v15 = vpop.f32.mrf.mxu0  ;;  %v1439_v16 = vpop.f32.mrf.mxu1 }
 0x2df   : > { %1564 = vst [vmem:[#allocation2 + $0x58] sm:$0xff] %v3183_v55  ;;  %1565 = vst [vmem:[#allocation2 + $0x18] sm:$0xff] %v3184_v14  ;;  %v1367_v19 = vadd.f32 %v1366_v15, %v4617_v59  ;;  %v1440_v20 = vadd.f32 %v1439_v16, %v4620_v60 }
 0x2e0   : > { %v1368_v21 = vpop.f32.mrf.mxu0  ;;  %v1441_v22 = vpop.f32.mrf.mxu1 }
 0x2e1   : > { %v3185_v23 = vpack.c.bf16 %v1367_v19, %v1365_v17  ;;  %v3186_v24 = vpack.c.bf16 %v1440_v20, %v1438_v18  ;;  %v1369_v27 = vadd.f32 %v1368_v21, %v4611_v57  ;;  %v1442_v28 = vadd.f32 %v1441_v22, %v4614_v58 }
 0x2e2   : > { %v1370_v25 = vpop.f32.mrf.mxu0  ;;  %v1443_v26 = vpop.f32.mrf.mxu1 }
 0x2e3   : > { %1566 = vst [vmem:[#allocation2 + $0x50] sm:$0xff] %v3185_v23  ;;  %1567 = vst [vmem:[#allocation2 + $0x68] sm:$0xff] %v3186_v24  ;;  %v1371_v29 = vadd.f32 %v1370_v25, %v4617_v59  ;;  %v1444_v30 = vadd.f32 %v1443_v26, %v4620_v60 }
 0x2e4   : > { %v1374_v31 = vpop.f32.mrf.mxu0  ;;  %v1447_v32 = vpop.f32.mrf.mxu1 }
 0x2e5   : > { %v3187_v33 = vpack.c.bf16 %v1371_v29, %v1369_v27  ;;  %v3188_v34 = vpack.c.bf16 %v1444_v30, %v1442_v28  ;;  %v1375_v37 = vadd.f32 %v1374_v31, %v4611_v57  ;;  %v1448_v38 = vadd.f32 %v1447_v32, %v4614_v58 }
 0x2e6   : > { %v1376_v35 = vpop.f32.mrf.mxu0  ;;  %v1449_v36 = vpop.f32.mrf.mxu1 }
 0x2e7   : > { %1568 = vst [vmem:[#allocation2 + $0x8] sm:$0xff] %v3187_v33  ;;  %1569 = vst [vmem:[#allocation2 + $0x48] sm:$0xff] %v3188_v34  ;;  %v1377_v39 = vadd.f32 %v1376_v35, %v4617_v59  ;;  %v1450_v40 = vadd.f32 %v1449_v36, %v4620_v60 }
 0x2e8   : > { %v1378_v41 = vpop.f32.mrf.mxu0  ;;  %v1451_v42 = vpop.f32.mrf.mxu1 }
 0x2e9   : > { %v3189_v43 = vpack.c.bf16 %v1377_v39, %v1375_v37  ;;  %v3190_v44 = vpack.c.bf16 %v1450_v40, %v1448_v38  ;;  %v1379_v47 = vadd.f32 %v1378_v41, %v4611_v57  ;;  %v1452_v48 = vadd.f32 %v1451_v42, %v4614_v58 }
 0x2ea   : > { %v1380_v45 = vpop.f32.mrf.mxu0  ;;  %v1453_v46 = vpop.f32.mrf.mxu1 }
 0x2eb   : > { %1570 = vst [vmem:[#allocation2 + $0x40] sm:$0xff] %v3189_v43  ;;  %1571 = vst [vmem:[#allocation2 + $0x20] sm:$0xff] %v3190_v44  ;;  %v1381_v49 = vadd.f32 %v1380_v45, %v4617_v59  ;;  %v1454_v50 = vadd.f32 %v1453_v46, %v4620_v60 }
 0x2ec   : > { %v1384_v51 = vpop.f32.mrf.mxu0  ;;  %v1457_v56 = vpop.f32.mrf.mxu1 }
 0x2ed   : > { %v3191_v61 = vpack.c.bf16 %v1381_v49, %v1379_v47  ;;  %v3192_v62 = vpack.c.bf16 %v1454_v50, %v1452_v48  ;;  %v1385_v2 = vadd.f32 %v1384_v51, %v4611_v57  ;;  %v1458_v3 = vadd.f32 %v1457_v56, %v4614_v58 }
 0x2ee   : > { %v1386_v63 = vpop.f32.mrf.mxu0  ;;  %v1459_v1 = vpop.f32.mrf.mxu1 }
 0x2ef   : > { %1572 = vst [vmem:[#allocation2 + $0x10] sm:$0xff] %v3191_v61  ;;  %1573 = vst [vmem:[#allocation2 + $0x38] sm:$0xff] %v3192_v62  ;;  %v1387_v4 = vadd.f32 %v1386_v63, %v4617_v59  ;;  %v1460_v5 = vadd.f32 %v1459_v1, %v4620_v60 }
 0x2f0   : > { %v1388_v6 = vpop.f32.mrf.mxu0  ;;  %v1461_v7 = vpop.f32.mrf.mxu1 }
 0x2f1   : > { %v3193_v8 = vpack.c.bf16 %v1387_v4, %v1385_v2  ;;  %v3194_v9 = vpack.c.bf16 %v1460_v5, %v1458_v3  ;;  %v1389_v0 = vadd.f32 %v1388_v6, %v4611_v57  ;;  %v1462_v12 = vadd.f32 %v1461_v7, %v4614_v58 }
 0x2f2   : > { %v1390_v10 = vpop.f32.mrf.mxu0  ;;  %v1463_v11 = vpop.f32.mrf.mxu1 }
 0x2f3   : > { %1574 = vst [vmem:[#allocation2 + $0x60] sm:$0xff] %v3193_v8  ;;  %1575 = vst [vmem:[#allocation2 + $0x70] sm:$0xff] %v3194_v9  ;;  %v1391_v13 = vadd.f32 %v1390_v10, %v4617_v59  ;;  %v1464_v52 = vadd.f32 %v1463_v11, %v4620_v60 }
 0x2f5   : > { %v3195_v53 = vpack.c.bf16 %v1391_v13, %v1389_v0  ;;  %v3196_v54 = vpack.c.bf16 %v1464_v52, %v1462_v12 }
 0x2f7   : > { %1576 = vst [vmem:[#allocation2 + $0x78] sm:$0xff] %v3195_v53  ;;  %1577 = vst [vmem:[#allocation2 + $0x28] sm:$0xff] %v3196_v54 }
 0x2f8 PF: > { %v4655_v57 = vld [vmem:[%s4486_s3 + $0xe4] ss:$16 sps:$4 sm:$0xff]   ;;  %v4658_v58 = vld [vmem:[%s4486_s3 + $0xe0] ss:$16 sps:$4 sm:$0xff]   ;;  %v4075_v59 = vmov 0   ;;  %s5339_s6 = sld [smem:[#allocation31_spill]] }
 0x2f9   : > { %1811 = vmatprep.mubr.bf16.mxu0 %v4075_v59  ;;  %1852 = vmatprep.mubr.bf16.mxu1 %v4075_v59  ;;  %v4664_v60 = vld [vmem:[%s4486_s3 + $0xec] ss:$16 sps:$4 sm:$0xff]   ;;  %v4667_v55 = vld [vmem:[%s4486_s3 + $0xe8] ss:$16 sps:$4 sm:$0xff]   ;;  %v4671_v14 = vld [vmem:[%s4486_s3 + $0xc4] ss:$16 sps:$4 sm:$0xff]  }
 0x2fa   : > { %1779 = vmatprep.subr.bf16.mxu0 %v4655_v57  ;;  %v4674_v15 = vld [vmem:[%s4486_s3 + $0xc0] ss:$16 sps:$4 sm:$0xff]   ;;  %1820 = vmatprep.subr.bf16.mxu1 %v4664_v60  ;;  %v4678_v16 = vld [vmem:[%s4486_s3 + $0xcc] ss:$16 sps:$4 sm:$0xff]   ;;  %v4683_v17 = vld [vmem:[%s4486_s3 + $0xc8] ss:$16 sps:$4 sm:$0xff]  }
 0x2fb   : > { %1780 = vmatpush1.bf16.msra.mxu0 %v4658_v58  ;;  %1821 = vmatpush1.bf16.msra.mxu1 %v4667_v55  ;;  %v4687_v18 = vld [vmem:[%s4486_s3 + $0xa4] ss:$16 sps:$4 sm:$0xff]   ;;  %v4691_v19 = vld [vmem:[%s4486_s3 + $0xa0] ss:$16 sps:$4 sm:$0xff]   ;;  %v4694_v20 = vld [vmem:[%s4486_s3 + $0xac] ss:$16 sps:$4 sm:$0xff]  }
 0x2fc   : > { %1781 = vmatprep.subr.bf16.mxu0 %v4671_v14  ;;  %1822 = vmatprep.subr.bf16.mxu1 %v4678_v16  ;;  %v4698_v21 = vld [vmem:[%s4486_s3 + $0x84] ss:$16 sps:$4 sm:$0xff]   ;;  %v4702_v22 = vld [vmem:[%s4486_s3 + $0xa8] ss:$16 sps:$4 sm:$0xff]   ;;  %v4706_v23 = vld [vmem:[%s4486_s3 + $0x8c] ss:$16 sps:$4 sm:$0xff]  }
 0x2fd   : > { %v4710_v24 = vld [vmem:[%s4486_s3 + $0x80] ss:$16 sps:$4 sm:$0xff]   ;;  %v4714_v25 = vld [vmem:[%s4486_s3 + $0x64] ss:$16 sps:$4 sm:$0xff]   ;;  %v4718_v26 = vld [vmem:[%s4486_s3 + $0x88] ss:$16 sps:$4 sm:$0xff]  }
 0x2fe   : > { %v4722_v27 = vld [vmem:[%s4486_s3 + $0x6c] ss:$16 sps:$4 sm:$0xff]   ;;  %v4726_v28 = vld [vmem:[%s4486_s3 + $0x60] ss:$16 sps:$4 sm:$0xff]   ;;  %v4730_v29 = vld [vmem:[%s4486_s3 + $0x44] ss:$16 sps:$4 sm:$0xff]  }
 0x2ff   : > { %1782 = vmatpush1.bf16.msra.mxu0 %v4674_v15  ;;  %1823 = vmatpush1.bf16.msra.mxu1 %v4683_v17  ;;  %v4734_v30 = vld [vmem:[%s4486_s3 + $0x68] ss:$16 sps:$4 sm:$0xff]   ;;  %v4738_v31 = vld [vmem:[%s4486_s3 + $0x4c] ss:$16 sps:$4 sm:$0xff]   ;;  %v4742_v32 = vld [vmem:[%s4486_s3 + $0x40] ss:$16 sps:$4 sm:$0xff]  }
 0x300   : > { %1783 = vmatprep.subr.bf16.mxu0 %v4687_v18  ;;  %1824 = vmatprep.subr.bf16.mxu1 %v4694_v20  ;;  %v4746_v33 = vld [vmem:[%s4486_s3 + $0x24] ss:$16 sps:$4 sm:$0xff]   ;;  %v4750_v34 = vld [vmem:[%s4486_s3 + $0x48] ss:$16 sps:$4 sm:$0xff]   ;;  %v4754_v35 = vld [vmem:[%s4486_s3 + $0x2c] ss:$16 sps:$4 sm:$0xff]  }
 0x301   : > { %v4758_v36 = vld [vmem:[%s4486_s3 + $0x20] ss:$16 sps:$4 sm:$0xff]   ;;  %v4762_v37 = vld [vmem:[%s4486_s3 + $0x4] ss:$16 sps:$4 sm:$0xff]   ;;  %v4766_v38 = vld [vmem:[%s4486_s3 + $0x28] ss:$16 sps:$4 sm:$0xff]  }
 0x302   : > { %v4770_v39 = vld [vmem:[%s4486_s3 + $0xc] ss:$16 sps:$4 sm:$0xff]   ;;  %v4774_v40 = vld [vmem:[%s4486_s3] ss:$16 sps:$4 sm:$0xff]   ;;  %v4781_v42 = vld [vmem:[%s4486_s3 + $0x8] ss:$16 sps:$4 sm:$0xff]  }
 0x303   : > { %1784 = vmatpush1.bf16.msra.mxu0 %v4691_v19  ;;  %1825 = vmatpush1.bf16.msra.mxu1 %v4702_v22  ;;  %v1610_v41 = vld [vmem:[%s475_s19] sm:$0xff]  ;;  %v1612_v44 = vld [vmem:[#allocation2 + $0x30] sm:$0xff]  ;;  %s5340_s19 = sld [smem:[#allocation32_spill]]  ;;  %s2713_s30 = sshll.u32 %s5258_s23, 4  ;;  %s5072_s30 = int_to_ptr.vmem [resolvable:$true] %s2713_s30 }
 0x304   : > { %1785 = vmatprep.subr.bf16.mxu0 %v4698_v21  ;;  %1826 = vmatprep.subr.bf16.mxu1 %v4706_v23  ;;  %v1618_v43 = vpack.c.bf16 %v1610_v41, %v1610_v41  ;;  %v1614_v45 = vunpack.c.l.bf16 %v1612_v44  ;;  %v1613_v46 = vld [vmem:[#allocation2] sm:$0xff]  ;;  %v1615_v47 = vunpack.c.h.bf16 %v1612_v44  ;;  %v1611_v53 = vld [vmem:[%s484_s1] sm:$0xff]  ;;  %s3156_s1 = sshll.u32 %s5339_s6, 1  ;;  %s5341_s26 = sld [smem:[#allocation50_spill]] }
 0x305   : > { %v1616_v50 = vunpack.c.l.bf16 %v1613_v46  ;;  %v1617_v7 = vunpack.c.h.bf16 %v1613_v46  ;;  %s5342_s10 = sld [smem:[#allocation39_spill]]  ;;  %s2695_s2 = sshll.u32 %s4500_s14, 4  ;;  %s5084_s2 = int_to_ptr.vmem [resolvable:$true] %s2695_s2 }
 0x306   : > { %s2728_s0 = sshll.u32 %s574_s12, 4  ;;  %s5343_s6 = sld [smem:[#allocation51_spill]]  ;;  %s5086_s0 = int_to_ptr.vmem [resolvable:$true] %s2728_s0 }
 0x307   : > { %1786 = vmatpush1.bf16.msra.mxu0 %v4710_v24  ;;  %1827 = vmatpush1.bf16.msra.mxu1 %v4718_v26  ;;  %s2677_s22 = scalar_lea.sflag [#allocation15], %s4451_s16  ;;  %s3824_s15 = scalar_lea.vmem %s5072_s30, 128 }
 0x308   : > { %1787 = vmatprep.subr.bf16.mxu0 %v4714_v25  ;;  %1828 = vmatprep.subr.bf16.mxu1 %v4722_v27  ;;  %p3825_p11 = scmp.ne.s32.totalorder %s5072_s30, %s3824_s15 }
 0x309   : > { %s2709_s5 = sadd.s32 %s5340_s19, %s3156_s1  ;;  %s3197_s8 = sshll.u32 %s5340_s19, 9 }
 0x30a   : > { %s3157_s29 = sshll.u32 %s2709_s5, 7  ;;  %s5344_s19 = sld [smem:[#allocation49_spill]] }
 0x30b   : > { %1788 = vmatpush1.bf16.msra.mxu0 %v4726_v28  ;;  %1829 = vmatpush1.bf16.msra.mxu1 %v4734_v30  ;;  %s5066_s7 = scalar_lea.hbm %s5341_s26, %s3157_s29  ;;  %p5347_p13 = scmp.ne.s32.totalorder %s5342_s10, 0 }
 0x30c   : > { %1789 = vmatprep.subr.bf16.mxu0 %v4730_v29  ;;  %1830 = vmatprep.subr.bf16.mxu1 %v4738_v31  ;;  %s5077_s1 = scalar_lea.hbm %s5343_s6, %s3157_s29  ;;  %s4076_s29 = smov [#allocation14]  }
 0x30d   : > { %p3826_p5 = pnand %p3825_p11, %p5347_p13  ;;  %s3828_s27 = sshll.u32 %s4076_s29, 4  ;;  %s3829_s27 = int_to_ptr.vmem [resolvable:$false] %s3828_s27 }
 0x30e   : > { %s3830_s18 = scalar_lea.vmem %s3829_s27, 256  ;;  %p3831_p12 = scmp.lt.s32.totalorder %s5072_s30, %s3829_s27 }
 0x30f   : > { %1790 = vmatpush1.bf16.msra.mxu0 %v4742_v32  ;;  %1831 = vmatpush1.bf16.msra.mxu1 %v4750_v34  ;;  %p3827_p10 = pneg %p3826_p5  ;;  %p3832_p8 = scmp.lt.s32.totalorder %s3830_s18, %s3824_s15 }
 0x310   : > { %1791 = vmatprep.subr.bf16.mxu0 %v4746_v33  ;;  %1832 = vmatprep.subr.bf16.mxu1 %v4754_v35  ;;  %s5345_s25 = smov %s5344_s19  ;;  %s5082_s23 = scalar_lea.hbm %s5344_s19, %s3197_s8 }
 0x311   : > { %p3833_p2 = por %p3832_p8, %p3831_p12 }
 0x313   : > { %1792 = vmatpush1.bf16.msra.mxu0 %v4758_v36  ;;  %1833 = vmatpush1.bf16.msra.mxu1 %v4766_v38  ;;  %p3834_p4 = pnand %p3833_p2, %p3827_p10 }
 0x314   : > { %1793 = vmatprep.subr.bf16.mxu0 %v4762_v37  ;;  %1834 = vmatprep.subr.bf16.mxu1 %v4770_v39 }
 0x317   : > { %1794 = vmatpush1.bf16.msra.mxu0 %v4774_v40  ;;  %1835 = vmatpush1.bf16.msra.mxu1 %v4781_v42 }
 0x318   : > { %1891 = vmatprep.subr.bf16.mxu0 %v4655_v57  ;;  %1932 = vmatprep.subr.bf16.mxu1 %v4664_v60 }
 0x31a   : > { %1812 = vmatmul.mubr.bf16.vlgmr.msra.gmra.mxu0 %v1618_v43  ;;  %1853 = vmatmul.mubr.bf16.vlgmr.msra.gmra.mxu1 %v1618_v43 }
 0x31b   : > { %1892 = vmatpush1.bf16.msra.mxu0 %v4658_v58  ;;  %1923 = vmatprep.mubr.bf16.mxu0 %v4075_v59 }
 0x31c   : > { %1893 = vmatprep.subr.bf16.mxu0 %v4671_v14  ;;  %1933 = vmatpush1.bf16.msra.mxu1 %v4667_v55 }
 0x31d   : > { %1964 = vmatprep.mubr.bf16.mxu1 %v4075_v59  ;;  %1934 = vmatprep.subr.bf16.mxu1 %v4678_v16 }
 0x31f   : > { %1894 = vmatpush1.bf16.msra.mxu0 %v4674_v15 }
 0x320   : > { %1895 = vmatprep.subr.bf16.mxu0 %v4687_v18  ;;  %1935 = vmatpush1.bf16.msra.mxu1 %v4683_v17 }
 0x321   : > { %1936 = vmatprep.subr.bf16.mxu1 %v4694_v20 }
 0x323   : > { %1896 = vmatpush1.bf16.msra.mxu0 %v4691_v19 }
 0x324   : > { %1897 = vmatprep.subr.bf16.mxu0 %v4698_v21  ;;  %1937 = vmatpush1.bf16.msra.mxu1 %v4702_v22 }
 0x325   : > { %1938 = vmatprep.subr.bf16.mxu1 %v4706_v23 }
 0x327   : > { %1898 = vmatpush1.bf16.msra.mxu0 %v4710_v24 }
 0x328   : > { %1899 = vmatprep.subr.bf16.mxu0 %v4714_v25  ;;  %1939 = vmatpush1.bf16.msra.mxu1 %v4718_v26 }
 0x329   : > { %1940 = vmatprep.subr.bf16.mxu1 %v4722_v27 }
 0x32b   : > { %1900 = vmatpush1.bf16.msra.mxu0 %v4726_v28 }
 0x32c   : > { %1901 = vmatprep.subr.bf16.mxu0 %v4730_v29  ;;  %1941 = vmatpush1.bf16.msra.mxu1 %v4734_v30 }
 0x32d   : > { %1942 = vmatprep.subr.bf16.mxu1 %v4738_v31 }
 0x32f   : > { %1902 = vmatpush1.bf16.msra.mxu0 %v4742_v32 }
 0x330   : > { %1903 = vmatprep.subr.bf16.mxu0 %v4746_v33  ;;  %1943 = vmatpush1.bf16.msra.mxu1 %v4750_v34 }
 0x331   : > { %1944 = vmatprep.subr.bf16.mxu1 %v4754_v35 }
 0x333   : > { %1904 = vmatpush1.bf16.msra.mxu0 %v4758_v36 }
 0x334   : > { %1905 = vmatprep.subr.bf16.mxu0 %v4762_v37  ;;  %1945 = vmatpush1.bf16.msra.mxu1 %v4766_v38 }
 0x335   : > { %1946 = vmatprep.subr.bf16.mxu1 %v4770_v39 }
 0x337   : > { %1906 = vmatpush1.bf16.msra.mxu0 %v4774_v40 }
 0x338   : > { %2003 = vmatprep.subr.bf16.mxu0 %v4655_v57  ;;  %1947 = vmatpush1.bf16.msra.mxu1 %v4781_v42 }
 0x339   : > { %2044 = vmatprep.subr.bf16.mxu1 %v4664_v60 }
 0x3da   : > { %v1813_v48 = vpop.f32.mrf.mxu0  ;;  %v1854_v56 = vpop.f32.mrf.mxu1 }
 0x3db   : > { %v1861_v49 = vadd.f32 %v1813_v48, %v1614_v45  ;;  %v1863_v3 = vadd.f32 %v1854_v56, %v1616_v50 }
 0x3dc   : > { %v1815_v51 = vpop.f32.mrf.mxu0  ;;  %v1856_v1 = vpop.f32.mrf.mxu1 }
 0x3dd   : > { %v1865_v61 = vmul.f32 0.5, %v1861_v49  ;;  %v1862_v62 = vadd.f32 %v1815_v51, %v1615_v47  ;;  %v1864_v8 = vadd.f32 %v1856_v1, %v1617_v7  ;;  %v1885_v51 = vld [vmem:[#allocation2 + $0x58] sm:$0xff] }
 0x3de   : > { %v1817_v63 = vpop.f32.mrf.mxu0  ;;  %v1858_v5 = vpop.f32.mrf.mxu1  ;;  %v1887_v56 = vunpack.c.l.bf16 %v1885_v51 }
 0x3df   : > { %3546 = vtanh.f32 %v1865_v61  ;;  %v1869_v2 = vmul.f32 0.5, %v1862_v62  ;;  %v1874_v9 = vmul.f32 0.5, %v1864_v8  ;;  %v1888_v61 = vunpack.c.h.bf16 %v1885_v51  ;;  %v1886_v63 = vld [vmem:[#allocation2 + $0x18] sm:$0xff] }
 0x3e0   : > { %v1818_v4 = vpop.f32.mrf.mxu0  ;;  %v1859_v6 = vpop.f32.mrf.mxu1 }
 0x3e1   : > { %3548 = vtanh.f32 %v1869_v2  ;;  %v1889_v6 = vunpack.c.l.bf16 %v1886_v63 }
 0x3e2   : > { %3550 = vtanh.f32 %v1863_v3 }
 0x3e3   : > { %3552 = vtanh.f32 %v1874_v9 }
 0x3ec   : > { %v3547_v10 = vpop.eup %3546 }
 0x3ed   : > { %v1867_v11 = vadd.f32 1.0, %v3547_v10 }
 0x3ee   : > { %v3549_v0 = vpop.eup %3548 }
 0x3ef   : > { %v1868_v12 = vmul.f32 0.5, %v1867_v11  ;;  %v1871_v13 = vadd.f32 1.0, %v3549_v0  ;;  %v3551_v52 = vpop.eup %3550 }
 0x3f0   : > { %v3553_v45 = vpop.eup %3552 }
 0x3f1   : > { %v1872_v54 = vmul.f32 0.5, %v1871_v13  ;;  %v1879_v43 = vmul.f32 %v3551_v52, %v1868_v12  ;;  %v1876_v46 = vadd.f32 1.0, %v3553_v45  ;;  %v1890_v13 = vunpack.c.h.bf16 %v1886_v63 }
 0x3f3   : > { %v1878_v41 = vmul.f32 %v1872_v54, %v1611_v53  ;;  %v1877_v47 = vmul.f32 0.5, %v1876_v46 }
 0x3f5   : > { %v4824_v44 = vadd.f32 %v1879_v43, %v1878_v41 }
 0x3f7   : > { %3554 = vtanh.f32 %v4824_v44 }
 0x404   : > { %v3555_v48 = vpop.eup %3554 }
 0x405   : > { %v1882_v49 = vmul.f32 %v3555_v48, %v1877_v47 }
 0x407   : > { %v1883_v50 = vpack.c.bf16 %v1882_v49, %v1882_v49 }
 0x409   : > { %1884 = vst [vmem:[%s4500_s14] sm:$0xf] %v1883_v50  ;;  %1924 = vmatmul.mubr.bf16.vlgmr.msra.gmra.mxu0 %v1883_v50  ;;  %1965 = vmatmul.mubr.bf16.vlgmr.msra.gmra.mxu1 %v1883_v50 }
 0x40a   : > { %2004 = vmatpush1.bf16.msra.mxu0 %v4658_v58  ;;  %2045 = vmatpush1.bf16.msra.mxu1 %v4667_v55 }
 0x40b   : > { %2005 = vmatprep.subr.bf16.mxu0 %v4671_v14  ;;  %2046 = vmatprep.subr.bf16.mxu1 %v4678_v16 }
 0x40c   : > { %2035 = vmatprep.mubr.bf16.mxu0 %v4075_v59  ;;  %2076 = vmatprep.mubr.bf16.mxu1 %v4075_v59 }
 0x40e   : > { %2006 = vmatpush1.bf16.msra.mxu0 %v4674_v15  ;;  %2047 = vmatpush1.bf16.msra.mxu1 %v4683_v17 }
 0x40f   : > { %2007 = vmatprep.subr.bf16.mxu0 %v4687_v18  ;;  %2048 = vmatprep.subr.bf16.mxu1 %v4694_v20 }
 0x412   : > { %2008 = vmatpush1.bf16.msra.mxu0 %v4691_v19  ;;  %2049 = vmatpush1.bf16.msra.mxu1 %v4702_v22 }
 0x413   : > { %2009 = vmatprep.subr.bf16.mxu0 %v4698_v21  ;;  %2050 = vmatprep.subr.bf16.mxu1 %v4706_v23 }
 0x416   : > { %2010 = vmatpush1.bf16.msra.mxu0 %v4710_v24  ;;  %2051 = vmatpush1.bf16.msra.mxu1 %v4718_v26 }
 0x417   : > { %2011 = vmatprep.subr.bf16.mxu0 %v4714_v25  ;;  %2052 = vmatprep.subr.bf16.mxu1 %v4722_v27 }
 0x41a   : > { %2012 = vmatpush1.bf16.msra.mxu0 %v4726_v28  ;;  %2053 = vmatpush1.bf16.msra.mxu1 %v4734_v30 }
 0x41b   : > { %2013 = vmatprep.subr.bf16.mxu0 %v4730_v29  ;;  %2054 = vmatprep.subr.bf16.mxu1 %v4738_v31 }
 0x41e   : > { %2014 = vmatpush1.bf16.msra.mxu0 %v4742_v32  ;;  %2055 = vmatpush1.bf16.msra.mxu1 %v4750_v34 }
 0x41f   : > { %2015 = vmatprep.subr.bf16.mxu0 %v4746_v33  ;;  %2056 = vmatprep.subr.bf16.mxu1 %v4754_v35 }
 0x422   : > { %2016 = vmatpush1.bf16.msra.mxu0 %v4758_v36  ;;  %2057 = vmatpush1.bf16.msra.mxu1 %v4766_v38 }
 0x423   : > { %2017 = vmatprep.subr.bf16.mxu0 %v4762_v37  ;;  %2058 = vmatprep.subr.bf16.mxu1 %v4770_v39 }
 0x426   : > { %2018 = vmatpush1.bf16.msra.mxu0 %v4774_v40  ;;  %2059 = vmatpush1.bf16.msra.mxu1 %v4781_v42 }
 0x427   : > { %2115 = vmatprep.subr.bf16.mxu0 %v4655_v57  ;;  %2156 = vmatprep.subr.bf16.mxu1 %v4664_v60 }
 0x4c9   : > { %v1925_v62 = vpop.f32.mrf.mxu0  ;;  %v1966_v1 = vpop.f32.mrf.mxu1 }
 0x4ca   : > { %v1973_v2 = vadd.f32 %v1925_v62, %v1887_v56  ;;  %v1975_v12 = vadd.f32 %v1966_v1, %v1889_v6  ;;  %v1998_v6 = vld [vmem:[#allocation2 + $0x68] sm:$0xff] }
 0x4cb   : > { %v1927_v3 = vpop.f32.mrf.mxu0  ;;  %v1968_v4 = vpop.f32.mrf.mxu1 }
 0x4cc   : > { %v1977_v5 = vmul.f32 0.5, %v1973_v2  ;;  %v1974_v7 = vadd.f32 %v1927_v3, %v1888_v61  ;;  %v1976_v52 = vadd.f32 %v1968_v4, %v1890_v13 }
 0x4cd   : > { %v1929_v8 = vpop.f32.mrf.mxu0  ;;  %v1970_v9 = vpop.f32.mrf.mxu1 }
 0x4ce   : > { %3556 = vtanh.f32 %v1977_v5  ;;  %v1981_v10 = vmul.f32 0.5, %v1974_v7  ;;  %v1986_v53 = vmul.f32 0.5, %v1976_v52 }
 0x4cf   : > { %v1930_v11 = vpop.f32.mrf.mxu0  ;;  %v1971_v0 = vpop.f32.mrf.mxu1 }
 0x4d0   : > { %3558 = vtanh.f32 %v1981_v10  ;;  %v2001_v0 = vunpack.c.l.bf16 %v1998_v6 }
 0x4d1   : > { %3560 = vtanh.f32 %v1975_v12 }
 0x4d2   : > { %3562 = vtanh.f32 %v1986_v53 }
 0x4db   : > { %v3557_v54 = vpop.eup %3556 }
 0x4dc   : > { %v1979_v41 = vadd.f32 1.0, %v3557_v54 }
 0x4dd   : > { %v3559_v43 = vpop.eup %3558 }
 0x4de   : > { %v1980_v45 = vmul.f32 0.5, %v1979_v41  ;;  %v1983_v46 = vadd.f32 1.0, %v3559_v43  ;;  %v3561_v48 = vpop.eup %3560 }
 0x4df   : > { %v3563_v56 = vpop.eup %3562 }
 0x4e0   : > { %v1984_v47 = vmul.f32 0.5, %v1983_v46  ;;  %v1991_v50 = vmul.f32 %v3561_v48, %v1980_v45  ;;  %v1988_v61 = vadd.f32 1.0, %v3563_v56  ;;  %v2002_v45 = vunpack.c.h.bf16 %v1998_v6 }
 0x4e2   : > { %v1990_v49 = vmul.f32 %v1984_v47, %v4824_v44  ;;  %v1989_v62 = vmul.f32 0.5, %v1988_v61  ;;  %v1997_v44 = vld [vmem:[#allocation2 + $0x50] sm:$0xff] }
 0x4e3   : > { %v1999_v3 = vunpack.c.l.bf16 %v1997_v44  ;;  %v2000_v4 = vunpack.c.h.bf16 %v1997_v44 }
 0x4e4   : > { %v4863_v51 = vadd.f32 %v1991_v50, %v1990_v49 }
 0x4e6   : > { %3564 = vtanh.f32 %v4863_v51 }
 0x4f3   : > { %v3565_v63 = vpop.eup %3564 }
 0x4f4   : > { %v1994_v1 = vmul.f32 %v3565_v63, %v1989_v62 }
 0x4f6   : > { %v1995_v2 = vpack.c.bf16 %v1994_v1, %v1994_v1 }
 0x4f8   : > { %1996 = vst [vmem:[%s4500_s14 + $0x4] sm:$0xf] %v1995_v2  ;;  %2036 = vmatmul.mubr.bf16.vlgmr.msra.gmra.mxu0 %v1995_v2  ;;  %2077 = vmatmul.mubr.bf16.vlgmr.msra.gmra.mxu1 %v1995_v2 }
 0x4f9   : > { %2116 = vmatpush1.bf16.msra.mxu0 %v4658_v58  ;;  %2157 = vmatpush1.bf16.msra.mxu1 %v4667_v55 }
 0x4fa   : > { %2117 = vmatprep.subr.bf16.mxu0 %v4671_v14  ;;  %2158 = vmatprep.subr.bf16.mxu1 %v4678_v16 }
 0x4fb   : > { %2147 = vmatprep.mubr.bf16.mxu0 %v4075_v59  ;;  %2188 = vmatprep.mubr.bf16.mxu1 %v4075_v59 }
 0x4fd   : > { %2118 = vmatpush1.bf16.msra.mxu0 %v4674_v15  ;;  %2159 = vmatpush1.bf16.msra.mxu1 %v4683_v17 }
 0x4fe   : > { %2119 = vmatprep.subr.bf16.mxu0 %v4687_v18  ;;  %2160 = vmatprep.subr.bf16.mxu1 %v4694_v20 }
 0x501   : > { %2120 = vmatpush1.bf16.msra.mxu0 %v4691_v19  ;;  %2161 = vmatpush1.bf16.msra.mxu1 %v4702_v22 }
 0x502   : > { %2121 = vmatprep.subr.bf16.mxu0 %v4698_v21  ;;  %2162 = vmatprep.subr.bf16.mxu1 %v4706_v23 }
 0x505   : > { %2122 = vmatpush1.bf16.msra.mxu0 %v4710_v24  ;;  %2163 = vmatpush1.bf16.msra.mxu1 %v4718_v26 }
 0x506   : > { %2123 = vmatprep.subr.bf16.mxu0 %v4714_v25  ;;  %2164 = vmatprep.subr.bf16.mxu1 %v4722_v27 }
 0x509   : > { %2124 = vmatpush1.bf16.msra.mxu0 %v4726_v28  ;;  %2165 = vmatpush1.bf16.msra.mxu1 %v4734_v30 }
 0x50a   : > { %2125 = vmatprep.subr.bf16.mxu0 %v4730_v29  ;;  %2166 = vmatprep.subr.bf16.mxu1 %v4738_v31 }
 0x50d   : > { %2126 = vmatpush1.bf16.msra.mxu0 %v4742_v32  ;;  %2167 = vmatpush1.bf16.msra.mxu1 %v4750_v34 }
 0x50e   : > { %2127 = vmatprep.subr.bf16.mxu0 %v4746_v33  ;;  %2168 = vmatprep.subr.bf16.mxu1 %v4754_v35 }
 0x511   : > { %2128 = vmatpush1.bf16.msra.mxu0 %v4758_v36  ;;  %2169 = vmatpush1.bf16.msra.mxu1 %v4766_v38 }
 0x512   : > { %2129 = vmatprep.subr.bf16.mxu0 %v4762_v37  ;;  %2170 = vmatprep.subr.bf16.mxu1 %v4770_v39 }
 0x515   : > { %2130 = vmatpush1.bf16.msra.mxu0 %v4774_v40  ;;  %2171 = vmatpush1.bf16.msra.mxu1 %v4781_v42 }
 0x516   : > { %2227 = vmatprep.subr.bf16.mxu0 %v4655_v57  ;;  %2268 = vmatprep.subr.bf16.mxu1 %v4664_v60 }
 0x5b8   : > { %v2037_v5 = vpop.f32.mrf.mxu0  ;;  %v2078_v7 = vpop.f32.mrf.mxu1 }
 0x5b9   : > { %v2085_v8 = vadd.f32 %v2037_v5, %v1999_v3  ;;  %v2087_v43 = vadd.f32 %v2078_v7, %v2001_v0  ;;  %v2110_v0 = vld [vmem:[#allocation2 + $0x48] sm:$0xff] }
 0x5ba   : > { %v2039_v9 = vpop.f32.mrf.mxu0  ;;  %v2080_v10 = vpop.f32.mrf.mxu1 }
 0x5bb   : > { %v2089_v11 = vmul.f32 0.5, %v2085_v8  ;;  %v2086_v12 = vadd.f32 %v2039_v9, %v2000_v4  ;;  %v2088_v46 = vadd.f32 %v2080_v10, %v2002_v45 }
 0x5bc   : > { %v2041_v13 = vpop.f32.mrf.mxu0  ;;  %v2082_v52 = vpop.f32.mrf.mxu1 }
 0x5bd   : > { %3566 = vtanh.f32 %v2089_v11  ;;  %v2093_v53 = vmul.f32 0.5, %v2086_v12  ;;  %v2098_v47 = vmul.f32 0.5, %v2088_v46 }
 0x5be   : > { %v2042_v54 = vpop.f32.mrf.mxu0  ;;  %v2083_v41 = vpop.f32.mrf.mxu1 }
 0x5bf   : > { %3568 = vtanh.f32 %v2093_v53  ;;  %v2113_v41 = vunpack.c.l.bf16 %v2110_v0 }
 0x5c0   : > { %3570 = vtanh.f32 %v2087_v43 }
 0x5c1   : > { %3572 = vtanh.f32 %v2098_v47 }
 0x5ca   : > { %v3567_v48 = vpop.eup %3566 }
 0x5cb   : > { %v2091_v49 = vadd.f32 1.0, %v3567_v48 }
 0x5cc   : > { %v3569_v50 = vpop.eup %3568 }
 0x5cd   : > { %v2092_v56 = vmul.f32 0.5, %v2091_v49  ;;  %v2095_v61 = vadd.f32 1.0, %v3569_v50  ;;  %v3571_v63 = vpop.eup %3570 }
 0x5ce   : > { %v3573_v3 = vpop.eup %3572 }
 0x5cf   : > { %v2096_v62 = vmul.f32 0.5, %v2095_v61  ;;  %v2103_v2 = vmul.f32 %v3571_v63, %v2092_v56  ;;  %v2100_v4 = vadd.f32 1.0, %v3573_v3  ;;  %v2114_v56 = vunpack.c.h.bf16 %v2110_v0 }
 0x5d1   : > { %v2102_v1 = vmul.f32 %v2096_v62, %v4863_v51  ;;  %v2101_v5 = vmul.f32 0.5, %v2100_v4  ;;  %v2109_v51 = vld [vmem:[#allocation2 + $0x8] sm:$0xff] }
 0x5d2   : > { %v2111_v9 = vunpack.c.l.bf16 %v2109_v51  ;;  %v2112_v10 = vunpack.c.h.bf16 %v2109_v51 }
 0x5d3   : > { %v4902_v44 = vadd.f32 %v2103_v2, %v2102_v1 }
 0x5d5   : > { %3574 = vtanh.f32 %v4902_v44 }
 0x5e2   : > { %v3575_v6 = vpop.eup %3574 }
 0x5e3   : > { %v2106_v7 = vmul.f32 %v3575_v6, %v2101_v5 }
 0x5e5   : > { %v2107_v8 = vpack.c.bf16 %v2106_v7, %v2106_v7 }
 0x5e7   : > { %2108 = vst [vmem:[%s4500_s14 + $0x8] sm:$0xf] %v2107_v8  ;;  %2148 = vmatmul.mubr.bf16.vlgmr.msra.gmra.mxu0 %v2107_v8  ;;  %2189 = vmatmul.mubr.bf16.vlgmr.msra.gmra.mxu1 %v2107_v8 }
 0x5e8   : > { %2228 = vmatpush1.bf16.msra.mxu0 %v4658_v58  ;;  %2269 = vmatpush1.bf16.msra.mxu1 %v4667_v55 }
 0x5e9   : > { %2229 = vmatprep.subr.bf16.mxu0 %v4671_v14  ;;  %2270 = vmatprep.subr.bf16.mxu1 %v4678_v16 }
 0x5ea   : > { %2259 = vmatprep.mubr.bf16.mxu0 %v4075_v59  ;;  %2300 = vmatprep.mubr.bf16.mxu1 %v4075_v59 }
 0x5ec   : > { %2230 = vmatpush1.bf16.msra.mxu0 %v4674_v15  ;;  %2271 = vmatpush1.bf16.msra.mxu1 %v4683_v17 }
 0x5ed   : > { %2231 = vmatprep.subr.bf16.mxu0 %v4687_v18  ;;  %2272 = vmatprep.subr.bf16.mxu1 %v4694_v20 }
 0x5f0   : > { %2232 = vmatpush1.bf16.msra.mxu0 %v4691_v19  ;;  %2273 = vmatpush1.bf16.msra.mxu1 %v4702_v22 }
 0x5f1   : > { %2233 = vmatprep.subr.bf16.mxu0 %v4698_v21  ;;  %2274 = vmatprep.subr.bf16.mxu1 %v4706_v23 }
 0x5f4   : > { %2234 = vmatpush1.bf16.msra.mxu0 %v4710_v24  ;;  %2275 = vmatpush1.bf16.msra.mxu1 %v4718_v26 }
 0x5f5   : > { %2235 = vmatprep.subr.bf16.mxu0 %v4714_v25  ;;  %2276 = vmatprep.subr.bf16.mxu1 %v4722_v27 }
 0x5f8   : > { %2236 = vmatpush1.bf16.msra.mxu0 %v4726_v28  ;;  %2277 = vmatpush1.bf16.msra.mxu1 %v4734_v30 }
 0x5f9   : > { %2237 = vmatprep.subr.bf16.mxu0 %v4730_v29  ;;  %2278 = vmatprep.subr.bf16.mxu1 %v4738_v31 }
 0x5fc   : > { %2238 = vmatpush1.bf16.msra.mxu0 %v4742_v32  ;;  %2279 = vmatpush1.bf16.msra.mxu1 %v4750_v34 }
 0x5fd   : > { %2239 = vmatprep.subr.bf16.mxu0 %v4746_v33  ;;  %2280 = vmatprep.subr.bf16.mxu1 %v4754_v35 }
 0x600   : > { %2240 = vmatpush1.bf16.msra.mxu0 %v4758_v36  ;;  %2281 = vmatpush1.bf16.msra.mxu1 %v4766_v38 }
 0x601   : > { %2241 = vmatprep.subr.bf16.mxu0 %v4762_v37  ;;  %2282 = vmatprep.subr.bf16.mxu1 %v4770_v39 }
 0x604   : > { %2242 = vmatpush1.bf16.msra.mxu0 %v4774_v40  ;;  %2283 = vmatpush1.bf16.msra.mxu1 %v4781_v42 }
 0x605   : > { %2339 = vmatprep.subr.bf16.mxu0 %v4655_v57  ;;  %2380 = vmatprep.subr.bf16.mxu1 %v4664_v60 }
 0x6a7   : > { %v2149_v11 = vpop.f32.mrf.mxu0  ;;  %v2190_v12 = vpop.f32.mrf.mxu1 }
 0x6a8   : > { %v2197_v13 = vadd.f32 %v2149_v11, %v2111_v9  ;;  %v2199_v50 = vadd.f32 %v2190_v12, %v2113_v41  ;;  %v2222_v41 = vld [vmem:[#allocation2 + $0x20] sm:$0xff] }
 0x6a9   : > { %v2151_v52 = vpop.f32.mrf.mxu0  ;;  %v2192_v53 = vpop.f32.mrf.mxu1 }
 0x6aa   : > { %v2201_v54 = vmul.f32 0.5, %v2197_v13  ;;  %v2198_v43 = vadd.f32 %v2151_v52, %v2112_v10  ;;  %v2200_v61 = vadd.f32 %v2192_v53, %v2114_v56 }
 0x6ab   : > { %v2153_v45 = vpop.f32.mrf.mxu0  ;;  %v2194_v46 = vpop.f32.mrf.mxu1 }
 0x6ac   : > { %3576 = vtanh.f32 %v2201_v54  ;;  %v2205_v47 = vmul.f32 0.5, %v2198_v43  ;;  %v2210_v62 = vmul.f32 0.5, %v2200_v61 }
 0x6ad   : > { %v2154_v48 = vpop.f32.mrf.mxu0  ;;  %v2195_v49 = vpop.f32.mrf.mxu1 }
 0x6ae   : > { %3578 = vtanh.f32 %v2205_v47  ;;  %v2225_v49 = vunpack.c.l.bf16 %v2222_v41 }
 0x6af   : > { %3580 = vtanh.f32 %v2199_v50 }
 0x6b0   : > { %3582 = vtanh.f32 %v2210_v62 }
 0x6b9   : > { %v3577_v63 = vpop.eup %3576 }
 0x6ba   : > { %v2203_v1 = vadd.f32 1.0, %v3577_v63 }
 0x6bb   : > { %v3579_v2 = vpop.eup %3578 }
 0x6bc   : > { %v2204_v3 = vmul.f32 0.5, %v2203_v1  ;;  %v2207_v4 = vadd.f32 1.0, %v3579_v2  ;;  %v3581_v6 = vpop.eup %3580 }
 0x6bd   : > { %v3583_v9 = vpop.eup %3582 }
 0x6be   : > { %v2208_v5 = vmul.f32 0.5, %v2207_v4  ;;  %v2215_v8 = vmul.f32 %v3581_v6, %v2204_v3  ;;  %v2212_v10 = vadd.f32 1.0, %v3583_v9 }
 0x6c0   : > { %v2214_v7 = vmul.f32 %v2208_v5, %v4902_v44  ;;  %v2213_v11 = vmul.f32 0.5, %v2212_v10  ;;  %v2221_v44 = vld [vmem:[#allocation2 + $0x40] sm:$0xff] }
 0x6c1   : > { %v2223_v52 = vunpack.c.l.bf16 %v2221_v44  ;;  %v2224_v53 = vunpack.c.h.bf16 %v2221_v44 }
 0x6c2   : > { %v4941_v51 = vadd.f32 %v2215_v8, %v2214_v7 }
 0x6c4   : > { %3584 = vtanh.f32 %v4941_v51 }
 0x6d1   : > { %v3585_v0 = vpop.eup %3584 }
 0x6d2   : > { %v2218_v12 = vmul.f32 %v3585_v0, %v2213_v11 }
 0x6d4   : > { %v2219_v13 = vpack.c.bf16 %v2218_v12, %v2218_v12 }
 0x6d6   : > { %2220 = vst [vmem:[%s4500_s14 + $0xc] sm:$0xf] %v2219_v13  ;;  %2260 = vmatmul.mubr.bf16.vlgmr.msra.gmra.mxu0 %v2219_v13  ;;  %2301 = vmatmul.mubr.bf16.vlgmr.msra.gmra.mxu1 %v2219_v13 }
 0x6d7   : > { %2340 = vmatpush1.bf16.msra.mxu0 %v4658_v58  ;;  %2381 = vmatpush1.bf16.msra.mxu1 %v4667_v55 }
 0x6d8   : > { %2341 = vmatprep.subr.bf16.mxu0 %v4671_v14  ;;  %2382 = vmatprep.subr.bf16.mxu1 %v4678_v16 }
 0x6d9   : > { %2371 = vmatprep.mubr.bf16.mxu0 %v4075_v59  ;;  %2412 = vmatprep.mubr.bf16.mxu1 %v4075_v59 }
 0x6db   : > { %2342 = vmatpush1.bf16.msra.mxu0 %v4674_v15  ;;  %2383 = vmatpush1.bf16.msra.mxu1 %v4683_v17 }
 0x6dc   : > { %2343 = vmatprep.subr.bf16.mxu0 %v4687_v18  ;;  %2384 = vmatprep.subr.bf16.mxu1 %v4694_v20 }
 0x6df   : > { %2344 = vmatpush1.bf16.msra.mxu0 %v4691_v19  ;;  %2385 = vmatpush1.bf16.msra.mxu1 %v4702_v22 }
 0x6e0   : > { %2345 = vmatprep.subr.bf16.mxu0 %v4698_v21  ;;  %2386 = vmatprep.subr.bf16.mxu1 %v4706_v23 }
 0x6e3   : > { %2346 = vmatpush1.bf16.msra.mxu0 %v4710_v24  ;;  %2387 = vmatpush1.bf16.msra.mxu1 %v4718_v26 }
 0x6e4   : > { %2347 = vmatprep.subr.bf16.mxu0 %v4714_v25  ;;  %2388 = vmatprep.subr.bf16.mxu1 %v4722_v27 }
 0x6e7   : > { %2348 = vmatpush1.bf16.msra.mxu0 %v4726_v28  ;;  %2389 = vmatpush1.bf16.msra.mxu1 %v4734_v30 }
 0x6e8   : > { %2349 = vmatprep.subr.bf16.mxu0 %v4730_v29  ;;  %2390 = vmatprep.subr.bf16.mxu1 %v4738_v31 }
 0x6eb   : > { %2350 = vmatpush1.bf16.msra.mxu0 %v4742_v32  ;;  %2391 = vmatpush1.bf16.msra.mxu1 %v4750_v34 }
 0x6ec   : > { %2351 = vmatprep.subr.bf16.mxu0 %v4746_v33  ;;  %2392 = vmatprep.subr.bf16.mxu1 %v4754_v35 }
 0x6ef   : > { %2352 = vmatpush1.bf16.msra.mxu0 %v4758_v36  ;;  %2393 = vmatpush1.bf16.msra.mxu1 %v4766_v38 }
 0x6f0   : > { %2353 = vmatprep.subr.bf16.mxu0 %v4762_v37  ;;  %2394 = vmatprep.subr.bf16.mxu1 %v4770_v39 }
 0x6f3   : > { %2354 = vmatpush1.bf16.msra.mxu0 %v4774_v40  ;;  %2395 = vmatpush1.bf16.msra.mxu1 %v4781_v42 }
 0x6f4   : > { %2451 = vmatprep.subr.bf16.mxu0 %v4655_v57  ;;  %2492 = vmatprep.subr.bf16.mxu1 %v4664_v60  ;;  %v2226_v60 = vunpack.c.h.bf16 %v2222_v41 }
 0x796   : > { %v2261_v54 = vpop.f32.mrf.mxu0  ;;  %v2302_v43 = vpop.f32.mrf.mxu1 }
 0x797   : > { %v2309_v45 = vadd.f32 %v2261_v54, %v2223_v52  ;;  %v2311_v1 = vadd.f32 %v2302_v43, %v2225_v49 }
 0x798   : > { %v2263_v46 = vpop.f32.mrf.mxu0  ;;  %v2304_v47 = vpop.f32.mrf.mxu1 }
 0x799   : > { %v2313_v48 = vmul.f32 0.5, %v2309_v45  ;;  %v2310_v50 = vadd.f32 %v2263_v46, %v2224_v53  ;;  %v2312_v2 = vadd.f32 %v2304_v47, %v2226_v60  ;;  %v3633_v60 = vld [vmem:[%s4486_s3 + $0xc8] ss:$16 sps:$4 sm:$0xff]  }
 0x79a   : > { %v2265_v56 = vpop.f32.mrf.mxu0  ;;  %v2306_v61 = vpop.f32.mrf.mxu1 }
 0x79b   : > { %3586 = vtanh.f32 %v2313_v48  ;;  %v2317_v62 = vmul.f32 0.5, %v2310_v50  ;;  %v2322_v3 = vmul.f32 0.5, %v2312_v2  ;;  %v3628_v61 = vld [vmem:[%s4486_s3 + $0xe0] ss:$16 sps:$4 sm:$0xff]   ;;  %v3634_v2 = vld [vmem:[%s4486_s3 + $0xa4] ss:$16 sps:$4 sm:$0xff]  }
 0x79c   : > { %v2266_v63 = vpop.f32.mrf.mxu0  ;;  %v2307_v57 = vpop.f32.mrf.mxu1 }
 0x79d   : > { %3588 = vtanh.f32 %v2317_v62  ;;  %v3629_v62 = vld [vmem:[%s4486_s3 + $0xe8] ss:$16 sps:$4 sm:$0xff]   ;;  %v3630_v63 = vld [vmem:[%s4486_s3 + $0xc4] ss:$16 sps:$4 sm:$0xff]   ;;  %v3631_v57 = vld [vmem:[%s4486_s3 + $0xcc] ss:$16 sps:$4 sm:$0xff]  }
 0x79e   : > { %3590 = vtanh.f32 %v2311_v1  ;;  %v3632_v1 = vld [vmem:[%s4486_s3 + $0xc0] ss:$16 sps:$4 sm:$0xff]  }
 0x79f   : > { %3592 = vtanh.f32 %v2322_v3  ;;  %v3635_v3 = vld [vmem:[%s4486_s3 + $0xac] ss:$16 sps:$4 sm:$0xff]  }
 0x7a8   : > { %v3587_v4 = vpop.eup %3586 }
 0x7a9   : > { %v2315_v5 = vadd.f32 1.0, %v3587_v4  ;;  %v3636_v4 = vld [vmem:[%s4486_s3 + $0xa0] ss:$16 sps:$4 sm:$0xff]  }
 0x7aa   : > { %v3589_v6 = vpop.eup %3588 }
 0x7ab   : > { %v2316_v7 = vmul.f32 0.5, %v2315_v5  ;;  %v2319_v8 = vadd.f32 1.0, %v3589_v6  ;;  %v3591_v10 = vpop.eup %3590  ;;  %v3637_v5 = vld [vmem:[%s4486_s3 + $0xa8] ss:$16 sps:$4 sm:$0xff]   ;;  %v3638_v6 = vld [vmem:[%s4486_s3 + $0x84] ss:$16 sps:$4 sm:$0xff]  }
 0x7ac   : > { %v3593_v13 = vpop.eup %3592 }
 0x7ad   : > { %v2320_v9 = vmul.f32 0.5, %v2319_v8  ;;  %v2327_v0 = vmul.f32 %v3591_v10, %v2316_v7  ;;  %v2324_v44 = vadd.f32 1.0, %v3593_v13  ;;  %v3640_v7 = vld [vmem:[%s4486_s3 + $0x80] ss:$16 sps:$4 sm:$0xff]   ;;  %v3641_v8 = vld [vmem:[%s4486_s3 + $0x88] ss:$16 sps:$4 sm:$0xff]  }
 0x7ae   : > { %v3643_v10 = vld [vmem:[%s4486_s3 + $0x6c] ss:$16 sps:$4 sm:$0xff]  }
 0x7af   : > { %v2326_v11 = vmul.f32 %v2320_v9, %v4941_v51  ;;  %v2325_v52 = vmul.f32 0.5, %v2324_v44  ;;  %v3642_v9 = vld [vmem:[%s4486_s3 + $0x64] ss:$16 sps:$4 sm:$0xff]   ;;  %v3647_v13 = vld [vmem:[%s4486_s3 + $0x4c] ss:$16 sps:$4 sm:$0xff]  }
 0x7b0   : > { %v3648_v44 = vld [vmem:[%s4486_s3 + $0x40] ss:$16 sps:$4 sm:$0xff]  }
 0x7b1   : > { %v4980_v12 = vadd.f32 %v2327_v0, %v2326_v11  ;;  %v3644_v11 = vld [vmem:[%s4486_s3 + $0x60] ss:$16 sps:$4 sm:$0xff]   ;;  %v3645_v0 = vld [vmem:[%s4486_s3 + $0x68] ss:$16 sps:$4 sm:$0xff]  }
 0x7b3   : > { %3594 = vtanh.f32 %v4980_v12 }
 0x7c0   : > { %v3595_v53 = vpop.eup %3594 }
 0x7c1   : > { %v2330_v54 = vmul.f32 %v3595_v53, %v2325_v52  ;;  %v3649_v52 = vld [vmem:[%s4486_s3 + $0x48] ss:$16 sps:$4 sm:$0xff]   ;;  %v3650_v53 = vld [vmem:[%s4486_s3 + $0x24] ss:$16 sps:$4 sm:$0xff]  }
 0x7c3   : > { %v2331_v41 = vpack.c.bf16 %v2330_v54, %v2330_v54  ;;  %v3651_v54 = vld [vmem:[%s4486_s3 + $0x2c] ss:$16 sps:$4 sm:$0xff]  }
 0x7c5   : > { %2332 = vst [vmem:[%s4500_s14 + $0x10] sm:$0xf] %v2331_v41  ;;  %2372 = vmatmul.mubr.bf16.vlgmr.msra.gmra.mxu0 %v2331_v41  ;;  %2413 = vmatmul.mubr.bf16.vlgmr.msra.gmra.mxu1 %v2331_v41  ;;  %v3652_v41 = vld [vmem:[%s4486_s3 + $0x20] ss:$16 sps:$4 sm:$0xff]  }
 0x7c6   : > { %2452 = vmatpush1.bf16.msra.mxu0 %v4658_v58  ;;  %2493 = vmatpush1.bf16.msra.mxu1 %v4667_v55  ;;  %v3626_v58 = vld [vmem:[%s4486_s3 + $0xe4] ss:$16 sps:$4 sm:$0xff]   ;;  %v3627_v55 = vld [vmem:[%s4486_s3 + $0xec] ss:$16 sps:$4 sm:$0xff]  }
 0x7c7   : > { %2453 = vmatprep.subr.bf16.mxu0 %v4671_v14  ;;  %2494 = vmatprep.subr.bf16.mxu1 %v4678_v16  ;;  %v2333_v14 = vld [vmem:[#allocation2 + $0x10] sm:$0xff] }
 0x7c8   : > { %2483 = vmatprep.mubr.bf16.mxu0 %v4075_v59  ;;  %2524 = vmatprep.mubr.bf16.mxu1 %v4075_v59  ;;  %v2336_v16 = vunpack.c.h.bf16 %v2333_v14 }
 0x7ca   : > { %2454 = vmatpush1.bf16.msra.mxu0 %v4674_v15  ;;  %2495 = vmatpush1.bf16.msra.mxu1 %v4683_v17  ;;  %v2335_v15 = vunpack.c.l.bf16 %v2333_v14  ;;  %v3655_v14 = vld [vmem:[%s4486_s3 + $0xc] ss:$16 sps:$4 sm:$0xff]  }
 0x7cb   : > { %2455 = vmatprep.subr.bf16.mxu0 %v4687_v18  ;;  %2496 = vmatprep.subr.bf16.mxu1 %v4694_v20  ;;  %v2334_v18 = vld [vmem:[#allocation2 + $0x38] sm:$0xff] }
 0x7ce   : > { %2456 = vmatpush1.bf16.msra.mxu0 %v4691_v19  ;;  %2497 = vmatpush1.bf16.msra.mxu1 %v4702_v22 }
 0x7cf   : > { %2457 = vmatprep.subr.bf16.mxu0 %v4698_v21  ;;  %2498 = vmatprep.subr.bf16.mxu1 %v4706_v23 }
 0x7d2   : > { %2458 = vmatpush1.bf16.msra.mxu0 %v4710_v24  ;;  %2499 = vmatpush1.bf16.msra.mxu1 %v4718_v26  ;;  %v2337_v24 = vunpack.c.l.bf16 %v2334_v18 }
 0x7d3   : > { %2459 = vmatprep.subr.bf16.mxu0 %v4714_v25  ;;  %2500 = vmatprep.subr.bf16.mxu1 %v4722_v27 }
 0x7d6   : > { %2460 = vmatpush1.bf16.msra.mxu0 %v4726_v28  ;;  %2501 = vmatpush1.bf16.msra.mxu1 %v4734_v30 }
 0x7d7   : > { %2461 = vmatprep.subr.bf16.mxu0 %v4730_v29  ;;  %2502 = vmatprep.subr.bf16.mxu1 %v4738_v31 }
 0x7da   : > { %2462 = vmatpush1.bf16.msra.mxu0 %v4742_v32  ;;  %2503 = vmatpush1.bf16.msra.mxu1 %v4750_v34  ;;  %v2338_v32 = vunpack.c.h.bf16 %v2334_v18 }
 0x7db   : > { %2463 = vmatprep.subr.bf16.mxu0 %v4746_v33  ;;  %2504 = vmatprep.subr.bf16.mxu1 %v4754_v35 }
 0x7de   : > { %2464 = vmatpush1.bf16.msra.mxu0 %v4758_v36  ;;  %2505 = vmatpush1.bf16.msra.mxu1 %v4766_v38 }
 0x7df   : > { %2465 = vmatprep.subr.bf16.mxu0 %v4762_v37  ;;  %2506 = vmatprep.subr.bf16.mxu1 %v4770_v39 }
 0x7e2   : > { %2466 = vmatpush1.bf16.msra.mxu0 %v4774_v40  ;;  %2507 = vmatpush1.bf16.msra.mxu1 %v4781_v42 }
 0x7e3   : > { %2563 = vmatprep.subr.bf16.mxu0 %v3626_v58  ;;  %2604 = vmatprep.subr.bf16.mxu1 %v3627_v55  ;;  %v3653_v58 = vld [vmem:[%s4486_s3 + $0x28] ss:$16 sps:$4 sm:$0xff]   ;;  %v3654_v55 = vld [vmem:[%s4486_s3 + $0x4] ss:$16 sps:$4 sm:$0xff]  }
 0x885   : > { %v2373_v17 = vpop.f32.mrf.mxu0  ;;  %v2414_v19 = vpop.f32.mrf.mxu1 }
 0x886   : > { %v2421_v20 = vadd.f32 %v2373_v17, %v2335_v15  ;;  %v2423_v31 = vadd.f32 %v2414_v19, %v2337_v24  ;;  %v3656_v15 = vld [vmem:[%s4486_s3] ss:$16 sps:$4 sm:$0xff]  }
 0x887   : > { %v2375_v21 = vpop.f32.mrf.mxu0  ;;  %v2416_v22 = vpop.f32.mrf.mxu1  ;;  %v2445_v17 = vld [vmem:[#allocation2 + $0x60] sm:$0xff] }
 0x888   : > { %v2425_v23 = vmul.f32 0.5, %v2421_v20  ;;  %v2422_v25 = vadd.f32 %v2375_v21, %v2336_v16  ;;  %v2424_v33 = vadd.f32 %v2416_v22, %v2338_v32  ;;  %v3657_v16 = vld [vmem:[%s4486_s3 + $0x8] ss:$16 sps:$4 sm:$0xff]   ;;  %v2447_v18 = vunpack.c.l.bf16 %v2445_v17  ;;  %v2446_v21 = vld [vmem:[#allocation2 + $0x70] sm:$0xff] }
 0x889   : > { %v2377_v26 = vpop.f32.mrf.mxu0  ;;  %v2418_v27 = vpop.f32.mrf.mxu1  ;;  %v2448_v19 = vunpack.c.h.bf16 %v2445_v17 }
 0x88a   : > { %3596 = vtanh.f32 %v2425_v23  ;;  %v2429_v28 = vmul.f32 0.5, %v2422_v25  ;;  %v2434_v34 = vmul.f32 0.5, %v2424_v33  ;;  %v2449_v27 = vunpack.c.l.bf16 %v2446_v21 }
 0x88b   : > { %v2378_v29 = vpop.f32.mrf.mxu0  ;;  %v2419_v30 = vpop.f32.mrf.mxu1 }
 0x88c   : > { %3598 = vtanh.f32 %v2429_v28 }
 0x88d   : > { %3600 = vtanh.f32 %v2423_v31 }
 0x88e   : > { %3602 = vtanh.f32 %v2434_v34 }
 0x897   : > { %v3597_v35 = vpop.eup %3596 }
 0x898   : > { %v2427_v36 = vadd.f32 1.0, %v3597_v35  ;;  %v2450_v35 = vunpack.c.h.bf16 %v2446_v21 }
 0x899   : > { %v3599_v37 = vpop.eup %3598 }
 0x89a   : > { %v2428_v38 = vmul.f32 0.5, %v2427_v36  ;;  %v2431_v39 = vadd.f32 1.0, %v3599_v37  ;;  %v3601_v42 = vpop.eup %3600 }
 0x89b   : > { %v3603_v46 = vpop.eup %3602 }
 0x89c   : > { %v2432_v40 = vmul.f32 0.5, %v2431_v39  ;;  %v2439_v43 = vmul.f32 %v3601_v42, %v2428_v38  ;;  %v2436_v47 = vadd.f32 1.0, %v3603_v46 }
 0x89e   : > { %v2438_v51 = vmul.f32 %v2432_v40, %v4980_v12  ;;  %v2437_v48 = vmul.f32 0.5, %v2436_v47  ;;  %v3646_v12 = vld [vmem:[%s4486_s3 + $0x44] ss:$16 sps:$4 sm:$0xff]  }
 0x8a0   : > { %v5019_v45 = vadd.f32 %v2439_v43, %v2438_v51 }
 0x8a2   : > { %3604 = vtanh.f32 %v5019_v45 }
 0x8af   : > { %v3605_v49 = vpop.eup %3604 }
 0x8b0   : > { %v2442_v50 = vmul.f32 %v3605_v49, %v2437_v48 }
 0x8b2   : > { %v2443_v56 = vpack.c.bf16 %v2442_v50, %v2442_v50 }
 0x8b4   : > { %2444 = vst [vmem:[%s4500_s14 + $0x14] sm:$0xf] %v2443_v56  ;;  %2484 = vmatmul.mubr.bf16.vlgmr.msra.gmra.mxu0 %v2443_v56  ;;  %2525 = vmatmul.mubr.bf16.vlgmr.msra.gmra.mxu1 %v2443_v56 }
 0x8b5   : > { %2564 = vmatpush1.bf16.msra.mxu0 %v3628_v61  ;;  %2605 = vmatpush1.bf16.msra.mxu1 %v3629_v62 }
 0x8b6   : > { %2565 = vmatprep.subr.bf16.mxu0 %v3630_v63  ;;  %2606 = vmatprep.subr.bf16.mxu1 %v3631_v57 }
 0x8b7   : > { %2595 = vmatprep.mubr.bf16.mxu0 %v4075_v59  ;;  %2636 = vmatprep.mubr.bf16.mxu1 %v4075_v59  ;;  %v3639_v59 = vld [vmem:[%s4486_s3 + $0x8c] ss:$16 sps:$4 sm:$0xff]  }
 0x8b9   : > { %2566 = vmatpush1.bf16.msra.mxu0 %v3632_v1  ;;  %2607 = vmatpush1.bf16.msra.mxu1 %v3633_v60  ;;  %v2557_v1 = vld [vmem:[#allocation2 + $0x78] sm:$0xff] }
 0x8ba   : > { %2567 = vmatprep.subr.bf16.mxu0 %v3634_v2  ;;  %2608 = vmatprep.subr.bf16.mxu1 %v3635_v3  ;;  %v2559_v60 = vunpack.c.l.bf16 %v2557_v1  ;;  %v2560_v2 = vunpack.c.h.bf16 %v2557_v1 }
 0x8bd   : > { %2568 = vmatpush1.bf16.msra.mxu0 %v3636_v4  ;;  %2609 = vmatpush1.bf16.msra.mxu1 %v3637_v5  ;;  %v2558_v4 = vld [vmem:[#allocation2 + $0x28] sm:$0xff] }
 0x8be   : > { %2569 = vmatprep.subr.bf16.mxu0 %v3638_v6  ;;  %2610 = vmatprep.subr.bf16.mxu1 %v3639_v59 }
 0x8c1   : > { %2570 = vmatpush1.bf16.msra.mxu0 %v3640_v7  ;;  %2611 = vmatpush1.bf16.msra.mxu1 %v3641_v8  ;;  %v2561_v8 = vunpack.c.l.bf16 %v2558_v4 }
 0x8c2   : > { %2571 = vmatprep.subr.bf16.mxu0 %v3642_v9  ;;  %2612 = vmatprep.subr.bf16.mxu1 %v3643_v10 }
 0x8c5   : > { %2572 = vmatpush1.bf16.msra.mxu0 %v3644_v11  ;;  %2613 = vmatpush1.bf16.msra.mxu1 %v3645_v0 }
 0x8c6   : > { %2573 = vmatprep.subr.bf16.mxu0 %v3646_v12  ;;  %2614 = vmatprep.subr.bf16.mxu1 %v3647_v13 }
 0x8c9   : > { %2574 = vmatpush1.bf16.msra.mxu0 %v3648_v44  ;;  %2615 = vmatpush1.bf16.msra.mxu1 %v3649_v52  ;;  %v2562_v52 = vunpack.c.h.bf16 %v2558_v4 }
 0x8ca   : > { %2575 = vmatprep.subr.bf16.mxu0 %v3650_v53  ;;  %2616 = vmatprep.subr.bf16.mxu1 %v3651_v54 }
 0x8cd   : > { %2576 = vmatpush1.bf16.msra.mxu0 %v3652_v41  ;;  %2617 = vmatpush1.bf16.msra.mxu1 %v3653_v58 }
 0x8ce   : > { %2577 = vmatprep.subr.bf16.mxu0 %v3654_v55  ;;  %2618 = vmatprep.subr.bf16.mxu1 %v3655_v14 }
 0x8d1   : > { %2578 = vmatpush1.bf16.msra.mxu0 %v3656_v15  ;;  %2619 = vmatpush1.bf16.msra.mxu1 %v3657_v16 }
 0x974   : > { %v2485_v20 = vpop.f32.mrf.mxu0  ;;  %v2526_v22 = vpop.f32.mrf.mxu1 }
 0x975   : > { %v2533_v23 = vadd.f32 %v2485_v20, %v2447_v18  ;;  %v2535_v34 = vadd.f32 %v2526_v22, %v2449_v27 }
 0x976   : > { %v2487_v24 = vpop.f32.mrf.mxu0  ;;  %v2528_v25 = vpop.f32.mrf.mxu1 }
 0x977   : > { %v2537_v26 = vmul.f32 0.5, %v2533_v23  ;;  %v2534_v28 = vadd.f32 %v2487_v24, %v2448_v19  ;;  %v2536_v36 = vadd.f32 %v2528_v25, %v2450_v35 }
 0x978   : > { %v2489_v29 = vpop.f32.mrf.mxu0  ;;  %v2530_v30 = vpop.f32.mrf.mxu1 }
 0x979   : > { %3606 = vtanh.f32 %v2537_v26  ;;  %v2541_v31 = vmul.f32 0.5, %v2534_v28  ;;  %v2546_v37 = vmul.f32 0.5, %v2536_v36 }
 0x97a   : > { %v2490_v32 = vpop.f32.mrf.mxu0  ;;  %v2531_v33 = vpop.f32.mrf.mxu1 }
 0x97b   : > { %3608 = vtanh.f32 %v2541_v31 }
 0x97c   : > { %3610 = vtanh.f32 %v2535_v34 }
 0x97d   : > { %3612 = vtanh.f32 %v2546_v37 }
 0x986   : > { %v3607_v38 = vpop.eup %3606 }
 0x987   : > { %v2539_v39 = vadd.f32 1.0, %v3607_v38 }
 0x988   : > { %v3609_v40 = vpop.eup %3608 }
 0x989   : > { %v2540_v42 = vmul.f32 0.5, %v2539_v39  ;;  %v2543_v51 = vadd.f32 1.0, %v3609_v40  ;;  %v3611_v46 = vpop.eup %3610 }
 0x98a   : > { %v3613_v50 = vpop.eup %3612 }
 0x98b   : > { %v2544_v43 = vmul.f32 0.5, %v2543_v51  ;;  %v2551_v48 = vmul.f32 %v3611_v46, %v2540_v42  ;;  %v2548_v56 = vadd.f32 1.0, %v3613_v50 }
 0x98d   : > { %v2550_v47 = vmul.f32 %v2544_v43, %v5019_v45  ;;  %v2549_v61 = vmul.f32 0.5, %v2548_v56 }
 0x98f   : > { %v2552_v49 = vadd.f32 %v2551_v48, %v2550_v47 }
 0x991   : > { %3614 = vtanh.f32 %v2552_v49 }
 0x99e   : > { %v3615_v62 = vpop.eup %3614 }
 0x99f   : > { %v2554_v63 = vmul.f32 %v3615_v62, %v2549_v61 }
 0x9a1   : > { %v2555_v57 = vpack.c.bf16 %v2554_v63, %v2554_v63 }
 0x9a3   : > { %2556 = vst [vmem:[%s4500_s14 + $0x18] sm:$0xf] %v2555_v57  ;;  %2596 = vmatmul.mubr.bf16.vlgmr.msra.gmra.mxu0 %v2555_v57  ;;  %2637 = vmatmul.mubr.bf16.vlgmr.msra.gmra.mxu1 %v2555_v57 }
 0xa63   : > { %v2597_v3 = vpop.f32.mrf.mxu0  ;;  %v2638_v5 = vpop.f32.mrf.mxu1 }
 0xa64   : > { %v2645_v6 = vadd.f32 %v2597_v3, %v2559_v60  ;;  %v2647_v44 = vadd.f32 %v2638_v5, %v2561_v8 }
 0xa65   : > { %v2599_v45 = vpop.f32.mrf.mxu0  ;;  %v2640_v59 = vpop.f32.mrf.mxu1 }
 0xa66   : > { %v2649_v7 = vmul.f32 0.5, %v2645_v6  ;;  %v2646_v9 = vadd.f32 %v2599_v45, %v2560_v2  ;;  %v2648_v53 = vadd.f32 %v2640_v59, %v2562_v52 }
 0xa67   : > { %v2601_v10 = vpop.f32.mrf.mxu0  ;;  %v2642_v11 = vpop.f32.mrf.mxu1 }
 0xa68   : > { %3616 = vtanh.f32 %v2649_v7  ;;  %v2653_v0 = vmul.f32 0.5, %v2646_v9  ;;  %v2658_v54 = vmul.f32 0.5, %v2648_v53 }
 0xa69   : > { %v2602_v12 = vpop.f32.mrf.mxu0  ;;  %v2643_v13 = vpop.f32.mrf.mxu1 }
 0xa6a   : > { %3618 = vtanh.f32 %v2653_v0 }
 0xa6b   : > { %3620 = vtanh.f32 %v2647_v44 }
 0xa6c   : > { %3622 = vtanh.f32 %v2658_v54 }
 0xa75   : > { %v3617_v41 = vpop.eup %3616 }
 0xa76   : > { %v2651_v58 = vadd.f32 1.0, %v3617_v41 }
 0xa77   : > { %v3619_v55 = vpop.eup %3618 }
 0xa78   : > { %v2652_v14 = vmul.f32 0.5, %v2651_v58  ;;  %v2655_v15 = vadd.f32 1.0, %v3619_v55  ;;  %v3621_v17 = vpop.eup %3620 }
 0xa79   : > { %v3623_v21 = vpop.eup %3622 }
 0xa7a   : > { %v2656_v16 = vmul.f32 0.5, %v2655_v15  ;;  %v2663_v19 = vmul.f32 %v3621_v17, %v2652_v14  ;;  %v2660_v22 = vadd.f32 1.0, %v3623_v21 }
 0xa7c   : > { %v2662_v18 = vmul.f32 %v2656_v16, %v2552_v49  ;;  %v2661_v23 = vmul.f32 0.5, %v2660_v22 }
 0xa7e   : > { %v2664_v20 = vadd.f32 %v2663_v19, %v2662_v18 }
 0xa80   : > { %3624 = vtanh.f32 %v2664_v20  ;;  %2670 = vst [vmem:[%s574_s12] sm:$0xff] %v2664_v20  ;;  %s5346_s12 = scalar_lea.vmem [#allocation14], %s4465_s21 }
 0xa8d   : > { %v3625_v24 = vpop.eup %3624 }
 0xa8e   : > { %v2666_v25 = vmul.f32 %v3625_v24, %v2661_v23 }
 0xa90   : > { %v2667_v26 = vpack.c.bf16 %v2666_v25, %v2666_v25  ;;  %2669 = vst [vmem:[%s5346_s12] sm:$0xff] %v2666_v25 }
 0xa91   : > { %3837 = shalt.err (!%p3834_p4)
}
 0xa92   : > { %s3838_s21 = scalar_lea.hbm %s5066_s7, 128  ;;  %s3842_s3 = scalar_lea.hbm %s5341_s26, 512 }
 0xa93   : > { %p3839_p6 = scmp.ne.s32.totalorder %s5066_s7, %s3838_s21  ;;  %p3843_p9 = scmp.lt.s32.totalorder %s5066_s7, %s5341_s26 }
 0xa94   : > { %p3844_p0 = scmp.lt.s32.totalorder %s3842_s3, %s3838_s21 }
 0xa95   : > { %p3840_p3 = pnand %p3839_p6, %p5347_p13 }
 0xa96   : > { %p3845_p7 = por %p3844_p0, %p3843_p9 }
 0xa97   : > { %p3841_p1 = pneg %p3840_p3 }
 0xa99   : > { %p3846_p11 = pnand %p3845_p7, %p3841_p1 }
 0xa9b   : > { %3849 = shalt.err (!%p3846_p11)
}
 0xa9c   : > { %3213 = dma.vmem_to_hbm [thread:$0]  (%p5347_p13), %s5072_s30, 128, %s5066_s7, %s2677_s22   ;;  %2668 = vst [vmem:[%s4500_s14 + $0x1c] sm:$0xf] %v2667_v26 }
 0xa9d   : > { %s3850_s18 = scalar_lea.vmem %s5086_s0, 128  ;;  %s4077_s15 = smov [#allocation16]  }
 0xa9e   : > { %p3851_p5 = scmp.ne.s32.totalorder %s5086_s0, %s3850_s18  ;;  %s3854_s29 = sshll.u32 %s4077_s15, 4  ;;  %s3855_s29 = int_to_ptr.vmem [resolvable:$false] %s3854_s29 }
 0xa9f   : > { %s3856_s27 = scalar_lea.vmem %s3855_s29, 256  ;;  %p3857_p8 = scmp.lt.s32.totalorder %s5086_s0, %s3855_s29 }
 0xaa0   : > { %p3852_p10 = pnand %p3851_p5, %p5347_p13  ;;  %p3858_p2 = scmp.lt.s32.totalorder %s3856_s27, %s3850_s18 }
 0xaa2   : > { %p3853_p12 = pneg %p3852_p10  ;;  %p3859_p4 = por %p3858_p2, %p3857_p8 }
 0xaa4   : > { %p3860_p6 = pnand %p3859_p4, %p3853_p12 }
 0xaa6   : > { %3863 = shalt.err (!%p3860_p6)
}
 0xaa7   : > { %s3864_s30 = scalar_lea.hbm %s5077_s1, 128  ;;  %s3868_s21 = scalar_lea.hbm %s5343_s6, 512 }
 0xaa8   : > { %p3865_p3 = scmp.ne.s32.totalorder %s5077_s1, %s3864_s30  ;;  %p3869_p0 = scmp.lt.s32.totalorder %s5077_s1, %s5343_s6 }
 0xaa9   : > { %p3870_p7 = scmp.lt.s32.totalorder %s3868_s21, %s3864_s30 }
 0xaaa   : > { %p3866_p1 = pnand %p3865_p3, %p5347_p13 }
 0xaab   : > { %p3871_p11 = por %p3870_p7, %p3869_p0 }
 0xaac   : > { %p3867_p9 = pneg %p3866_p1 }
 0xaae   : > { %p3872_p5 = pnand %p3871_p11, %p3867_p9 }
 0xab0   : > { %3875 = shalt.err (!%p3872_p5)
}
 0xab1   : > { %3214 = dma.vmem_to_hbm [thread:$0]  (%p5347_p13), %s5086_s0, 128, %s5077_s1, %s2677_s22  }
 0xab2   : > { %s2672_s3 = scalar_lea.sflag [#allocation5], %s4454_s9  ;;  %s3876_s19 = scalar_lea.vmem %s5084_s2, 512 }
 0xab3   : > { %p3877_p10 = scmp.ne.s32.totalorder %s5084_s2, %s3876_s19  ;;  %p5348_p12 = scmp.ne.s32.totalorder %s5301_s20, 0 }
 0xab4   : > { %s4078_s12 = smov [#allocation13]  }
 0xab5   : > { %p3878_p8 = pnand %p3877_p10, %p5348_p12  ;;  %s3880_s18 = sshll.u32 %s4078_s12, 4  ;;  %s3881_s18 = int_to_ptr.vmem [resolvable:$false] %s3880_s18 }
 0xab6   : > { %s3882_s10 = scalar_lea.vmem %s3881_s18, 1024  ;;  %p3883_p4 = scmp.lt.s32.totalorder %s5084_s2, %s3881_s18 }
 0xab7   : > { %p3879_p2 = pneg %p3878_p8  ;;  %p3884_p6 = scmp.lt.s32.totalorder %s3882_s10, %s3876_s19 }
 0xab9   : > { %p3885_p3 = por %p3884_p6, %p3883_p4 }
 0xabb   : > { %p3886_p1 = pnand %p3885_p3, %p3879_p2 }
 0xabd   : > { %3889 = shalt.err (!%p3886_p1)
}
 0xabe   : > { %s3890_s22 = scalar_lea.hbm %s5082_s23, 512  ;;  %s3894_s1 = scalar_lea.hbm %s5345_s25, 1024 }
 0xabf   : > { %p3891_p13 = scmp.ne.s32.totalorder %s5082_s23, %s3890_s22  ;;  %p3895_p7 = scmp.lt.s32.totalorder %s5082_s23, %s5345_s25 }
 0xac0   : > { %p3896_p11 = scmp.lt.s32.totalorder %s3894_s1, %s3890_s22 }
 0xac1   : > { %p3892_p9 = pnand %p3891_p13, %p5348_p12 }
 0xac2   : > { %p3897_p5 = por %p3896_p11, %p3895_p7 }
 0xac3   : > { %p3893_p0 = pneg %p3892_p9 }
 0xac5   : > { %p3898_p10 = pnand %p3897_p5, %p3893_p0 }
 0xac7   : > { %3901 = shalt.err (!%p3898_p10)
}
 0xac8   : > { %s4079_s27 = smov 64   ;;  %s4080_s30 = smov 4  }
 0xac9   : > { %3212 = dma.vmem_to_hbm [thread:$0]  (%p5348_p12), %s5084_s2, 512, %s5082_s23, %s2672_s3, %s4079_s27, %s4079_s27, %s4080_s30  }
 0xaca PF: > { %p3251_p8 = scmp.ge.s32.totalorder %s4061_s24, 2  ;;  %s2740_s14 = sand.u32 1, %s4033_s17  }
 0xacb   : > { %p5349_p2 = scmp.ne.s32.totalorder %s5304_s4, 0  ;;  %s2741_s7 = scalar_lea.sflag [#allocation5], %s2740_s14 }
 0xacd   : > { %p3239_p4 = pnand %p3251_p8, %p5349_p2 }
 0xacf   : > { %p3240_p6 = pneg %p3239_p4 }
 0xad1   : > { %3991 = dma.done.wait (%p3240_p6), %s2741_s7, 512  }
 0xad2   : > { %3993 = vsyncadd (%p3240_p6), %s2741_s7, 4294966784  ;;  %s5350_s21 = sadd.s32 4294967294, %s4061_s24   ;;  %p5351_p3 = scmp.ne.s32.totalorder %s5292_s28, 0 }
 0xad3   : > { %s2749_s8 = sand.u32 1, %s5350_s21  }
 0xad4   : > { %p3242_p1 = pnand %p3251_p8, %p5351_p3  ;;  %s2750_s20 = scalar_lea.sflag [#allocation15], %s2749_s8 }
 0xad6   : > { %p3243_p13 = pneg %p3242_p1 }
 0xad8   : > { %3995 = dma.done.wait (%p3243_p13), %s2750_s20, 256  }
 0xad9   : > { %3997 = vsyncadd (%p3243_p13), %s2750_s20, 4294967040  ;;  %s33_s24 = sadd.s32 1, %s4061_s24   ;;  %s5353_s30 = sld [smem:[#allocation25_spill]] }
 0xada   : > { %p5168_p12 = scmp.ge.s32.totalorder %s33_s24, 6   ;;  %s5354_s10 = sld [smem:[#allocation26_spill]] }
 0xadb   : > { %s5355_s14 = sld [smem:[#allocation27_spill]]  ;;  %s5366_s12 = smov %s4017_s13 }
 0xadc   : > { %s5356_s15 = sld [smem:[#allocation28_spill]]  ;;  %s5184_s13 = smov 0  }
 0xadd   : > { %s5357_s16 = sld [smem:[#allocation40_spill]] }
 0xade   : > { %s5358_s4 = sld [smem:[#allocation29_spill]] }
 0xadf   : > { %s5359_s18 = sld [smem:[#allocation30_spill]] }
 0xae0   : > { %s5360_s19 = sld [smem:[#allocation41_spill]]  ;;  %32 = sbr.rel (!%p5168_p12) target bundleno = 27 (0x1b), region = 186 }
 0xae1   : > { %s5361_s20 = sld [smem:[#allocation33_spill]] }
 0xae2   : > { %s5362_s21 = sld [smem:[#allocation34_spill]] }
 0xae3   : > { %s5363_s22 = sld [smem:[#allocation35_spill]] }
 0xae4   : > { %s5364_s23 = sld [smem:[#allocation37_spill]]  ;;  %s5367_s17 = smov %s5358_s4 }
 0xae5   :  { %2764 = vsyncpa [#allocation4], 1 }
 0xae6   :  { %2766 = vsyncpa [#allocation4 + $0x1], 1 }
 0xae7   :  { %2767 = vsyncpa [#allocation7], 1 }
 0xae8   :  { %2769 = vsyncpa [#allocation7 + $0x1], 1 }
 0xae9   :  { %2770 = vsyncpa [#allocation10], 1 }
 0xaea   :  { %2771 = vsyncpa [#allocation5], 1 }
 0xaeb   :  { %2773 = vsyncpa [#allocation5 + $0x1], 1 }
 0xaec   :  { %2774 = vsyncpa [#allocation15], 1 }
 0xaed   :  { %2776 = vsyncpa [#allocation15 + $0x1], 1 }

</bundles_post_ra>
